<compile_context>
chip_gen: v6e
topology: v6e:2x2x1
jax: 0.10.0
libtpu: 0.0.40
codegen_flags: <defaults>
</compile_context>

<pallas_src>
import functools
import math

import numpy as np
import jax
import jax.numpy as jnp
from jax import lax
from jax.experimental import pallas as pl
from jax.experimental.pallas import tpu as pltpu

_VMEM_LIMIT = 32 * 1024 * 1024  # explicit scoped-VMEM budget (safe on v5e/v6e/v7x)


# ----------------------------------------------------------------------------
# Fused multi-head attention kernel
#   optional pre-projection of the query input (temporal_proj / spatial_proj),
#   fused QKV (self-attn) or Q + fused KV (cross-attn) projections,
#   per-head scaled-dot-product attention with optional in-kernel spatial gate / mask,
#   batched head-merge + output projection + residual + LayerNorm (+ non_pad_mask).
# ----------------------------------------------------------------------------
def _mha_kernel(*refs, n_head, d_k, d_v, inv_temp, self_attn,
                has_pre, gate_links, has_mask, has_npm):
    refs = list(refs)
    attn_ref = refs.pop()
    out_ref = refs.pop()
    it = iter(refs)
    x_ref = next(it)
    kv_ref = None if self_attn else next(it)
    if has_pre:
        pwT_ref = next(it)
        pb_ref = next(it)
    if self_attn:
        wqkvT_ref = next(it)
        bqkv_ref = next(it)
    else:
        wqT_ref = next(it)
        bq_ref = next(it)
        wkvT_ref = next(it)
        bkv_ref = next(it)
    woT_ref = next(it)
    bo_ref = next(it)
    g_ref = next(it)
    be_ref = next(it)
    gsrc_ref = next(it) if gate_links is not None else None
    mask_ref = next(it) if has_mask else None
    npm_ref = next(it) if has_npm else None

    bf16 = jnp.bfloat16
    f32 = jnp.float32
    Hdk = n_head * d_k

    x_mm = x_ref[0].astype(bf16)                                  # (Lq, Din) bf16 MXU input
    if has_pre:                                                   # fused nn.Linear pre-projection
        xq = jnp.dot(x_mm, pwT_ref[...], preferred_element_type=f32) + pb_ref[...]
        resid = xq                                                # residual = pre-projected input
        q_src = xq.astype(bf16)
    else:
        resid = x_ref[0].astype(f32)
        q_src = x_mm

    if self_attn:
        qkv = jnp.dot(q_src, wqkvT_ref[...], preferred_element_type=f32) + bqkv_ref[...]
        q = qkv[:, :Hdk]                                          # (Lq, H*dk)
        kv = qkv[:, Hdk:]                                         # (Lq, H*dk + H*dv), [K | V]
    else:
        q = jnp.dot(q_src, wqT_ref[...], preferred_element_type=f32) + bq_ref[...]
        kv = jnp.dot(kv_ref[0].astype(bf16), wkvT_ref[...],
                     preferred_element_type=f32) + bkv_ref[...]   # (Lk, H*dk + H*dv)

    q_bf = (q * inv_temp).astype(bf16)                            # fold 1/sqrt(d_k), cast once
    kv_bf = kv.astype(bf16)

    mask_bias = None
    if has_mask:
        # Hoisted out of the head loop: one additive bias reused by all heads.
        mask_bias = mask_ref[0].astype(f32) * jnp.float32(-1e30)

    ov_list = []
    for h in range(n_head):                                       # static unrolled head loop
        qh = q_bf[:, h * d_k:(h + 1) * d_k]                       # (Lq, dk)
        kh = kv_bf[:, h * d_k:(h + 1) * d_k]                      # (Lk, dk)
        vh = kv_bf[:, Hdk + h * d_v: Hdk + (h + 1) * d_v]         # (Lk, dv)
        s = lax.dot_general(qh, kh, (((1,), (1,)), ((), ())),
                            preferred_element_type=f32)           # (Lq, Lk) f32
        if gate_links is not None:
            # Build this head's spatial gate in-kernel from the compact temporal
            # attention (Lq, Lt): each (t, s>1) link expands to s repeats of its
            # t temporal columns (matches unsqueeze/expand/transpose/reshape).
            gh = gsrc_ref[0, h]                                   # (Lq, Lt) f32
            parts = []
            i0 = 0
            for (t, sgl) in gate_links:
                if sgl > 1:
                    blk = gh[:, i0:i0 + t]
                    parts.extend([blk] * sgl)
                i0 += t
            gate_h = parts[0] if len(parts) == 1 else jnp.concatenate(parts, axis=-1)
            s = s * gate_h
        if mask_bias is not None:
            s = s + mask_bias
        mx = jnp.max(s, axis=-1, keepdims=True)
        e = jnp.exp(s - mx)
        p = e * pl.reciprocal(jnp.sum(e, axis=-1, keepdims=True), approx=True)
        attn_ref[0, h] = p.astype(attn_ref.dtype)
        ov_list.append(jnp.dot(p.astype(bf16), vh, preferred_element_type=f32))

    # Batched head merge: one (Lq, H*dv) @ (H*dv, d_attn) matmul instead of H
    # per-head matmuls with K=d_v.
    heads = jnp.concatenate(ov_list, axis=-1).astype(bf16)        # (Lq, H*dv)
    y = jnp.dot(heads, woT_ref[...], preferred_element_type=f32) + bo_ref[...] + resid
    mu = jnp.mean(y, axis=-1, keepdims=True)
    var = jnp.mean(jnp.square(y - mu), axis=-1, keepdims=True)
    out = (y - mu) * lax.rsqrt(var + 1e-5) * g_ref[...] + be_ref[...]
    if has_npm:
        out = out * npm_ref[0]
    out_ref[0] = out.astype(out_ref.dtype)


def fused_mha(p, q_in, kv_in, n_head, d_k, d_v, *, mask=None,
              gate_src=None, gate_links=None,
              pre_wT=None, pre_b=None, npm=None,
              self_attn=False, out_dtype=None):
    B, Lq, Dq = q_in.shape
    if self_attn:
        Lk = Lq
    else:
        Lk, Dkv = kv_in.shape[1], kv_in.shape[2]
    d_attn = p["w_fcT"].shape[1]
    H = n_head
    has_pre = pre_wT is not None
    has_gate = gate_src is not None
    has_mask = mask is not None
    has_npm = npm is not None
    out_dtype = q_in.dtype if out_dtype is None else out_dtype

    inputs, in_specs = [], []

    def add(arr, spec):
        inputs.append(arr)
        in_specs.append(spec)

    add(q_in, pl.BlockSpec((1, Lq, Dq), lambda b: (b, 0, 0)))
    if not self_attn:
        add(kv_in, pl.BlockSpec((1, Lk, Dkv), lambda b: (b, 0, 0)))
    if has_pre:
        add(pre_wT, pl.BlockSpec(pre_wT.shape, lambda b: (0, 0)))
        add(pre_b, pl.BlockSpec(pre_b.shape, lambda b: (0, 0)))
    if self_attn:
        add(p["w_qkvT"], pl.BlockSpec(p["w_qkvT"].shape, lambda b: (0, 0)))
        add(p["b_qkv"], pl.BlockSpec(p["b_qkv"].shape, lambda b: (0, 0)))
    else:
        add(p["w_qT"], pl.BlockSpec(p["w_qT"].shape, lambda b: (0, 0)))
        add(p["b_q"], pl.BlockSpec(p["b_q"].shape, lambda b: (0, 0)))
        add(p["w_kvT"], pl.BlockSpec(p["w_kvT"].shape, lambda b: (0, 0)))
        add(p["b_kv"], pl.BlockSpec(p["b_kv"].shape, lambda b: (0, 0)))
    add(p["w_fcT"], pl.BlockSpec(p["w_fcT"].shape, lambda b: (0, 0)))
    add(p["b_fc"], pl.BlockSpec(p["b_fc"].shape, lambda b: (0, 0)))
    add(p["ln_g"], pl.BlockSpec(p["ln_g"].shape, lambda b: (0, 0)))
    add(p["ln_b"], pl.BlockSpec(p["ln_b"].shape, lambda b: (0, 0)))
    if has_gate:
        Lt = gate_src.shape[-1]
        add(gate_src.astype(jnp.float32),
            pl.BlockSpec((1, H, Lq, Lt), lambda b: (b, 0, 0, 0)))
    if has_mask:
        # Mask shipped as bf16 (half the DMA/VMEM of int32); expanded to an additive
        # bias once in-kernel.
        add(mask.astype(jnp.bfloat16), pl.BlockSpec((1, Lq, Lk), lambda b: (b, 0, 0)))
    if has_npm:
        add(npm.astype(jnp.float32), pl.BlockSpec((1, Lq, 1), lambda b: (b, 0, 0)))

    kern = functools.partial(
        _mha_kernel, n_head=H, d_k=d_k, d_v=d_v, inv_temp=1.0 / math.sqrt(d_k),
        self_attn=self_attn, has_pre=has_pre,
        gate_links=gate_links if has_gate else None,
        has_mask=has_mask, has_npm=has_npm)

    out, attn = pl.pallas_call(
        kern,
        out_shape=(jax.ShapeDtypeStruct((B, Lq, d_attn), out_dtype),
                   jax.ShapeDtypeStruct((B, H, Lq, Lk), jnp.float32)),
        grid=(B,),
        in_specs=in_specs,
        out_specs=(pl.BlockSpec((1, Lq, d_attn), lambda b: (b, 0, 0)),
                   pl.BlockSpec((1, H, Lq, Lk), lambda b: (b, 0, 0, 0))),
        compiler_params=pltpu.CompilerParams(
            dimension_semantics=("parallel",),
            vmem_limit_bytes=_VMEM_LIMIT),
    )(*inputs)
    return out, attn


# ----------------------------------------------------------------------------
# Fused spat_dec_proj + position-wise FFN (+ residual + LayerNorm + non_pad_mask)
# ----------------------------------------------------------------------------
def _proj_ffn_kernel(x_ref, pwT_ref, pb_ref, w1T_ref, b1_ref, w2T_ref, b2_ref,
                     g_ref, be_ref, *rest, has_npm):
    if has_npm:
        npm_ref, o_ref = rest
    else:
        (o_ref,) = rest
    bf16 = jnp.bfloat16
    f32 = jnp.float32
    x = jnp.dot(x_ref[0].astype(bf16), pwT_ref[...],
                preferred_element_type=f32) + pb_ref[...]        # spat_dec_proj
    h = jnp.maximum(jnp.dot(x.astype(bf16), w1T_ref[...],
                            preferred_element_type=f32) + b1_ref[...], 0.0)
    y = jnp.dot(h.astype(bf16), w2T_ref[...],
                preferred_element_type=f32) + b2_ref[...] + x    # residual = proj output
    mu = jnp.mean(y, axis=-1, keepdims=True)
    var = jnp.mean(jnp.square(y - mu), axis=-1, keepdims=True)
    out = (y - mu) * lax.rsqrt(var + 1e-5) * g_ref[...] + be_ref[...]
    if has_npm:
        out = out * npm_ref[0]
    o_ref[0] = out.astype(o_ref.dtype)


def fused_proj_ffn(x, pp, npm=None, out_dtype=None):
    B, Lq, Dsp = x.shape
    f = pp["ffn"]
    D = f["w1T"].shape[0]
    Dh = f["w1T"].shape[1]
    has_npm = npm is not None
    out_dtype = x.dtype if out_dtype is None else out_dtype
    inputs = [x, pp["spat_dec_proj_wT"], pp["spat_dec_proj_b"],
              f["w1T"], f["b1"], f["w2T"], f["b2"], f["ln_g"], f["ln_b"]]
    in_specs = [pl.BlockSpec((1, Lq, Dsp), lambda b: (b, 0, 0)),
                pl.BlockSpec((Dsp, D), lambda b: (0, 0)),
                pl.BlockSpec((1, D), lambda b: (0, 0)),
                pl.BlockSpec((D, Dh), lambda b: (0, 0)),
                pl.BlockSpec((1, Dh), lambda b: (0, 0)),
                pl.BlockSpec((Dh, D), lambda b: (0, 0)),
                pl.BlockSpec((1, D), lambda b: (0, 0)),
                pl.BlockSpec((1, D), lambda b: (0, 0)),
                pl.BlockSpec((1, D), lambda b: (0, 0))]
    if has_npm:
        inputs.append(npm.astype(jnp.float32))
        in_specs.append(pl.BlockSpec((1, Lq, 1), lambda b: (b, 0, 0)))
    kern = functools.partial(_proj_ffn_kernel, has_npm=has_npm)
    return pl.pallas_call(
        kern,
        out_shape=jax.ShapeDtypeStruct((B, Lq, D), out_dtype),
        grid=(B,),
        in_specs=in_specs,
        out_specs=pl.BlockSpec((1, Lq, D), lambda b: (b, 0, 0)),
        compiler_params=pltpu.CompilerParams(
            dimension_semantics=("parallel",),
            vmem_limit_bytes=_VMEM_LIMIT),
    )(*inputs)


# ----------------------------------------------------------------------------
# Small standalone linear kernel (only for the spatial_cache=None fallback path)
# ----------------------------------------------------------------------------
def _linear_kernel(x_ref, wT_ref, b_ref, o_ref):
    y = jnp.dot(x_ref[0].astype(jnp.bfloat16), wT_ref[...],
                preferred_element_type=jnp.float32) + b_ref[...]
    o_ref[0] = y.astype(o_ref.dtype)


def linear(x, wT, b2d):
    B, L, Din = x.shape
    Dout = wT.shape[1]
    return pl.pallas_call(
        _linear_kernel,
        out_shape=jax.ShapeDtypeStruct((B, L, Dout), x.dtype),
        grid=(B,),
        in_specs=[pl.BlockSpec((1, L, Din), lambda i: (i, 0, 0)),
                  pl.BlockSpec((Din, Dout), lambda i: (0, 0)),
                  pl.BlockSpec((1, Dout), lambda i: (0, 0))],
        out_specs=pl.BlockSpec((1, L, Dout), lambda i: (i, 0, 0)),
        compiler_params=pltpu.CompilerParams(dimension_semantics=("parallel",)),
    )(x, wT, b2d)


# ----------------------------------------------------------------------------
# Reference-only (plain JAX) spatial gate construction — the Pallas path now
# builds the gate in-kernel from the compact temporal attention.
# ----------------------------------------------------------------------------
def build_spatial_gate(dec_temp_attn, temporal_spatial_link):
    gates = []
    idx_start = 0
    for (t, s) in temporal_spatial_link:
        if s > 1:
            temp_sel = dec_temp_attn[:, :, :, idx_start:idx_start + t]
            b, nh, dq, tt = temp_sel.shape
            temp_sel = jnp.broadcast_to(temp_sel[:, :, :, None, :], (b, nh, dq, s, tt))
            gates.append(temp_sel.reshape(b, nh, dq, tt * s))
        idx_start += t
    return jnp.concatenate(gates, axis=3)


# ----------------------------------------------------------------------------
# DecoderLayer forward (4 fused pallas_calls)
# ----------------------------------------------------------------------------
def decoder_layer(pp, cfg, dec_input, temporal_cache, spatial_cache,
                  temporal_spatial_link, non_pad_mask,
                  slf_attn_mask=None, dec_enc_attn_mask=None):
    n_head, d_k, d_v = cfg["n_head"], cfg["d_k"], cfg["d_v"]
    act_dtype = jnp.bfloat16  # inter-sub-layer activations round-trip HBM in bf16

    dec_output, dec_slf_attn = fused_mha(
        pp["slf_attn"], dec_input, None, n_head, d_k, d_v,
        mask=slf_attn_mask, npm=non_pad_mask, self_attn=True, out_dtype=act_dtype)

    dec_temp, dec_temp_attn = fused_mha(
        pp["temporal_cache_attn"], dec_output, temporal_cache, n_head, d_k, d_v,
        mask=dec_enc_attn_mask, npm=non_pad_mask,
        pre_wT=pp["temporal_proj_wT"], pre_b=pp["temporal_proj_b"],
        out_dtype=act_dtype)

    dec_spat_attn = None
    if spatial_cache is not None:
        gate_links = tuple((int(t), int(s)) for (t, s) in temporal_spatial_link)
        dec_spat, dec_spat_attn = fused_mha(
            pp["spatial_cache_attn"], dec_temp, spatial_cache, n_head, d_k, d_v,
            gate_src=dec_temp_attn, gate_links=gate_links, npm=non_pad_mask,
            pre_wT=pp["spatial_proj_wT"], pre_b=pp["spatial_proj_b"],
            out_dtype=act_dtype)
        ffn_in = dec_spat
    else:
        # Fallback: spatial projection without spatial attention (per the module spec).
        ffn_in = linear(dec_temp, pp["spatial_proj_wT"], pp["spatial_proj_b"])

    dec_output = fused_proj_ffn(ffn_in, pp, npm=non_pad_mask,
                                out_dtype=dec_input.dtype)
    return dec_output, [dec_slf_attn, dec_spat_attn, dec_temp_attn]


# ----------------------------------------------------------------------------
# Parameter init (PyTorch layout) and one-time kernel-layout preparation
# ----------------------------------------------------------------------------
def _normal(key, shape, scale=0.1):
    return scale * jax.random.normal(key, shape, jnp.float32)


def init_mha(key, d_model, n_head, d_k, d_v):
    k = jax.random.split(key, 10)
    return dict(
        w_qs=_normal(k[0], (n_head * d_k, d_model)), b_qs=_normal(k[1], (n_head * d_k,), 0.05),
        w_ks=_normal(k[2], (n_head * d_k, d_model)), b_ks=_normal(k[3], (n_head * d_k,), 0.05),
        w_vs=_normal(k[4], (n_head * d_v, d_model)), b_vs=_normal(k[5], (n_head * d_v,), 0.05),
        w_fc=_normal(k[6], (d_model, n_head * d_v)), b_fc=_normal(k[7], (d_model,), 0.05),
        ln_g=1.0 + _normal(k[8], (d_model,), 0.05), ln_b=_normal(k[9], (d_model,), 0.05),
    )


def init_decoder_params(key, d_model, d_inner, n_head, d_k, d_v, temporal_dim, spatial_dim):
    k = jax.random.split(key, 12)
    return dict(
        slf_attn=init_mha(k[0], d_model, n_head, d_k, d_v),
        temporal_cache_attn=init_mha(k[1], temporal_dim, n_head, d_k, d_v),
        temporal_proj_w=_normal(k[2], (temporal_dim, d_model)),
        temporal_proj_b=_normal(k[3], (temporal_dim,), 0.05),
        spatial_proj_w=_normal(k[4], (spatial_dim, temporal_dim)),
        spatial_proj_b=_normal(k[5], (spatial_dim,), 0.05),
        spatial_cache_attn=init_mha(k[6], spatial_dim, n_head, d_k, d_v),
        spat_dec_proj_w=_normal(k[7], (d_model, spatial_dim)),
        spat_dec_proj_b=_normal(k[8], (d_model,), 0.05),
        ffn=dict(
            w1=_normal(k[9], (d_inner, d_model)),   # Conv1d(d_model, d_inner, 1) weight squeezed
            b1=jnp.zeros((d_inner,), jnp.float32),
            w2=_normal(k[10], (d_model, d_inner)),  # Conv1d(d_inner, d_model, 1) weight squeezed
            b2=jnp.zeros((d_model,), jnp.float32),
            ln_g=1.0 + _normal(k[11], (d_model,), 0.05),
            ln_b=jnp.zeros((d_model,), jnp.float32),
        ),
    )


def prepare_params(params, weight_dtype=jnp.bfloat16):
    """Hoist transposes / QKV fusion AND bf16 weight casts out of the forward pass (once).

    Matmul weights are stored bf16 (MXU consumes bf16 anyway); biases and LayerNorm
    params stay f32 since they add into f32 accumulators.
    """
    wd = weight_dtype

    def prep_mha(p):
        return dict(
            w_qkvT=jnp.concatenate([p["w_qs"].T, p["w_ks"].T, p["w_vs"].T], axis=1).astype(wd),
            b_qkv=jnp.concatenate([p["b_qs"], p["b_ks"], p["b_vs"]])[None, :],
            w_qT=p["w_qs"].T.astype(wd), b_q=p["b_qs"][None, :],
            w_kvT=jnp.concatenate([p["w_ks"].T, p["w_vs"].T], axis=1).astype(wd),
            b_kv=jnp.concatenate([p["b_ks"], p["b_vs"]])[None, :],
            w_fcT=p["w_fc"].T.astype(wd), b_fc=p["b_fc"][None, :],
            ln_g=p["ln_g"][None, :], ln_b=p["ln_b"][None, :],
        )

    f = params["ffn"]
    return dict(
        slf_attn=prep_mha(params["slf_attn"]),
        temporal_cache_attn=prep_mha(params["temporal_cache_attn"]),
        spatial_cache_attn=prep_mha(params["spatial_cache_attn"]),
        temporal_proj_wT=params["temporal_proj_w"].T.astype(wd),
        temporal_proj_b=params["temporal_proj_b"][None, :],
        spatial_proj_wT=params["spatial_proj_w"].T.astype(wd),
        spatial_proj_b=params["spatial_proj_b"][None, :],
        spat_dec_proj_wT=params["spat_dec_proj_w"].T.astype(wd),
        spat_dec_proj_b=params["spat_dec_proj_b"][None, :],
        ffn=dict(
            w1T=f["w1"].T.astype(wd), b1=f["b1"][None, :],
            w2T=f["w2"].T.astype(wd), b2=f["b2"][None, :],
            ln_g=f["ln_g"][None, :], ln_b=f["ln_b"][None, :],
        ),
    )


# ----------------------------------------------------------------------------
# Pure-JAX f32 reference (sanity check)
# ----------------------------------------------------------------------------
def _ref_linear(x, w, b):
    return x @ w.T + b


def _ref_ln(x, g, b, eps=1e-5):
    mu = jnp.mean(x, -1, keepdims=True)
    var = jnp.mean((x - mu) ** 2, -1, keepdims=True)
    return (x - mu) / jnp.sqrt(var + eps) * g + b


def _ref_mha(p, q_in, k_in, v_in, n_head, d_k, d_v, mask=None, k_gate=None):
    B, Lq, _ = q_in.shape
    Lk = k_in.shape[1]
    q = _ref_linear(q_in, p["w_qs"], p["b_qs"]).reshape(B, Lq, n_head, d_k).transpose(0, 2, 1, 3)
    k = _ref_linear(k_in, p["w_ks"], p["b_ks"]).reshape(B, Lk, n_head, d_k).transpose(0, 2, 1, 3)
    v = _ref_linear(v_in, p["w_vs"], p["b_vs"]).reshape(B, Lk, n_head, d_v).transpose(0, 2, 1, 3)
    s = jnp.einsum("bhqd,bhkd->bhqk", q, k) / math.sqrt(d_k)
    if k_gate is not None:
        s = s * k_gate
    if mask is not None:
        s = jnp.where(mask[:, None].astype(bool), -1e30, s)
    attn = jax.nn.softmax(s, axis=-1)
    out = jnp.einsum("bhqk,bhkd->bhqd", attn, v).transpose(0, 2, 1, 3).reshape(B, Lq, n_head * d_v)
    out = _ref_ln(_ref_linear(out, p["w_fc"], p["b_fc"]) + q_in, p["ln_g"], p["ln_b"])
    return out, attn


def _ref_ffn(x, p):
    h = jnp.maximum(_ref_linear(x, p["w1"], p["b1"]), 0.0)
    y = _ref_linear(h, p["w2"], p["b2"]) + x
    return _ref_ln(y, p["ln_g"], p["ln_b"])


def _ref_decoder(params, cfg, dec_input, temporal_cache, spatial_cache, tsl, non_pad_mask):
    n_head, d_k, d_v = cfg["n_head"], cfg["d_k"], cfg["d_v"]
    o, a_slf = _ref_mha(params["slf_attn"], dec_input, dec_input, dec_input, n_head, d_k, d_v)
    o = o * non_pad_mask
    t = _ref_linear(o, params["temporal_proj_w"], params["temporal_proj_b"])
    t, a_tmp = _ref_mha(params["temporal_cache_attn"], t, temporal_cache, temporal_cache, n_head, d_k, d_v)
    t = t * non_pad_mask
    sp = _ref_linear(t, params["spatial_proj_w"], params["spatial_proj_b"])
    gate = build_spatial_gate(a_tmp, tsl)
    sp, a_sp = _ref_mha(params["spatial_cache_attn"], sp, spatial_cache, spatial_cache,
                        n_head, d_k, d_v, k_gate=gate)
    sp = sp * non_pad_mask
    o = _ref_linear(sp, params["spat_dec_proj_w"], params["spat_dec_proj_b"])
    o = _ref_ffn(o, params["ffn"])
    o = o * non_pad_mask
    return o, [a_slf, a_sp, a_tmp]


# ----------------------------------------------------------------------------
if __name__ == "__main__":
    B, Lq = 2, 8
    d_model, d_inner = 32, 64
    n_head, d_k, d_v = 4, 16, 16
    temporal_dim, spatial_dim = 24, 48
    temporal_spatial_link = [(3, 1), (2, 4)]          # temporal cache len = 5, spatial cache len = 8
    Lt = sum(t for t, s in temporal_spatial_link)
    Ls = sum(t * s for t, s in temporal_spatial_link if s > 1)

    cfg = dict(n_head=n_head, d_k=d_k, d_v=d_v)
    key = jax.random.PRNGKey(0)
    kp, kx, kt, ks = jax.random.split(key, 4)
    params = init_decoder_params(kp, d_model, d_inner, n_head, d_k, d_v, temporal_dim, spatial_dim)
    pp = prepare_params(params)   # kernel-layout weights (transposed / QKV-fused / bf16), built once

    dec_input = jax.random.normal(kx, (B, Lq, d_model), jnp.float32)
    temporal_cache = jax.random.normal(kt, (B, Lt, temporal_dim), jnp.float32)
    spatial_cache = jax.random.normal(ks, (B, Ls, spatial_dim), jnp.float32)
    non_pad_mask = jnp.ones((B, Lq, 1), jnp.float32).at[1, -2:, :].set(0.0)

    fwd = jax.jit(lambda pp_, di, tc, sc, npm: decoder_layer(
        pp_, cfg, di, tc, sc, temporal_spatial_link, npm))
    dec_out, (a_slf, a_sp, a_tmp) = fwd(pp, dec_input, temporal_cache, spatial_cache, non_pad_mask)
    jax.block_until_ready(dec_out)

    ref_out, (r_slf, r_sp, r_tmp) = _ref_decoder(
        params, cfg, dec_input, temporal_cache, spatial_cache,
        temporal_spatial_link, non_pad_mask)

    # bf16 MXU inputs / bf16 weights + approx-reciprocal softmax => compare against the
    # f32 reference with a modest tolerance.
    for got, want in ((dec_out, ref_out), (a_slf, r_slf), (a_sp, r_sp), (a_tmp, r_tmp)):
        assert np.allclose(np.asarray(got, dtype=np.float32),
                           np.asarray(want, dtype=np.float32), rtol=5e-2, atol=5e-2)

    print("KERNEL_OK")
</pallas_src>

<mosaic_0001>
module attributes {stable_mosaic.version = 11 : i64} {
  func.func @_mha_kernel(%arg0: i32, %arg1: memref<1x8x32xf32, #tpu.memory_space<vmem>>, %arg2: memref<32x192xbf16, #tpu.memory_space<vmem>>, %arg3: memref<1x192xf32, #tpu.memory_space<vmem>>, %arg4: memref<64x32xbf16, #tpu.memory_space<vmem>>, %arg5: memref<1x32xf32, #tpu.memory_space<vmem>>, %arg6: memref<1x32xf32, #tpu.memory_space<vmem>>, %arg7: memref<1x32xf32, #tpu.memory_space<vmem>>, %arg8: memref<1x8x1xf32, #tpu.memory_space<vmem>>, %arg9: memref<1x8x32xbf16, #tpu.memory_space<vmem>>, %arg10: memref<1x4x8x8xf32, #tpu.memory_space<vmem>>) attributes {dimension_semantics = [#tpu.dimension_semantics<parallel>], iteration_bounds = array<i64: 2>, scalar_prefetch = 0 : i64, scratch_operands = 0 : i64, tpu.core_type = #tpu.core_type<tc>, window_params = [{transform_indices = @transform_0, window_bounds = array<i64: 1, 8, 32>}, {pipeline_mode = #tpu.pipeline_mode<synchronous>, transform_indices = @transform_1, window_bounds = array<i64: 32, 192>}, {pipeline_mode = #tpu.pipeline_mode<synchronous>, transform_indices = @transform_2, window_bounds = array<i64: 1, 192>}, {pipeline_mode = #tpu.pipeline_mode<synchronous>, transform_indices = @transform_3, window_bounds = array<i64: 64, 32>}, {pipeline_mode = #tpu.pipeline_mode<synchronous>, transform_indices = @transform_4, window_bounds = array<i64: 1, 32>}, {pipeline_mode = #tpu.pipeline_mode<synchronous>, transform_indices = @transform_5, window_bounds = array<i64: 1, 32>}, {pipeline_mode = #tpu.pipeline_mode<synchronous>, transform_indices = @transform_6, window_bounds = array<i64: 1, 32>}, {transform_indices = @transform_7, window_bounds = array<i64: 1, 8, 1>}, {transform_indices = @transform_8, window_bounds = array<i64: 1, 8, 32>}, {transform_indices = @transform_9, window_bounds = array<i64: 1, 4, 8, 8>}]} {
    %c0 = arith.constant 0 : index
    %c0_0 = arith.constant 0 : index
    %c0_1 = arith.constant 0 : index
    %0 = vector.load %arg1[%c0, %c0_0, %c0_1] : memref<1x8x32xf32, #tpu.memory_space<vmem>>, vector<1x8x32xf32>
    %1 = vector.shape_cast %0 : vector<1x8x32xf32> to vector<8x32xf32>
    %2 = arith.truncf %1 : vector<8x32xf32> to vector<8x32xbf16>
    %c0_2 = arith.constant 0 : index
    %c0_3 = arith.constant 0 : index
    %c0_4 = arith.constant 0 : index
    %3 = vector.load %arg1[%c0_2, %c0_3, %c0_4] : memref<1x8x32xf32, #tpu.memory_space<vmem>>, vector<1x8x32xf32>
    %4 = vector.shape_cast %3 : vector<1x8x32xf32> to vector<8x32xf32>
    %c0_5 = arith.constant 0 : index
    %c0_6 = arith.constant 0 : index
    %5 = vector.load %arg2[%c0_5, %c0_6] : memref<32x192xbf16, #tpu.memory_space<vmem>>, vector<32x192xbf16>
    %cst = arith.constant dense<0.000000e+00> : vector<8x192xf32>
    %6 = tpu.matmul %2, %5, %cst {dimension_numbers = #tpu.dot_dimension_numbers<[1], [0], [0], [1], [0, 0, 1, 1], [], []>} : vector<8x32xbf16>, vector<32x192xbf16>, vector<8x192xf32> -> vector<8x192xf32>
    %c0_7 = arith.constant 0 : index
    %c0_8 = arith.constant 0 : index
    %7 = vector.load %arg3[%c0_7, %c0_8] : memref<1x192xf32, #tpu.memory_space<vmem>>, vector<1x192xf32>
    %8 = vector.broadcast %7 : vector<1x192xf32> to vector<8x192xf32>
    %9 = arith.addf %6, %8 : vector<8x192xf32>
    %10 = vector.extract_strided_slice %9 {offsets = [0, 0], sizes = [8, 64], strides = [1, 1]} : vector<8x192xf32> to vector<8x64xf32>
    %11 = vector.extract_strided_slice %9 {offsets = [0, 64], sizes = [8, 128], strides = [1, 1]} : vector<8x192xf32> to vector<8x128xf32>
    %cst_9 = arith.constant 2.500000e-01 : f32
    %12 = vector.broadcast %cst_9 : f32 to vector<8x64xf32>
    %13 = arith.mulf %10, %12 : vector<8x64xf32>
    %14 = arith.truncf %13 : vector<8x64xf32> to vector<8x64xbf16>
    %15 = arith.truncf %11 : vector<8x128xf32> to vector<8x128xbf16>
    %16 = vector.extract_strided_slice %14 {offsets = [0, 0], sizes = [8, 16], strides = [1, 1]} : vector<8x64xbf16> to vector<8x16xbf16>
    %17 = vector.extract_strided_slice %15 {offsets = [0, 0], sizes = [8, 16], strides = [1, 1]} : vector<8x128xbf16> to vector<8x16xbf16>
    %18 = vector.extract_strided_slice %15 {offsets = [0, 64], sizes = [8, 16], strides = [1, 1]} : vector<8x128xbf16> to vector<8x16xbf16>
    %cst_10 = arith.constant dense<0.000000e+00> : vector<8x8xf32>
    %19 = tpu.matmul %16, %17, %cst_10 {dimension_numbers = #tpu.dot_dimension_numbers<[1], [1], [0], [0], [0, 0, 1, 0], [], []>} : vector<8x16xbf16>, vector<8x16xbf16>, vector<8x8xf32> -> vector<8x8xf32>
    %cst_11 = arith.constant dense<0xFF800000> : vector<8xf32>
    %20 = vector.multi_reduction <maximumf>, %19, %cst_11 [1] : vector<8x8xf32> to vector<8xf32>
    %21 = vector.shape_cast %20 : vector<8xf32> to vector<8x1xf32>
    %22 = vector.broadcast %21 : vector<8x1xf32> to vector<8x8xf32>
    %23 = arith.subf %19, %22 : vector<8x8xf32>
    %24 = math.exp %23 : vector<8x8xf32>
    %cst_12 = arith.constant dense<0.000000e+00> : vector<8xf32>
    %25 = vector.multi_reduction <add>, %24, %cst_12 [1] : vector<8x8xf32> to vector<8xf32>
    %26 = vector.shape_cast %25 : vector<8xf32> to vector<8x1xf32>
    %27 = tpu.reciprocal %26 {approx = true} : vector<8x1xf32> -> vector<8x1xf32>
    %28 = vector.broadcast %27 : vector<8x1xf32> to vector<8x8xf32>
    %29 = arith.mulf %24, %28 : vector<8x8xf32>
    %c0_13 = arith.constant 0 : index
    %c0_14 = arith.constant 0 : index
    %c0_15 = arith.constant 0 : index
    %c0_16 = arith.constant 0 : index
    %30 = vector.load %arg10[%c0_13, %c0_14, %c0_15, %c0_16] : memref<1x4x8x8xf32, #tpu.memory_space<vmem>>, vector<1x1x8x8xf32>
    %31 = vector.shape_cast %30 : vector<1x1x8x8xf32> to vector<8x8xf32>
    %32 = vector.shape_cast %29 : vector<8x8xf32> to vector<1x1x8x8xf32>
    tpu.vector_store %arg10[%c0_13, %c0_14, %c0_15, %c0_16], %32 {strides = array<i32>} : memref<1x4x8x8xf32, #tpu.memory_space<vmem>>, vector<1x1x8x8xf32>,
    %33 = arith.truncf %29 : vector<8x8xf32> to vector<8x8xbf16>
    %cst_17 = arith.constant dense<0.000000e+00> : vector<8x16xf32>
    %34 = tpu.matmul %33, %18, %cst_17 {dimension_numbers = #tpu.dot_dimension_numbers<[1], [0], [0], [1], [0, 0, 1, 1], [], []>} : vector<8x8xbf16>, vector<8x16xbf16>, vector<8x16xf32> -> vector<8x16xf32>
    %35 = vector.extract_strided_slice %14 {offsets = [0, 16], sizes = [8, 16], strides = [1, 1]} : vector<8x64xbf16> to vector<8x16xbf16>
    %36 = vector.extract_strided_slice %15 {offsets = [0, 16], sizes = [8, 16], strides = [1, 1]} : vector<8x128xbf16> to vector<8x16xbf16>
    %37 = vector.extract_strided_slice %15 {offsets = [0, 80], sizes = [8, 16], strides = [1, 1]} : vector<8x128xbf16> to vector<8x16xbf16>
    %cst_18 = arith.constant dense<0.000000e+00> : vector<8x8xf32>
    %38 = tpu.matmul %35, %36, %cst_18 {dimension_numbers = #tpu.dot_dimension_numbers<[1], [1], [0], [0], [0, 0, 1, 0], [], []>} : vector<8x16xbf16>, vector<8x16xbf16>, vector<8x8xf32> -> vector<8x8xf32>
    %cst_19 = arith.constant dense<0xFF800000> : vector<8xf32>
    %39 = vector.multi_reduction <maximumf>, %38, %cst_19 [1] : vector<8x8xf32> to vector<8xf32>
    %40 = vector.shape_cast %39 : vector<8xf32> to vector<8x1xf32>
    %41 = vector.broadcast %40 : vector<8x1xf32> to vector<8x8xf32>
    %42 = arith.subf %38, %41 : vector<8x8xf32>
    %43 = math.exp %42 : vector<8x8xf32>
    %cst_20 = arith.constant dense<0.000000e+00> : vector<8xf32>
    %44 = vector.multi_reduction <add>, %43, %cst_20 [1] : vector<8x8xf32> to vector<8xf32>
    %45 = vector.shape_cast %44 : vector<8xf32> to vector<8x1xf32>
    %46 = tpu.reciprocal %45 {approx = true} : vector<8x1xf32> -> vector<8x1xf32>
    %47 = vector.broadcast %46 : vector<8x1xf32> to vector<8x8xf32>
    %48 = arith.mulf %43, %47 : vector<8x8xf32>
    %c0_21 = arith.constant 0 : index
    %c1 = arith.constant 1 : index
    %c0_22 = arith.constant 0 : index
    %c0_23 = arith.constant 0 : index
    %49 = vector.load %arg10[%c0_21, %c1, %c0_22, %c0_23] : memref<1x4x8x8xf32, #tpu.memory_space<vmem>>, vector<1x1x8x8xf32>
    %50 = vector.shape_cast %49 : vector<1x1x8x8xf32> to vector<8x8xf32>
    %51 = vector.shape_cast %48 : vector<8x8xf32> to vector<1x1x8x8xf32>
    tpu.vector_store %arg10[%c0_21, %c1, %c0_22, %c0_23], %51 {strides = array<i32>} : memref<1x4x8x8xf32, #tpu.memory_space<vmem>>, vector<1x1x8x8xf32>,
    %52 = arith.truncf %48 : vector<8x8xf32> to vector<8x8xbf16>
    %cst_24 = arith.constant dense<0.000000e+00> : vector<8x16xf32>
    %53 = tpu.matmul %52, %37, %cst_24 {dimension_numbers = #tpu.dot_dimension_numbers<[1], [0], [0], [1], [0, 0, 1, 1], [], []>} : vector<8x8xbf16>, vector<8x16xbf16>, vector<8x16xf32> -> vector<8x16xf32>
    %54 = vector.extract_strided_slice %14 {offsets = [0, 32], sizes = [8, 16], strides = [1, 1]} : vector<8x64xbf16> to vector<8x16xbf16>
    %55 = vector.extract_strided_slice %15 {offsets = [0, 32], sizes = [8, 16], strides = [1, 1]} : vector<8x128xbf16> to vector<8x16xbf16>
    %56 = vector.extract_strided_slice %15 {offsets = [0, 96], sizes = [8, 16], strides = [1, 1]} : vector<8x128xbf16> to vector<8x16xbf16>
    %cst_25 = arith.constant dense<0.000000e+00> : vector<8x8xf32>
    %57 = tpu.matmul %54, %55, %cst_25 {dimension_numbers = #tpu.dot_dimension_numbers<[1], [1], [0], [0], [0, 0, 1, 0], [], []>} : vector<8x16xbf16>, vector<8x16xbf16>, vector<8x8xf32> -> vector<8x8xf32>
    %cst_26 = arith.constant dense<0xFF800000> : vector<8xf32>
    %58 = vector.multi_reduction <maximumf>, %57, %cst_26 [1] : vector<8x8xf32> to vector<8xf32>
    %59 = vector.shape_cast %58 : vector<8xf32> to vector<8x1xf32>
    %60 = vector.broadcast %59 : vector<8x1xf32> to vector<8x8xf32>
    %61 = arith.subf %57, %60 : vector<8x8xf32>
    %62 = math.exp %61 : vector<8x8xf32>
    %cst_27 = arith.constant dense<0.000000e+00> : vector<8xf32>
    %63 = vector.multi_reduction <add>, %62, %cst_27 [1] : vector<8x8xf32> to vector<8xf32>
    %64 = vector.shape_cast %63 : vector<8xf32> to vector<8x1xf32>
    %65 = tpu.reciprocal %64 {approx = true} : vector<8x1xf32> -> vector<8x1xf32>
    %66 = vector.broadcast %65 : vector<8x1xf32> to vector<8x8xf32>
    %67 = arith.mulf %62, %66 : vector<8x8xf32>
    %c0_28 = arith.constant 0 : index
    %c2 = arith.constant 2 : index
    %c0_29 = arith.constant 0 : index
    %c0_30 = arith.constant 0 : index
    %68 = vector.load %arg10[%c0_28, %c2, %c0_29, %c0_30] : memref<1x4x8x8xf32, #tpu.memory_space<vmem>>, vector<1x1x8x8xf32>
    %69 = vector.shape_cast %68 : vector<1x1x8x8xf32> to vector<8x8xf32>
    %70 = vector.shape_cast %67 : vector<8x8xf32> to vector<1x1x8x8xf32>
    tpu.vector_store %arg10[%c0_28, %c2, %c0_29, %c0_30], %70 {strides = array<i32>} : memref<1x4x8x8xf32, #tpu.memory_space<vmem>>, vector<1x1x8x8xf32>,
    %71 = arith.truncf %67 : vector<8x8xf32> to vector<8x8xbf16>
    %cst_31 = arith.constant dense<0.000000e+00> : vector<8x16xf32>
    %72 = tpu.matmul %71, %56, %cst_31 {dimension_numbers = #tpu.dot_dimension_numbers<[1], [0], [0], [1], [0, 0, 1, 1], [], []>} : vector<8x8xbf16>, vector<8x16xbf16>, vector<8x16xf32> -> vector<8x16xf32>
    %73 = vector.extract_strided_slice %14 {offsets = [0, 48], sizes = [8, 16], strides = [1, 1]} : vector<8x64xbf16> to vector<8x16xbf16>
    %74 = vector.extract_strided_slice %15 {offsets = [0, 48], sizes = [8, 16], strides = [1, 1]} : vector<8x128xbf16> to vector<8x16xbf16>
    %75 = vector.extract_strided_slice %15 {offsets = [0, 112], sizes = [8, 16], strides = [1, 1]} : vector<8x128xbf16> to vector<8x16xbf16>
    %cst_32 = arith.constant dense<0.000000e+00> : vector<8x8xf32>
    %76 = tpu.matmul %73, %74, %cst_32 {dimension_numbers = #tpu.dot_dimension_numbers<[1], [1], [0], [0], [0, 0, 1, 0], [], []>} : vector<8x16xbf16>, vector<8x16xbf16>, vector<8x8xf32> -> vector<8x8xf32>
    %cst_33 = arith.constant dense<0xFF800000> : vector<8xf32>
    %77 = vector.multi_reduction <maximumf>, %76, %cst_33 [1] : vector<8x8xf32> to vector<8xf32>
    %78 = vector.shape_cast %77 : vector<8xf32> to vector<8x1xf32>
    %79 = vector.broadcast %78 : vector<8x1xf32> to vector<8x8xf32>
    %80 = arith.subf %76, %79 : vector<8x8xf32>
    %81 = math.exp %80 : vector<8x8xf32>
    %cst_34 = arith.constant dense<0.000000e+00> : vector<8xf32>
    %82 = vector.multi_reduction <add>, %81, %cst_34 [1] : vector<8x8xf32> to vector<8xf32>
    %83 = vector.shape_cast %82 : vector<8xf32> to vector<8x1xf32>
    %84 = tpu.reciprocal %83 {approx = true} : vector<8x1xf32> -> vector<8x1xf32>
    %85 = vector.broadcast %84 : vector<8x1xf32> to vector<8x8xf32>
    %86 = arith.mulf %81, %85 : vector<8x8xf32>
    %c0_35 = arith.constant 0 : index
    %c3 = arith.constant 3 : index
    %c0_36 = arith.constant 0 : index
    %c0_37 = arith.constant 0 : index
    %87 = vector.load %arg10[%c0_35, %c3, %c0_36, %c0_37] : memref<1x4x8x8xf32, #tpu.memory_space<vmem>>, vector<1x1x8x8xf32>
    %88 = vector.shape_cast %87 : vector<1x1x8x8xf32> to vector<8x8xf32>
    %89 = vector.shape_cast %86 : vector<8x8xf32> to vector<1x1x8x8xf32>
    tpu.vector_store %arg10[%c0_35, %c3, %c0_36, %c0_37], %89 {strides = array<i32>} : memref<1x4x8x8xf32, #tpu.memory_space<vmem>>, vector<1x1x8x8xf32>,
    %90 = arith.truncf %86 : vector<8x8xf32> to vector<8x8xbf16>
    %cst_38 = arith.constant dense<0.000000e+00> : vector<8x16xf32>
    %91 = tpu.matmul %90, %75, %cst_38 {dimension_numbers = #tpu.dot_dimension_numbers<[1], [0], [0], [1], [0, 0, 1, 1], [], []>} : vector<8x8xbf16>, vector<8x16xbf16>, vector<8x16xf32> -> vector<8x16xf32>
    %92 = tpu.concatenate %34, %53, %72, %91 in 1 : vector<8x16xf32>, vector<8x16xf32>, vector<8x16xf32>, vector<8x16xf32> -> vector<8x64xf32>
    %93 = arith.truncf %92 : vector<8x64xf32> to vector<8x64xbf16>
    %c0_39 = arith.constant 0 : index
    %c0_40 = arith.constant 0 : index
    %94 = vector.load %arg4[%c0_39, %c0_40] : memref<64x32xbf16, #tpu.memory_space<vmem>>, vector<64x32xbf16>
    %cst_41 = arith.constant dense<0.000000e+00> : vector<8x32xf32>
    %95 = tpu.matmul %93, %94, %cst_41 {dimension_numbers = #tpu.dot_dimension_numbers<[1], [0], [0], [1], [0, 0, 1, 1], [], []>} : vector<8x64xbf16>, vector<64x32xbf16>, vector<8x32xf32> -> vector<8x32xf32>
    %c0_42 = arith.constant 0 : index
    %c0_43 = arith.constant 0 : index
    %96 = vector.load %arg5[%c0_42, %c0_43] : memref<1x32xf32, #tpu.memory_space<vmem>>, vector<1x32xf32>
    %97 = vector.broadcast %96 : vector<1x32xf32> to vector<8x32xf32>
    %98 = arith.addf %95, %97 : vector<8x32xf32>
    %99 = arith.addf %98, %4 : vector<8x32xf32>
    %cst_44 = arith.constant dense<0.000000e+00> : vector<8xf32>
    %100 = vector.multi_reduction <add>, %99, %cst_44 [1] : vector<8x32xf32> to vector<8xf32>
    %101 = vector.shape_cast %100 : vector<8xf32> to vector<8x1xf32>
    %cst_45 = arith.constant 3.200000e+01 : f32
    %102 = vector.broadcast %cst_45 : f32 to vector<8x1xf32>
    %103 = arith.divf %101, %102 : vector<8x1xf32>
    %104 = vector.broadcast %103 : vector<8x1xf32> to vector<8x32xf32>
    %105 = arith.subf %99, %104 : vector<8x32xf32>
    %106 = arith.mulf %105, %105 : vector<8x32xf32>
    %cst_46 = arith.constant dense<0.000000e+00> : vector<8xf32>
    %107 = vector.multi_reduction <add>, %106, %cst_46 [1] : vector<8x32xf32> to vector<8xf32>
    %108 = vector.shape_cast %107 : vector<8xf32> to vector<8x1xf32>
    %cst_47 = arith.constant 3.200000e+01 : f32
    %109 = vector.broadcast %cst_47 : f32 to vector<8x1xf32>
    %110 = arith.divf %108, %109 : vector<8x1xf32>
    %111 = vector.broadcast %103 : vector<8x1xf32> to vector<8x32xf32>
    %112 = arith.subf %99, %111 : vector<8x32xf32>
    %cst_48 = arith.constant 9.99999974E-6 : f32
    %113 = vector.broadcast %cst_48 : f32 to vector<8x1xf32>
    %114 = arith.addf %110, %113 : vector<8x1xf32>
    %115 = math.rsqrt %114 : vector<8x1xf32>
    %116 = vector.broadcast %115 : vector<8x1xf32> to vector<8x32xf32>
    %117 = arith.mulf %112, %116 : vector<8x32xf32>
    %c0_49 = arith.constant 0 : index
    %c0_50 = arith.constant 0 : index
    %118 = vector.load %arg6[%c0_49, %c0_50] : memref<1x32xf32, #tpu.memory_space<vmem>>, vector<1x32xf32>
    %119 = vector.broadcast %118 : vector<1x32xf32> to vector<8x32xf32>
    %120 = arith.mulf %117, %119 : vector<8x32xf32>
    %c0_51 = arith.constant 0 : index
    %c0_52 = arith.constant 0 : index
    %121 = vector.load %arg7[%c0_51, %c0_52] : memref<1x32xf32, #tpu.memory_space<vmem>>, vector<1x32xf32>
    %122 = vector.broadcast %121 : vector<1x32xf32> to vector<8x32xf32>
    %123 = arith.addf %120, %122 : vector<8x32xf32>
    %c0_53 = arith.constant 0 : index
    %c0_54 = arith.constant 0 : index
    %c0_55 = arith.constant 0 : index
    %124 = vector.load %arg8[%c0_53, %c0_54, %c0_55] : memref<1x8x1xf32, #tpu.memory_space<vmem>>, vector<1x8x1xf32>
    %125 = vector.shape_cast %124 : vector<1x8x1xf32> to vector<8x1xf32>
    %126 = vector.broadcast %125 : vector<8x1xf32> to vector<8x32xf32>
    %127 = arith.mulf %123, %126 : vector<8x32xf32>
    %128 = arith.truncf %127 : vector<8x32xf32> to vector<8x32xbf16>
    %c0_56 = arith.constant 0 : index
    %c0_57 = arith.constant 0 : index
    %c0_58 = arith.constant 0 : index
    %129 = vector.load %arg9[%c0_56, %c0_57, %c0_58] : memref<1x8x32xbf16, #tpu.memory_space<vmem>>, vector<1x8x32xbf16>
    %130 = vector.shape_cast %129 : vector<1x8x32xbf16> to vector<8x32xbf16>
    %131 = vector.shape_cast %128 : vector<8x32xbf16> to vector<1x8x32xbf16>
    tpu.vector_store %arg9[%c0_56, %c0_57, %c0_58], %131 {strides = array<i32>} : memref<1x8x32xbf16, #tpu.memory_space<vmem>>, vector<1x8x32xbf16>,
    return
  }
  func.func @transform_0(%arg0: i32) -> (i32, i32, i32) {
    %c0_i32 = arith.constant 0 : i32
    %c0_i32_0 = arith.constant 0 : i32
    %c0_i32_1 = arith.constant 0 : i32
    return %arg0, %c0_i32, %c0_i32_0 : i32, i32, i32
  }
  func.func @transform_1(%arg0: i32) -> (i32, i32) {
    %c0_i32 = arith.constant 0 : i32
    %c0_i32_0 = arith.constant 0 : i32
    %c0_i32_1 = arith.constant 0 : i32
    return %c0_i32, %c0_i32_0 : i32, i32
  }
  func.func @transform_2(%arg0: i32) -> (i32, i32) {
    %c0_i32 = arith.constant 0 : i32
    %c0_i32_0 = arith.constant 0 : i32
    %c0_i32_1 = arith.constant 0 : i32
    return %c0_i32, %c0_i32_0 : i32, i32
  }
  func.func @transform_3(%arg0: i32) -> (i32, i32) {
    %c0_i32 = arith.constant 0 : i32
    %c0_i32_0 = arith.constant 0 : i32
    %c0_i32_1 = arith.constant 0 : i32
    return %c0_i32, %c0_i32_0 : i32, i32
  }
  func.func @transform_4(%arg0: i32) -> (i32, i32) {
    %c0_i32 = arith.constant 0 : i32
    %c0_i32_0 = arith.constant 0 : i32
    %c0_i32_1 = arith.constant 0 : i32
    return %c0_i32, %c0_i32_0 : i32, i32
  }
  func.func @transform_5(%arg0: i32) -> (i32, i32) {
    %c0_i32 = arith.constant 0 : i32
    %c0_i32_0 = arith.constant 0 : i32
    %c0_i32_1 = arith.constant 0 : i32
    return %c0_i32, %c0_i32_0 : i32, i32
  }
  func.func @transform_6(%arg0: i32) -> (i32, i32) {
    %c0_i32 = arith.constant 0 : i32
    %c0_i32_0 = arith.constant 0 : i32
    %c0_i32_1 = arith.constant 0 : i32
    return %c0_i32, %c0_i32_0 : i32, i32
  }
  func.func @transform_7(%arg0: i32) -> (i32, i32, i32) {
    %c0_i32 = arith.constant 0 : i32
    %c0_i32_0 = arith.constant 0 : i32
    %c0_i32_1 = arith.constant 0 : i32
    return %arg0, %c0_i32, %c0_i32_0 : i32, i32, i32
  }
  func.func @transform_8(%arg0: i32) -> (i32, i32, i32) {
    %c0_i32 = arith.constant 0 : i32
    %c0_i32_0 = arith.constant 0 : i32
    %c0_i32_1 = arith.constant 0 : i32
    return %arg0, %c0_i32, %c0_i32_0 : i32, i32, i32
  }
  func.func @transform_9(%arg0: i32) -> (i32, i32, i32, i32) {
    %c0_i32 = arith.constant 0 : i32
    %c0_i32_0 = arith.constant 0 : i32
    %c0_i32_1 = arith.constant 0 : i32
    %c0_i32_2 = arith.constant 0 : i32
    return %arg0, %c0_i32, %c0_i32_0, %c0_i32_1 : i32, i32, i32, i32
  }
}

module attributes {stable_mosaic.version = 11 : i64} {
  func.func @_mha_kernel(%arg0: i32, %arg1: memref<1x8x32xbf16, #tpu.memory_space<vmem>>, %arg2: memref<1x5x24xf32, #tpu.memory_space<vmem>>, %arg3: memref<32x24xbf16, #tpu.memory_space<vmem>>, %arg4: memref<1x24xf32, #tpu.memory_space<vmem>>, %arg5: memref<24x64xbf16, #tpu.memory_space<vmem>>, %arg6: memref<1x64xf32, #tpu.memory_space<vmem>>, %arg7: memref<24x128xbf16, #tpu.memory_space<vmem>>, %arg8: memref<1x128xf32, #tpu.memory_space<vmem>>, %arg9: memref<64x24xbf16, #tpu.memory_space<vmem>>, %arg10: memref<1x24xf32, #tpu.memory_space<vmem>>, %arg11: memref<1x24xf32, #tpu.memory_space<vmem>>, %arg12: memref<1x24xf32, #tpu.memory_space<vmem>>, %arg13: memref<1x8x1xf32, #tpu.memory_space<vmem>>, %arg14: memref<1x8x24xbf16, #tpu.memory_space<vmem>>, %arg15: memref<1x4x8x5xf32, #tpu.memory_space<vmem>>) attributes {dimension_semantics = [#tpu.dimension_semantics<parallel>], iteration_bounds = array<i64: 2>, scalar_prefetch = 0 : i64, scratch_operands = 0 : i64, tpu.core_type = #tpu.core_type<tc>, window_params = [{transform_indices = @transform_0, window_bounds = array<i64: 1, 8, 32>}, {transform_indices = @transform_1, window_bounds = array<i64: 1, 5, 24>}, {pipeline_mode = #tpu.pipeline_mode<synchronous>, transform_indices = @transform_2, window_bounds = array<i64: 32, 24>}, {pipeline_mode = #tpu.pipeline_mode<synchronous>, transform_indices = @transform_3, window_bounds = array<i64: 1, 24>}, {pipeline_mode = #tpu.pipeline_mode<synchronous>, transform_indices = @transform_4, window_bounds = array<i64: 24, 64>}, {pipeline_mode = #tpu.pipeline_mode<synchronous>, transform_indices = @transform_5, window_bounds = array<i64: 1, 64>}, {pipeline_mode = #tpu.pipeline_mode<synchronous>, transform_indices = @transform_6, window_bounds = array<i64: 24, 128>}, {pipeline_mode = #tpu.pipeline_mode<synchronous>, transform_indices = @transform_7, window_bounds = array<i64: 1, 128>}, {pipeline_mode = #tpu.pipeline_mode<synchronous>, transform_indices = @transform_8, window_bounds = array<i64: 64, 24>}, {pipeline_mode = #tpu.pipeline_mode<synchronous>, transform_indices = @transform_9, window_bounds = array<i64: 1, 24>}, {pipeline_mode = #tpu.pipeline_mode<synchronous>, transform_indices = @transform_10, window_bounds = array<i64: 1, 24>}, {pipeline_mode = #tpu.pipeline_mode<synchronous>, transform_indices = @transform_11, window_bounds = array<i64: 1, 24>}, {transform_indices = @transform_12, window_bounds = array<i64: 1, 8, 1>}, {transform_indices = @transform_13, window_bounds = array<i64: 1, 8, 24>}, {transform_indices = @transform_14, window_bounds = array<i64: 1, 4, 8, 5>}]} {
    %c0 = arith.constant 0 : index
    %c0_0 = arith.constant 0 : index
    %c0_1 = arith.constant 0 : index
    %0 = vector.load %arg1[%c0, %c0_0, %c0_1] : memref<1x8x32xbf16, #tpu.memory_space<vmem>>, vector<1x8x32xbf16>
    %1 = vector.shape_cast %0 : vector<1x8x32xbf16> to vector<8x32xbf16>
    %c0_2 = arith.constant 0 : index
    %c0_3 = arith.constant 0 : index
    %2 = vector.load %arg3[%c0_2, %c0_3] : memref<32x24xbf16, #tpu.memory_space<vmem>>, vector<32x24xbf16>
    %cst = arith.constant dense<0.000000e+00> : vector<8x24xf32>
    %3 = tpu.matmul %1, %2, %cst {dimension_numbers = #tpu.dot_dimension_numbers<[1], [0], [0], [1], [0, 0, 1, 1], [], []>} : vector<8x32xbf16>, vector<32x24xbf16>, vector<8x24xf32> -> vector<8x24xf32>
    %c0_4 = arith.constant 0 : index
    %c0_5 = arith.constant 0 : index
    %4 = vector.load %arg4[%c0_4, %c0_5] : memref<1x24xf32, #tpu.memory_space<vmem>>, vector<1x24xf32>
    %5 = vector.broadcast %4 : vector<1x24xf32> to vector<8x24xf32>
    %6 = arith.addf %3, %5 : vector<8x24xf32>
    %7 = arith.truncf %6 : vector<8x24xf32> to vector<8x24xbf16>
    %c0_6 = arith.constant 0 : index
    %c0_7 = arith.constant 0 : index
    %8 = vector.load %arg5[%c0_6, %c0_7] : memref<24x64xbf16, #tpu.memory_space<vmem>>, vector<24x64xbf16>
    %cst_8 = arith.constant dense<0.000000e+00> : vector<8x64xf32>
    %9 = tpu.matmul %7, %8, %cst_8 {dimension_numbers = #tpu.dot_dimension_numbers<[1], [0], [0], [1], [0, 0, 1, 1], [], []>} : vector<8x24xbf16>, vector<24x64xbf16>, vector<8x64xf32> -> vector<8x64xf32>
    %c0_9 = arith.constant 0 : index
    %c0_10 = arith.constant 0 : index
    %10 = vector.load %arg6[%c0_9, %c0_10] : memref<1x64xf32, #tpu.memory_space<vmem>>, vector<1x64xf32>
    %11 = vector.broadcast %10 : vector<1x64xf32> to vector<8x64xf32>
    %12 = arith.addf %9, %11 : vector<8x64xf32>
    %c0_11 = arith.constant 0 : index
    %c0_12 = arith.constant 0 : index
    %c0_13 = arith.constant 0 : index
    %13 = vector.load %arg2[%c0_11, %c0_12, %c0_13] : memref<1x5x24xf32, #tpu.memory_space<vmem>>, vector<1x5x24xf32>
    %14 = vector.shape_cast %13 : vector<1x5x24xf32> to vector<5x24xf32>
    %15 = arith.truncf %14 : vector<5x24xf32> to vector<5x24xbf16>
    %c0_14 = arith.constant 0 : index
    %c0_15 = arith.constant 0 : index
    %16 = vector.load %arg7[%c0_14, %c0_15] : memref<24x128xbf16, #tpu.memory_space<vmem>>, vector<24x128xbf16>
    %cst_16 = arith.constant dense<0.000000e+00> : vector<5x128xf32>
    %17 = tpu.matmul %15, %16, %cst_16 {dimension_numbers = #tpu.dot_dimension_numbers<[1], [0], [0], [1], [0, 0, 1, 1], [], []>} : vector<5x24xbf16>, vector<24x128xbf16>, vector<5x128xf32> -> vector<5x128xf32>
    %c0_17 = arith.constant 0 : index
    %c0_18 = arith.constant 0 : index
    %18 = vector.load %arg8[%c0_17, %c0_18] : memref<1x128xf32, #tpu.memory_space<vmem>>, vector<1x128xf32>
    %19 = vector.broadcast %18 : vector<1x128xf32> to vector<5x128xf32>
    %20 = arith.addf %17, %19 : vector<5x128xf32>
    %cst_19 = arith.constant 2.500000e-01 : f32
    %21 = vector.broadcast %cst_19 : f32 to vector<8x64xf32>
    %22 = arith.mulf %12, %21 : vector<8x64xf32>
    %23 = arith.truncf %22 : vector<8x64xf32> to vector<8x64xbf16>
    %24 = arith.truncf %20 : vector<5x128xf32> to vector<5x128xbf16>
    %25 = vector.extract_strided_slice %23 {offsets = [0, 0], sizes = [8, 16], strides = [1, 1]} : vector<8x64xbf16> to vector<8x16xbf16>
    %26 = vector.extract_strided_slice %24 {offsets = [0, 0], sizes = [5, 16], strides = [1, 1]} : vector<5x128xbf16> to vector<5x16xbf16>
    %27 = vector.extract_strided_slice %24 {offsets = [0, 64], sizes = [5, 16], strides = [1, 1]} : vector<5x128xbf16> to vector<5x16xbf16>
    %cst_20 = arith.constant dense<0.000000e+00> : vector<8x5xf32>
    %28 = tpu.matmul %25, %26, %cst_20 {dimension_numbers = #tpu.dot_dimension_numbers<[1], [1], [0], [0], [0, 0, 1, 0], [], []>} : vector<8x16xbf16>, vector<5x16xbf16>, vector<8x5xf32> -> vector<8x5xf32>
    %cst_21 = arith.constant dense<0xFF800000> : vector<8xf32>
    %29 = vector.multi_reduction <maximumf>, %28, %cst_21 [1] : vector<8x5xf32> to vector<8xf32>
    %30 = vector.shape_cast %29 : vector<8xf32> to vector<8x1xf32>
    %31 = vector.broadcast %30 : vector<8x1xf32> to vector<8x5xf32>
    %32 = arith.subf %28, %31 : vector<8x5xf32>
    %33 = math.exp %32 : vector<8x5xf32>
    %cst_22 = arith.constant dense<0.000000e+00> : vector<8xf32>
    %34 = vector.multi_reduction <add>, %33, %cst_22 [1] : vector<8x5xf32> to vector<8xf32>
    %35 = vector.shape_cast %34 : vector<8xf32> to vector<8x1xf32>
    %36 = tpu.reciprocal %35 {approx = true} : vector<8x1xf32> -> vector<8x1xf32>
    %37 = vector.broadcast %36 : vector<8x1xf32> to vector<8x5xf32>
    %38 = arith.mulf %33, %37 : vector<8x5xf32>
    %c0_23 = arith.constant 0 : index
    %c0_24 = arith.constant 0 : index
    %c0_25 = arith.constant 0 : index
    %c0_26 = arith.constant 0 : index
    %39 = vector.load %arg15[%c0_23, %c0_24, %c0_25, %c0_26] : memref<1x4x8x5xf32, #tpu.memory_space<vmem>>, vector<1x1x8x5xf32>
    %40 = vector.shape_cast %39 : vector<1x1x8x5xf32> to vector<8x5xf32>
    %41 = vector.shape_cast %38 : vector<8x5xf32> to vector<1x1x8x5xf32>
    tpu.vector_store %arg15[%c0_23, %c0_24, %c0_25, %c0_26], %41 {strides = array<i32>} : memref<1x4x8x5xf32, #tpu.memory_space<vmem>>, vector<1x1x8x5xf32>,
    %42 = arith.truncf %38 : vector<8x5xf32> to vector<8x5xbf16>
    %cst_27 = arith.constant dense<0.000000e+00> : vector<8x16xf32>
    %43 = tpu.matmul %42, %27, %cst_27 {dimension_numbers = #tpu.dot_dimension_numbers<[1], [0], [0], [1], [0, 0, 1, 1], [], []>} : vector<8x5xbf16>, vector<5x16xbf16>, vector<8x16xf32> -> vector<8x16xf32>
    %44 = vector.extract_strided_slice %23 {offsets = [0, 16], sizes = [8, 16], strides = [1, 1]} : vector<8x64xbf16> to vector<8x16xbf16>
    %45 = vector.extract_strided_slice %24 {offsets = [0, 16], sizes = [5, 16], strides = [1, 1]} : vector<5x128xbf16> to vector<5x16xbf16>
    %46 = vector.extract_strided_slice %24 {offsets = [0, 80], sizes = [5, 16], strides = [1, 1]} : vector<5x128xbf16> to vector<5x16xbf16>
    %cst_28 = arith.constant dense<0.000000e+00> : vector<8x5xf32>
    %47 = tpu.matmul %44, %45, %cst_28 {dimension_numbers = #tpu.dot_dimension_numbers<[1], [1], [0], [0], [0, 0, 1, 0], [], []>} : vector<8x16xbf16>, vector<5x16xbf16>, vector<8x5xf32> -> vector<8x5xf32>
    %cst_29 = arith.constant dense<0xFF800000> : vector<8xf32>
    %48 = vector.multi_reduction <maximumf>, %47, %cst_29 [1] : vector<8x5xf32> to vector<8xf32>
    %49 = vector.shape_cast %48 : vector<8xf32> to vector<8x1xf32>
    %50 = vector.broadcast %49 : vector<8x1xf32> to vector<8x5xf32>
    %51 = arith.subf %47, %50 : vector<8x5xf32>
    %52 = math.exp %51 : vector<8x5xf32>
    %cst_30 = arith.constant dense<0.000000e+00> : vector<8xf32>
    %53 = vector.multi_reduction <add>, %52, %cst_30 [1] : vector<8x5xf32> to vector<8xf32>
    %54 = vector.shape_cast %53 : vector<8xf32> to vector<8x1xf32>
    %55 = tpu.reciprocal %54 {approx = true} : vector<8x1xf32> -> vector<8x1xf32>
    %56 = vector.broadcast %55 : vector<8x1xf32> to vector<8x5xf32>
    %57 = arith.mulf %52, %56 : vector<8x5xf32>
    %c0_31 = arith.constant 0 : index
    %c1 = arith.constant 1 : index
    %c0_32 = arith.constant 0 : index
    %c0_33 = arith.constant 0 : index
    %58 = vector.load %arg15[%c0_31, %c1, %c0_32, %c0_33] : memref<1x4x8x5xf32, #tpu.memory_space<vmem>>, vector<1x1x8x5xf32>
    %59 = vector.shape_cast %58 : vector<1x1x8x5xf32> to vector<8x5xf32>
    %60 = vector.shape_cast %57 : vector<8x5xf32> to vector<1x1x8x5xf32>
    tpu.vector_store %arg15[%c0_31, %c1, %c0_32, %c0_33], %60 {strides = array<i32>} : memref<1x4x8x5xf32, #tpu.memory_space<vmem>>, vector<1x1x8x5xf32>,
    %61 = arith.truncf %57 : vector<8x5xf32> to vector<8x5xbf16>
    %cst_34 = arith.constant dense<0.000000e+00> : vector<8x16xf32>
    %62 = tpu.matmul %61, %46, %cst_34 {dimension_numbers = #tpu.dot_dimension_numbers<[1], [0], [0], [1], [0, 0, 1, 1], [], []>} : vector<8x5xbf16>, vector<5x16xbf16>, vector<8x16xf32> -> vector<8x16xf32>
    %63 = vector.extract_strided_slice %23 {offsets = [0, 32], sizes = [8, 16], strides = [1, 1]} : vector<8x64xbf16> to vector<8x16xbf16>
    %64 = vector.extract_strided_slice %24 {offsets = [0, 32], sizes = [5, 16], strides = [1, 1]} : vector<5x128xbf16> to vector<5x16xbf16>
    %65 = vector.extract_strided_slice %24 {offsets = [0, 96], sizes = [5, 16], strides = [1, 1]} : vector<5x128xbf16> to vector<5x16xbf16>
    %cst_35 = arith.constant dense<0.000000e+00> : vector<8x5xf32>
    %66 = tpu.matmul %63, %64, %cst_35 {dimension_numbers = #tpu.dot_dimension_numbers<[1], [1], [0], [0], [0, 0, 1, 0], [], []>} : vector<8x16xbf16>, vector<5x16xbf16>, vector<8x5xf32> -> vector<8x5xf32>
    %cst_36 = arith.constant dense<0xFF800000> : vector<8xf32>
    %67 = vector.multi_reduction <maximumf>, %66, %cst_36 [1] : vector<8x5xf32> to vector<8xf32>
    %68 = vector.shape_cast %67 : vector<8xf32> to vector<8x1xf32>
    %69 = vector.broadcast %68 : vector<8x1xf32> to vector<8x5xf32>
    %70 = arith.subf %66, %69 : vector<8x5xf32>
    %71 = math.exp %70 : vector<8x5xf32>
    %cst_37 = arith.constant dense<0.000000e+00> : vector<8xf32>
    %72 = vector.multi_reduction <add>, %71, %cst_37 [1] : vector<8x5xf32> to vector<8xf32>
    %73 = vector.shape_cast %72 : vector<8xf32> to vector<8x1xf32>
    %74 = tpu.reciprocal %73 {approx = true} : vector<8x1xf32> -> vector<8x1xf32>
    %75 = vector.broadcast %74 : vector<8x1xf32> to vector<8x5xf32>
    %76 = arith.mulf %71, %75 : vector<8x5xf32>
    %c0_38 = arith.constant 0 : index
    %c2 = arith.constant 2 : index
    %c0_39 = arith.constant 0 : index
    %c0_40 = arith.constant 0 : index
    %77 = vector.load %arg15[%c0_38, %c2, %c0_39, %c0_40] : memref<1x4x8x5xf32, #tpu.memory_space<vmem>>, vector<1x1x8x5xf32>
    %78 = vector.shape_cast %77 : vector<1x1x8x5xf32> to vector<8x5xf32>
    %79 = vector.shape_cast %76 : vector<8x5xf32> to vector<1x1x8x5xf32>
    tpu.vector_store %arg15[%c0_38, %c2, %c0_39, %c0_40], %79 {strides = array<i32>} : memref<1x4x8x5xf32, #tpu.memory_space<vmem>>, vector<1x1x8x5xf32>,
    %80 = arith.truncf %76 : vector<8x5xf32> to vector<8x5xbf16>
    %cst_41 = arith.constant dense<0.000000e+00> : vector<8x16xf32>
    %81 = tpu.matmul %80, %65, %cst_41 {dimension_numbers = #tpu.dot_dimension_numbers<[1], [0], [0], [1], [0, 0, 1, 1], [], []>} : vector<8x5xbf16>, vector<5x16xbf16>, vector<8x16xf32> -> vector<8x16xf32>
    %82 = vector.extract_strided_slice %23 {offsets = [0, 48], sizes = [8, 16], strides = [1, 1]} : vector<8x64xbf16> to vector<8x16xbf16>
    %83 = vector.extract_strided_slice %24 {offsets = [0, 48], sizes = [5, 16], strides = [1, 1]} : vector<5x128xbf16> to vector<5x16xbf16>
    %84 = vector.extract_strided_slice %24 {offsets = [0, 112], sizes = [5, 16], strides = [1, 1]} : vector<5x128xbf16> to vector<5x16xbf16>
    %cst_42 = arith.constant dense<0.000000e+00> : vector<8x5xf32>
    %85 = tpu.matmul %82, %83, %cst_42 {dimension_numbers = #tpu.dot_dimension_numbers<[1], [1], [0], [0], [0, 0, 1, 0], [], []>} : vector<8x16xbf16>, vector<5x16xbf16>, vector<8x5xf32> -> vector<8x5xf32>
    %cst_43 = arith.constant dense<0xFF800000> : vector<8xf32>
    %86 = vector.multi_reduction <maximumf>, %85, %cst_43 [1] : vector<8x5xf32> to vector<8xf32>
    %87 = vector.shape_cast %86 : vector<8xf32> to vector<8x1xf32>
    %88 = vector.broadcast %87 : vector<8x1xf32> to vector<8x5xf32>
    %89 = arith.subf %85, %88 : vector<8x5xf32>
    %90 = math.exp %89 : vector<8x5xf32>
    %cst_44 = arith.constant dense<0.000000e+00> : vector<8xf32>
    %91 = vector.multi_reduction <add>, %90, %cst_44 [1] : vector<8x5xf32> to vector<8xf32>
    %92 = vector.shape_cast %91 : vector<8xf32> to vector<8x1xf32>
    %93 = tpu.reciprocal %92 {approx = true} : vector<8x1xf32> -> vector<8x1xf32>
    %94 = vector.broadcast %93 : vector<8x1xf32> to vector<8x5xf32>
    %95 = arith.mulf %90, %94 : vector<8x5xf32>
    %c0_45 = arith.constant 0 : index
    %c3 = arith.constant 3 : index
    %c0_46 = arith.constant 0 : index
    %c0_47 = arith.constant 0 : index
    %96 = vector.load %arg15[%c0_45, %c3, %c0_46, %c0_47] : memref<1x4x8x5xf32, #tpu.memory_space<vmem>>, vector<1x1x8x5xf32>
    %97 = vector.shape_cast %96 : vector<1x1x8x5xf32> to vector<8x5xf32>
    %98 = vector.shape_cast %95 : vector<8x5xf32> to vector<1x1x8x5xf32>
    tpu.vector_store %arg15[%c0_45, %c3, %c0_46, %c0_47], %98 {strides = array<i32>} : memref<1x4x8x5xf32, #tpu.memory_space<vmem>>, vector<1x1x8x5xf32>,
    %99 = arith.truncf %95 : vector<8x5xf32> to vector<8x5xbf16>
    %cst_48 = arith.constant dense<0.000000e+00> : vector<8x16xf32>
    %100 = tpu.matmul %99, %84, %cst_48 {dimension_numbers = #tpu.dot_dimension_numbers<[1], [0], [0], [1], [0, 0, 1, 1], [], []>} : vector<8x5xbf16>, vector<5x16xbf16>, vector<8x16xf32> -> vector<8x16xf32>
    %101 = tpu.concatenate %43, %62, %81, %100 in 1 : vector<8x16xf32>, vector<8x16xf32>, vector<8x16xf32>, vector<8x16xf32> -> vector<8x64xf32>
    %102 = arith.truncf %101 : vector<8x64xf32> to vector<8x64xbf16>
    %c0_49 = arith.constant 0 : index
    %c0_50 = arith.constant 0 : index
    %103 = vector.load %arg9[%c0_49, %c0_50] : memref<64x24xbf16, #tpu.memory_space<vmem>>, vector<64x24xbf16>
    %cst_51 = arith.constant dense<0.000000e+00> : vector<8x24xf32>
    %104 = tpu.matmul %102, %103, %cst_51 {dimension_numbers = #tpu.dot_dimension_numbers<[1], [0], [0], [1], [0, 0, 1, 1], [], []>} : vector<8x64xbf16>, vector<64x24xbf16>, vector<8x24xf32> -> vector<8x24xf32>
    %c0_52 = arith.constant 0 : index
    %c0_53 = arith.constant 0 : index
    %105 = vector.load %arg10[%c0_52, %c0_53] : memref<1x24xf32, #tpu.memory_space<vmem>>, vector<1x24xf32>
    %106 = vector.broadcast %105 : vector<1x24xf32> to vector<8x24xf32>
    %107 = arith.addf %104, %106 : vector<8x24xf32>
    %108 = arith.addf %107, %6 : vector<8x24xf32>
    %cst_54 = arith.constant dense<0.000000e+00> : vector<8xf32>
    %109 = vector.multi_reduction <add>, %108, %cst_54 [1] : vector<8x24xf32> to vector<8xf32>
    %110 = vector.shape_cast %109 : vector<8xf32> to vector<8x1xf32>
    %cst_55 = arith.constant 2.400000e+01 : f32
    %111 = vector.broadcast %cst_55 : f32 to vector<8x1xf32>
    %112 = arith.divf %110, %111 : vector<8x1xf32>
    %113 = vector.broadcast %112 : vector<8x1xf32> to vector<8x24xf32>
    %114 = arith.subf %108, %113 : vector<8x24xf32>
    %115 = arith.mulf %114, %114 : vector<8x24xf32>
    %cst_56 = arith.constant dense<0.000000e+00> : vector<8xf32>
    %116 = vector.multi_reduction <add>, %115, %cst_56 [1] : vector<8x24xf32> to vector<8xf32>
    %117 = vector.shape_cast %116 : vector<8xf32> to vector<8x1xf32>
    %cst_57 = arith.constant 2.400000e+01 : f32
    %118 = vector.broadcast %cst_57 : f32 to vector<8x1xf32>
    %119 = arith.divf %117, %118 : vector<8x1xf32>
    %120 = vector.broadcast %112 : vector<8x1xf32> to vector<8x24xf32>
    %121 = arith.subf %108, %120 : vector<8x24xf32>
    %cst_58 = arith.constant 9.99999974E-6 : f32
    %122 = vector.broadcast %cst_58 : f32 to vector<8x1xf32>
    %123 = arith.addf %119, %122 : vector<8x1xf32>
    %124 = math.rsqrt %123 : vector<8x1xf32>
    %125 = vector.broadcast %124 : vector<8x1xf32> to vector<8x24xf32>
    %126 = arith.mulf %121, %125 : vector<8x24xf32>
    %c0_59 = arith.constant 0 : index
    %c0_60 = arith.constant 0 : index
    %127 = vector.load %arg11[%c0_59, %c0_60] : memref<1x24xf32, #tpu.memory_space<vmem>>, vector<1x24xf32>
    %128 = vector.broadcast %127 : vector<1x24xf32> to vector<8x24xf32>
    %129 = arith.mulf %126, %128 : vector<8x24xf32>
    %c0_61 = arith.constant 0 : index
    %c0_62 = arith.constant 0 : index
    %130 = vector.load %arg12[%c0_61, %c0_62] : memref<1x24xf32, #tpu.memory_space<vmem>>, vector<1x24xf32>
    %131 = vector.broadcast %130 : vector<1x24xf32> to vector<8x24xf32>
    %132 = arith.addf %129, %131 : vector<8x24xf32>
    %c0_63 = arith.constant 0 : index
    %c0_64 = arith.constant 0 : index
    %c0_65 = arith.constant 0 : index
    %133 = vector.load %arg13[%c0_63, %c0_64, %c0_65] : memref<1x8x1xf32, #tpu.memory_space<vmem>>, vector<1x8x1xf32>
    %134 = vector.shape_cast %133 : vector<1x8x1xf32> to vector<8x1xf32>
    %135 = vector.broadcast %134 : vector<8x1xf32> to vector<8x24xf32>
    %136 = arith.mulf %132, %135 : vector<8x24xf32>
    %137 = arith.truncf %136 : vector<8x24xf32> to vector<8x24xbf16>
    %c0_66 = arith.constant 0 : index
    %c0_67 = arith.constant 0 : index
    %c0_68 = arith.constant 0 : index
    %138 = vector.load %arg14[%c0_66, %c0_67, %c0_68] : memref<1x8x24xbf16, #tpu.memory_space<vmem>>, vector<1x8x24xbf16>
    %139 = vector.shape_cast %138 : vector<1x8x24xbf16> to vector<8x24xbf16>
    %140 = vector.shape_cast %137 : vector<8x24xbf16> to vector<1x8x24xbf16>
    tpu.vector_store %arg14[%c0_66, %c0_67, %c0_68], %140 {strides = array<i32>} : memref<1x8x24xbf16, #tpu.memory_space<vmem>>, vector<1x8x24xbf16>,
    return
  }
  func.func @transform_0(%arg0: i32) -> (i32, i32, i32) {
    %c0_i32 = arith.constant 0 : i32
    %c0_i32_0 = arith.constant 0 : i32
    %c0_i32_1 = arith.constant 0 : i32
    return %arg0, %c0_i32, %c0_i32_0 : i32, i32, i32
  }
  func.func @transform_1(%arg0: i32) -> (i32, i32, i32) {
    %c0_i32 = arith.constant 0 : i32
    %c0_i32_0 = arith.constant 0 : i32
    %c0_i32_1 = arith.constant 0 : i32
    return %arg0, %c0_i32, %c0_i32_0 : i32, i32, i32
  }
  func.func @transform_2(%arg0: i32) -> (i32, i32) {
    %c0_i32 = arith.constant 0 : i32
    %c0_i32_0 = arith.constant 0 : i32
    %c0_i32_1 = arith.constant 0 : i32
    return %c0_i32, %c0_i32_0 : i32, i32
  }
  func.func @transform_3(%arg0: i32) -> (i32, i32) {
    %c0_i32 = arith.constant 0 : i32
    %c0_i32_0 = arith.constant 0 : i32
    %c0_i32_1 = arith.constant 0 : i32
    return %c0_i32, %c0_i32_0 : i32, i32
  }
  func.func @transform_4(%arg0: i32) -> (i32, i32) {
    %c0_i32 = arith.constant 0 : i32
    %c0_i32_0 = arith.constant 0 : i32
    %c0_i32_1 = arith.constant 0 : i32
    return %c0_i32, %c0_i32_0 : i32, i32
  }
  func.func @transform_5(%arg0: i32) -> (i32, i32) {
    %c0_i32 = arith.constant 0 : i32
    %c0_i32_0 = arith.constant 0 : i32
    %c0_i32_1 = arith.constant 0 : i32
    return %c0_i32, %c0_i32_0 : i32, i32
  }
  func.func @transform_6(%arg0: i32) -> (i32, i32) {
    %c0_i32 = arith.constant 0 : i32
    %c0_i32_0 = arith.constant 0 : i32
    %c0_i32_1 = arith.constant 0 : i32
    return %c0_i32, %c0_i32_0 : i32, i32
  }
  func.func @transform_7(%arg0: i32) -> (i32, i32) {
    %c0_i32 = arith.constant 0 : i32
    %c0_i32_0 = arith.constant 0 : i32
    %c0_i32_1 = arith.constant 0 : i32
    return %c0_i32, %c0_i32_0 : i32, i32
  }
  func.func @transform_8(%arg0: i32) -> (i32, i32) {
    %c0_i32 = arith.constant 0 : i32
    %c0_i32_0 = arith.constant 0 : i32
    %c0_i32_1 = arith.constant 0 : i32
    return %c0_i32, %c0_i32_0 : i32, i32
  }
  func.func @transform_9(%arg0: i32) -> (i32, i32) {
    %c0_i32 = arith.constant 0 : i32
    %c0_i32_0 = arith.constant 0 : i32
    %c0_i32_1 = arith.constant 0 : i32
    return %c0_i32, %c0_i32_0 : i32, i32
  }
  func.func @transform_10(%arg0: i32) -> (i32, i32) {
    %c0_i32 = arith.constant 0 : i32
    %c0_i32_0 = arith.constant 0 : i32
    %c0_i32_1 = arith.constant 0 : i32
    return %c0_i32, %c0_i32_0 : i32, i32
  }
  func.func @transform_11(%arg0: i32) -> (i32, i32) {
    %c0_i32 = arith.constant 0 : i32
    %c0_i32_0 = arith.constant 0 : i32
    %c0_i32_1 = arith.constant 0 : i32
    return %c0_i32, %c0_i32_0 : i32, i32
  }
  func.func @transform_12(%arg0: i32) -> (i32, i32, i32) {
    %c0_i32 = arith.constant 0 : i32
    %c0_i32_0 = arith.constant 0 : i32
    %c0_i32_1 = arith.constant 0 : i32
    return %arg0, %c0_i32, %c0_i32_0 : i32, i32, i32
  }
  func.func @transform_13(%arg0: i32) -> (i32, i32, i32) {
    %c0_i32 = arith.constant 0 : i32
    %c0_i32_0 = arith.constant 0 : i32
    %c0_i32_1 = arith.constant 0 : i32
    return %arg0, %c0_i32, %c0_i32_0 : i32, i32, i32
  }
  func.func @transform_14(%arg0: i32) -> (i32, i32, i32, i32) {
    %c0_i32 = arith.constant 0 : i32
    %c0_i32_0 = arith.constant 0 : i32
    %c0_i32_1 = arith.constant 0 : i32
    %c0_i32_2 = arith.constant 0 : i32
    return %arg0, %c0_i32, %c0_i32_0, %c0_i32_1 : i32, i32, i32, i32
  }
}

module attributes {stable_mosaic.version = 11 : i64} {
  func.func @_mha_kernel(%arg0: i32, %arg1: memref<1x8x24xbf16, #tpu.memory_space<vmem>>, %arg2: memref<1x8x48xf32, #tpu.memory_space<vmem>>, %arg3: memref<24x48xbf16, #tpu.memory_space<vmem>>, %arg4: memref<1x48xf32, #tpu.memory_space<vmem>>, %arg5: memref<48x64xbf16, #tpu.memory_space<vmem>>, %arg6: memref<1x64xf32, #tpu.memory_space<vmem>>, %arg7: memref<48x128xbf16, #tpu.memory_space<vmem>>, %arg8: memref<1x128xf32, #tpu.memory_space<vmem>>, %arg9: memref<64x48xbf16, #tpu.memory_space<vmem>>, %arg10: memref<1x48xf32, #tpu.memory_space<vmem>>, %arg11: memref<1x48xf32, #tpu.memory_space<vmem>>, %arg12: memref<1x48xf32, #tpu.memory_space<vmem>>, %arg13: memref<1x4x8x5xf32, #tpu.memory_space<vmem>>, %arg14: memref<1x8x1xf32, #tpu.memory_space<vmem>>, %arg15: memref<1x8x48xbf16, #tpu.memory_space<vmem>>, %arg16: memref<1x4x8x8xf32, #tpu.memory_space<vmem>>) attributes {dimension_semantics = [#tpu.dimension_semantics<parallel>], iteration_bounds = array<i64: 2>, scalar_prefetch = 0 : i64, scratch_operands = 0 : i64, tpu.core_type = #tpu.core_type<tc>, window_params = [{transform_indices = @transform_0, window_bounds = array<i64: 1, 8, 24>}, {transform_indices = @transform_1, window_bounds = array<i64: 1, 8, 48>}, {pipeline_mode = #tpu.pipeline_mode<synchronous>, transform_indices = @transform_2, window_bounds = array<i64: 24, 48>}, {pipeline_mode = #tpu.pipeline_mode<synchronous>, transform_indices = @transform_3, window_bounds = array<i64: 1, 48>}, {pipeline_mode = #tpu.pipeline_mode<synchronous>, transform_indices = @transform_4, window_bounds = array<i64: 48, 64>}, {pipeline_mode = #tpu.pipeline_mode<synchronous>, transform_indices = @transform_5, window_bounds = array<i64: 1, 64>}, {pipeline_mode = #tpu.pipeline_mode<synchronous>, transform_indices = @transform_6, window_bounds = array<i64: 48, 128>}, {pipeline_mode = #tpu.pipeline_mode<synchronous>, transform_indices = @transform_7, window_bounds = array<i64: 1, 128>}, {pipeline_mode = #tpu.pipeline_mode<synchronous>, transform_indices = @transform_8, window_bounds = array<i64: 64, 48>}, {pipeline_mode = #tpu.pipeline_mode<synchronous>, transform_indices = @transform_9, window_bounds = array<i64: 1, 48>}, {pipeline_mode = #tpu.pipeline_mode<synchronous>, transform_indices = @transform_10, window_bounds = array<i64: 1, 48>}, {pipeline_mode = #tpu.pipeline_mode<synchronous>, transform_indices = @transform_11, window_bounds = array<i64: 1, 48>}, {transform_indices = @transform_12, window_bounds = array<i64: 1, 4, 8, 5>}, {transform_indices = @transform_13, window_bounds = array<i64: 1, 8, 1>}, {transform_indices = @transform_14, window_bounds = array<i64: 1, 8, 48>}, {transform_indices = @transform_15, window_bounds = array<i64: 1, 4, 8, 8>}]} {
    %c0 = arith.constant 0 : index
    %c0_0 = arith.constant 0 : index
    %c0_1 = arith.constant 0 : index
    %0 = vector.load %arg1[%c0, %c0_0, %c0_1] : memref<1x8x24xbf16, #tpu.memory_space<vmem>>, vector<1x8x24xbf16>
    %1 = vector.shape_cast %0 : vector<1x8x24xbf16> to vector<8x24xbf16>
    %c0_2 = arith.constant 0 : index
    %c0_3 = arith.constant 0 : index
    %2 = vector.load %arg3[%c0_2, %c0_3] : memref<24x48xbf16, #tpu.memory_space<vmem>>, vector<24x48xbf16>
    %cst = arith.constant dense<0.000000e+00> : vector<8x48xf32>
    %3 = tpu.matmul %1, %2, %cst {dimension_numbers = #tpu.dot_dimension_numbers<[1], [0], [0], [1], [0, 0, 1, 1], [], []>} : vector<8x24xbf16>, vector<24x48xbf16>, vector<8x48xf32> -> vector<8x48xf32>
    %c0_4 = arith.constant 0 : index
    %c0_5 = arith.constant 0 : index
    %4 = vector.load %arg4[%c0_4, %c0_5] : memref<1x48xf32, #tpu.memory_space<vmem>>, vector<1x48xf32>
    %5 = vector.broadcast %4 : vector<1x48xf32> to vector<8x48xf32>
    %6 = arith.addf %3, %5 : vector<8x48xf32>
    %7 = arith.truncf %6 : vector<8x48xf32> to vector<8x48xbf16>
    %c0_6 = arith.constant 0 : index
    %c0_7 = arith.constant 0 : index
    %8 = vector.load %arg5[%c0_6, %c0_7] : memref<48x64xbf16, #tpu.memory_space<vmem>>, vector<48x64xbf16>
    %cst_8 = arith.constant dense<0.000000e+00> : vector<8x64xf32>
    %9 = tpu.matmul %7, %8, %cst_8 {dimension_numbers = #tpu.dot_dimension_numbers<[1], [0], [0], [1], [0, 0, 1, 1], [], []>} : vector<8x48xbf16>, vector<48x64xbf16>, vector<8x64xf32> -> vector<8x64xf32>
    %c0_9 = arith.constant 0 : index
    %c0_10 = arith.constant 0 : index
    %10 = vector.load %arg6[%c0_9, %c0_10] : memref<1x64xf32, #tpu.memory_space<vmem>>, vector<1x64xf32>
    %11 = vector.broadcast %10 : vector<1x64xf32> to vector<8x64xf32>
    %12 = arith.addf %9, %11 : vector<8x64xf32>
    %c0_11 = arith.constant 0 : index
    %c0_12 = arith.constant 0 : index
    %c0_13 = arith.constant 0 : index
    %13 = vector.load %arg2[%c0_11, %c0_12, %c0_13] : memref<1x8x48xf32, #tpu.memory_space<vmem>>, vector<1x8x48xf32>
    %14 = vector.shape_cast %13 : vector<1x8x48xf32> to vector<8x48xf32>
    %15 = arith.truncf %14 : vector<8x48xf32> to vector<8x48xbf16>
    %c0_14 = arith.constant 0 : index
    %c0_15 = arith.constant 0 : index
    %16 = vector.load %arg7[%c0_14, %c0_15] : memref<48x128xbf16, #tpu.memory_space<vmem>>, vector<48x128xbf16>
    %cst_16 = arith.constant dense<0.000000e+00> : vector<8x128xf32>
    %17 = tpu.matmul %15, %16, %cst_16 {dimension_numbers = #tpu.dot_dimension_numbers<[1], [0], [0], [1], [0, 0, 1, 1], [], []>} : vector<8x48xbf16>, vector<48x128xbf16>, vector<8x128xf32> -> vector<8x128xf32>
    %c0_17 = arith.constant 0 : index
    %c0_18 = arith.constant 0 : index
    %18 = vector.load %arg8[%c0_17, %c0_18] : memref<1x128xf32, #tpu.memory_space<vmem>>, vector<1x128xf32>
    %19 = vector.broadcast %18 : vector<1x128xf32> to vector<8x128xf32>
    %20 = arith.addf %17, %19 : vector<8x128xf32>
    %cst_19 = arith.constant 2.500000e-01 : f32
    %21 = vector.broadcast %cst_19 : f32 to vector<8x64xf32>
    %22 = arith.mulf %12, %21 : vector<8x64xf32>
    %23 = arith.truncf %22 : vector<8x64xf32> to vector<8x64xbf16>
    %24 = arith.truncf %20 : vector<8x128xf32> to vector<8x128xbf16>
    %25 = vector.extract_strided_slice %23 {offsets = [0, 0], sizes = [8, 16], strides = [1, 1]} : vector<8x64xbf16> to vector<8x16xbf16>
    %26 = vector.extract_strided_slice %24 {offsets = [0, 0], sizes = [8, 16], strides = [1, 1]} : vector<8x128xbf16> to vector<8x16xbf16>
    %27 = vector.extract_strided_slice %24 {offsets = [0, 64], sizes = [8, 16], strides = [1, 1]} : vector<8x128xbf16> to vector<8x16xbf16>
    %cst_20 = arith.constant dense<0.000000e+00> : vector<8x8xf32>
    %28 = tpu.matmul %25, %26, %cst_20 {dimension_numbers = #tpu.dot_dimension_numbers<[1], [1], [0], [0], [0, 0, 1, 0], [], []>} : vector<8x16xbf16>, vector<8x16xbf16>, vector<8x8xf32> -> vector<8x8xf32>
    %c0_21 = arith.constant 0 : index
    %c0_22 = arith.constant 0 : index
    %c0_23 = arith.constant 0 : index
    %c0_24 = arith.constant 0 : index
    %29 = vector.load %arg13[%c0_21, %c0_22, %c0_23, %c0_24] : memref<1x4x8x5xf32, #tpu.memory_space<vmem>>, vector<1x1x8x5xf32>
    %30 = vector.shape_cast %29 : vector<1x1x8x5xf32> to vector<8x5xf32>
    %31 = vector.extract_strided_slice %30 {offsets = [0, 3], sizes = [8, 2], strides = [1, 1]} : vector<8x5xf32> to vector<8x2xf32>
    %32 = tpu.concatenate %31, %31, %31, %31 in 1 : vector<8x2xf32>, vector<8x2xf32>, vector<8x2xf32>, vector<8x2xf32> -> vector<8x8xf32>
    %33 = arith.mulf %28, %32 : vector<8x8xf32>
    %cst_25 = arith.constant dense<0xFF800000> : vector<8xf32>
    %34 = vector.multi_reduction <maximumf>, %33, %cst_25 [1] : vector<8x8xf32> to vector<8xf32>
    %35 = vector.shape_cast %34 : vector<8xf32> to vector<8x1xf32>
    %36 = vector.broadcast %35 : vector<8x1xf32> to vector<8x8xf32>
    %37 = arith.subf %33, %36 : vector<8x8xf32>
    %38 = math.exp %37 : vector<8x8xf32>
    %cst_26 = arith.constant dense<0.000000e+00> : vector<8xf32>
    %39 = vector.multi_reduction <add>, %38, %cst_26 [1] : vector<8x8xf32> to vector<8xf32>
    %40 = vector.shape_cast %39 : vector<8xf32> to vector<8x1xf32>
    %41 = tpu.reciprocal %40 {approx = true} : vector<8x1xf32> -> vector<8x1xf32>
    %42 = vector.broadcast %41 : vector<8x1xf32> to vector<8x8xf32>
    %43 = arith.mulf %38, %42 : vector<8x8xf32>
    %c0_27 = arith.constant 0 : index
    %c0_28 = arith.constant 0 : index
    %c0_29 = arith.constant 0 : index
    %c0_30 = arith.constant 0 : index
    %44 = vector.load %arg16[%c0_27, %c0_28, %c0_29, %c0_30] : memref<1x4x8x8xf32, #tpu.memory_space<vmem>>, vector<1x1x8x8xf32>
    %45 = vector.shape_cast %44 : vector<1x1x8x8xf32> to vector<8x8xf32>
    %46 = vector.shape_cast %43 : vector<8x8xf32> to vector<1x1x8x8xf32>
    tpu.vector_store %arg16[%c0_27, %c0_28, %c0_29, %c0_30], %46 {strides = array<i32>} : memref<1x4x8x8xf32, #tpu.memory_space<vmem>>, vector<1x1x8x8xf32>,
    %47 = arith.truncf %43 : vector<8x8xf32> to vector<8x8xbf16>
    %cst_31 = arith.constant dense<0.000000e+00> : vector<8x16xf32>
    %48 = tpu.matmul %47, %27, %cst_31 {dimension_numbers = #tpu.dot_dimension_numbers<[1], [0], [0], [1], [0, 0, 1, 1], [], []>} : vector<8x8xbf16>, vector<8x16xbf16>, vector<8x16xf32> -> vector<8x16xf32>
    %49 = vector.extract_strided_slice %23 {offsets = [0, 16], sizes = [8, 16], strides = [1, 1]} : vector<8x64xbf16> to vector<8x16xbf16>
    %50 = vector.extract_strided_slice %24 {offsets = [0, 16], sizes = [8, 16], strides = [1, 1]} : vector<8x128xbf16> to vector<8x16xbf16>
    %51 = vector.extract_strided_slice %24 {offsets = [0, 80], sizes = [8, 16], strides = [1, 1]} : vector<8x128xbf16> to vector<8x16xbf16>
    %cst_32 = arith.constant dense<0.000000e+00> : vector<8x8xf32>
    %52 = tpu.matmul %49, %50, %cst_32 {dimension_numbers = #tpu.dot_dimension_numbers<[1], [1], [0], [0], [0, 0, 1, 0], [], []>} : vector<8x16xbf16>, vector<8x16xbf16>, vector<8x8xf32> -> vector<8x8xf32>
    %c0_33 = arith.constant 0 : index
    %c1 = arith.constant 1 : index
    %c0_34 = arith.constant 0 : index
    %c0_35 = arith.constant 0 : index
    %53 = vector.load %arg13[%c0_33, %c1, %c0_34, %c0_35] : memref<1x4x8x5xf32, #tpu.memory_space<vmem>>, vector<1x1x8x5xf32>
    %54 = vector.shape_cast %53 : vector<1x1x8x5xf32> to vector<8x5xf32>
    %55 = vector.extract_strided_slice %54 {offsets = [0, 3], sizes = [8, 2], strides = [1, 1]} : vector<8x5xf32> to vector<8x2xf32>
    %56 = tpu.concatenate %55, %55, %55, %55 in 1 : vector<8x2xf32>, vector<8x2xf32>, vector<8x2xf32>, vector<8x2xf32> -> vector<8x8xf32>
    %57 = arith.mulf %52, %56 : vector<8x8xf32>
    %cst_36 = arith.constant dense<0xFF800000> : vector<8xf32>
    %58 = vector.multi_reduction <maximumf>, %57, %cst_36 [1] : vector<8x8xf32> to vector<8xf32>
    %59 = vector.shape_cast %58 : vector<8xf32> to vector<8x1xf32>
    %60 = vector.broadcast %59 : vector<8x1xf32> to vector<8x8xf32>
    %61 = arith.subf %57, %60 : vector<8x8xf32>
    %62 = math.exp %61 : vector<8x8xf32>
    %cst_37 = arith.constant dense<0.000000e+00> : vector<8xf32>
    %63 = vector.multi_reduction <add>, %62, %cst_37 [1] : vector<8x8xf32> to vector<8xf32>
    %64 = vector.shape_cast %63 : vector<8xf32> to vector<8x1xf32>
    %65 = tpu.reciprocal %64 {approx = true} : vector<8x1xf32> -> vector<8x1xf32>
    %66 = vector.broadcast %65 : vector<8x1xf32> to vector<8x8xf32>
    %67 = arith.mulf %62, %66 : vector<8x8xf32>
    %c0_38 = arith.constant 0 : index
    %c1_39 = arith.constant 1 : index
    %c0_40 = arith.constant 0 : index
    %c0_41 = arith.constant 0 : index
    %68 = vector.load %arg16[%c0_38, %c1_39, %c0_40, %c0_41] : memref<1x4x8x8xf32, #tpu.memory_space<vmem>>, vector<1x1x8x8xf32>
    %69 = vector.shape_cast %68 : vector<1x1x8x8xf32> to vector<8x8xf32>
    %70 = vector.shape_cast %67 : vector<8x8xf32> to vector<1x1x8x8xf32>
    tpu.vector_store %arg16[%c0_38, %c1_39, %c0_40, %c0_41], %70 {strides = array<i32>} : memref<1x4x8x8xf32, #tpu.memory_space<vmem>>, vector<1x1x8x8xf32>,
    %71 = arith.truncf %67 : vector<8x8xf32> to vector<8x8xbf16>
    %cst_42 = arith.constant dense<0.000000e+00> : vector<8x16xf32>
    %72 = tpu.matmul %71, %51, %cst_42 {dimension_numbers = #tpu.dot_dimension_numbers<[1], [0], [0], [1], [0, 0, 1, 1], [], []>} : vector<8x8xbf16>, vector<8x16xbf16>, vector<8x16xf32> -> vector<8x16xf32>
    %73 = vector.extract_strided_slice %23 {offsets = [0, 32], sizes = [8, 16], strides = [1, 1]} : vector<8x64xbf16> to vector<8x16xbf16>
    %74 = vector.extract_strided_slice %24 {offsets = [0, 32], sizes = [8, 16], strides = [1, 1]} : vector<8x128xbf16> to vector<8x16xbf16>
    %75 = vector.extract_strided_slice %24 {offsets = [0, 96], sizes = [8, 16], strides = [1, 1]} : vector<8x128xbf16> to vector<8x16xbf16>
    %cst_43 = arith.constant dense<0.000000e+00> : vector<8x8xf32>
    %76 = tpu.matmul %73, %74, %cst_43 {dimension_numbers = #tpu.dot_dimension_numbers<[1], [1], [0], [0], [0, 0, 1, 0], [], []>} : vector<8x16xbf16>, vector<8x16xbf16>, vector<8x8xf32> -> vector<8x8xf32>
    %c0_44 = arith.constant 0 : index
    %c2 = arith.constant 2 : index
    %c0_45 = arith.constant 0 : index
    %c0_46 = arith.constant 0 : index
    %77 = vector.load %arg13[%c0_44, %c2, %c0_45, %c0_46] : memref<1x4x8x5xf32, #tpu.memory_space<vmem>>, vector<1x1x8x5xf32>
    %78 = vector.shape_cast %77 : vector<1x1x8x5xf32> to vector<8x5xf32>
    %79 = vector.extract_strided_slice %78 {offsets = [0, 3], sizes = [8, 2], strides = [1, 1]} : vector<8x5xf32> to vector<8x2xf32>
    %80 = tpu.concatenate %79, %79, %79, %79 in 1 : vector<8x2xf32>, vector<8x2xf32>, vector<8x2xf32>, vector<8x2xf32> -> vector<8x8xf32>
    %81 = arith.mulf %76, %80 : vector<8x8xf32>
    %cst_47 = arith.constant dense<0xFF800000> : vector<8xf32>
    %82 = vector.multi_reduction <maximumf>, %81, %cst_47 [1] : vector<8x8xf32> to vector<8xf32>
    %83 = vector.shape_cast %82 : vector<8xf32> to vector<8x1xf32>
    %84 = vector.broadcast %83 : vector<8x1xf32> to vector<8x8xf32>
    %85 = arith.subf %81, %84 : vector<8x8xf32>
    %86 = math.exp %85 : vector<8x8xf32>
    %cst_48 = arith.constant dense<0.000000e+00> : vector<8xf32>
    %87 = vector.multi_reduction <add>, %86, %cst_48 [1] : vector<8x8xf32> to vector<8xf32>
    %88 = vector.shape_cast %87 : vector<8xf32> to vector<8x1xf32>
    %89 = tpu.reciprocal %88 {approx = true} : vector<8x1xf32> -> vector<8x1xf32>
    %90 = vector.broadcast %89 : vector<8x1xf32> to vector<8x8xf32>
    %91 = arith.mulf %86, %90 : vector<8x8xf32>
    %c0_49 = arith.constant 0 : index
    %c2_50 = arith.constant 2 : index
    %c0_51 = arith.constant 0 : index
    %c0_52 = arith.constant 0 : index
    %92 = vector.load %arg16[%c0_49, %c2_50, %c0_51, %c0_52] : memref<1x4x8x8xf32, #tpu.memory_space<vmem>>, vector<1x1x8x8xf32>
    %93 = vector.shape_cast %92 : vector<1x1x8x8xf32> to vector<8x8xf32>
    %94 = vector.shape_cast %91 : vector<8x8xf32> to vector<1x1x8x8xf32>
    tpu.vector_store %arg16[%c0_49, %c2_50, %c0_51, %c0_52], %94 {strides = array<i32>} : memref<1x4x8x8xf32, #tpu.memory_space<vmem>>, vector<1x1x8x8xf32>,
    %95 = arith.truncf %91 : vector<8x8xf32> to vector<8x8xbf16>
    %cst_53 = arith.constant dense<0.000000e+00> : vector<8x16xf32>
    %96 = tpu.matmul %95, %75, %cst_53 {dimension_numbers = #tpu.dot_dimension_numbers<[1], [0], [0], [1], [0, 0, 1, 1], [], []>} : vector<8x8xbf16>, vector<8x16xbf16>, vector<8x16xf32> -> vector<8x16xf32>
    %97 = vector.extract_strided_slice %23 {offsets = [0, 48], sizes = [8, 16], strides = [1, 1]} : vector<8x64xbf16> to vector<8x16xbf16>
    %98 = vector.extract_strided_slice %24 {offsets = [0, 48], sizes = [8, 16], strides = [1, 1]} : vector<8x128xbf16> to vector<8x16xbf16>
    %99 = vector.extract_strided_slice %24 {offsets = [0, 112], sizes = [8, 16], strides = [1, 1]} : vector<8x128xbf16> to vector<8x16xbf16>
    %cst_54 = arith.constant dense<0.000000e+00> : vector<8x8xf32>
    %100 = tpu.matmul %97, %98, %cst_54 {dimension_numbers = #tpu.dot_dimension_numbers<[1], [1], [0], [0], [0, 0, 1, 0], [], []>} : vector<8x16xbf16>, vector<8x16xbf16>, vector<8x8xf32> -> vector<8x8xf32>
    %c0_55 = arith.constant 0 : index
    %c3 = arith.constant 3 : index
    %c0_56 = arith.constant 0 : index
    %c0_57 = arith.constant 0 : index
    %101 = vector.load %arg13[%c0_55, %c3, %c0_56, %c0_57] : memref<1x4x8x5xf32, #tpu.memory_space<vmem>>, vector<1x1x8x5xf32>
    %102 = vector.shape_cast %101 : vector<1x1x8x5xf32> to vector<8x5xf32>
    %103 = vector.extract_strided_slice %102 {offsets = [0, 3], sizes = [8, 2], strides = [1, 1]} : vector<8x5xf32> to vector<8x2xf32>
    %104 = tpu.concatenate %103, %103, %103, %103 in 1 : vector<8x2xf32>, vector<8x2xf32>, vector<8x2xf32>, vector<8x2xf32> -> vector<8x8xf32>
    %105 = arith.mulf %100, %104 : vector<8x8xf32>
    %cst_58 = arith.constant dense<0xFF800000> : vector<8xf32>
    %106 = vector.multi_reduction <maximumf>, %105, %cst_58 [1] : vector<8x8xf32> to vector<8xf32>
    %107 = vector.shape_cast %106 : vector<8xf32> to vector<8x1xf32>
    %108 = vector.broadcast %107 : vector<8x1xf32> to vector<8x8xf32>
    %109 = arith.subf %105, %108 : vector<8x8xf32>
    %110 = math.exp %109 : vector<8x8xf32>
    %cst_59 = arith.constant dense<0.000000e+00> : vector<8xf32>
    %111 = vector.multi_reduction <add>, %110, %cst_59 [1] : vector<8x8xf32> to vector<8xf32>
    %112 = vector.shape_cast %111 : vector<8xf32> to vector<8x1xf32>
    %113 = tpu.reciprocal %112 {approx = true} : vector<8x1xf32> -> vector<8x1xf32>
    %114 = vector.broadcast %113 : vector<8x1xf32> to vector<8x8xf32>
    %115 = arith.mulf %110, %114 : vector<8x8xf32>
    %c0_60 = arith.constant 0 : index
    %c3_61 = arith.constant 3 : index
    %c0_62 = arith.constant 0 : index
    %c0_63 = arith.constant 0 : index
    %116 = vector.load %arg16[%c0_60, %c3_61, %c0_62, %c0_63] : memref<1x4x8x8xf32, #tpu.memory_space<vmem>>, vector<1x1x8x8xf32>
    %117 = vector.shape_cast %116 : vector<1x1x8x8xf32> to vector<8x8xf32>
    %118 = vector.shape_cast %115 : vector<8x8xf32> to vector<1x1x8x8xf32>
    tpu.vector_store %arg16[%c0_60, %c3_61, %c0_62, %c0_63], %118 {strides = array<i32>} : memref<1x4x8x8xf32, #tpu.memory_space<vmem>>, vector<1x1x8x8xf32>,
    %119 = arith.truncf %115 : vector<8x8xf32> to vector<8x8xbf16>
    %cst_64 = arith.constant dense<0.000000e+00> : vector<8x16xf32>
    %120 = tpu.matmul %119, %99, %cst_64 {dimension_numbers = #tpu.dot_dimension_numbers<[1], [0], [0], [1], [0, 0, 1, 1], [], []>} : vector<8x8xbf16>, vector<8x16xbf16>, vector<8x16xf32> -> vector<8x16xf32>
    %121 = tpu.concatenate %48, %72, %96, %120 in 1 : vector<8x16xf32>, vector<8x16xf32>, vector<8x16xf32>, vector<8x16xf32> -> vector<8x64xf32>
    %122 = arith.truncf %121 : vector<8x64xf32> to vector<8x64xbf16>
    %c0_65 = arith.constant 0 : index
    %c0_66 = arith.constant 0 : index
    %123 = vector.load %arg9[%c0_65, %c0_66] : memref<64x48xbf16, #tpu.memory_space<vmem>>, vector<64x48xbf16>
    %cst_67 = arith.constant dense<0.000000e+00> : vector<8x48xf32>
    %124 = tpu.matmul %122, %123, %cst_67 {dimension_numbers = #tpu.dot_dimension_numbers<[1], [0], [0], [1], [0, 0, 1, 1], [], []>} : vector<8x64xbf16>, vector<64x48xbf16>, vector<8x48xf32> -> vector<8x48xf32>
    %c0_68 = arith.constant 0 : index
    %c0_69 = arith.constant 0 : index
    %125 = vector.load %arg10[%c0_68, %c0_69] : memref<1x48xf32, #tpu.memory_space<vmem>>, vector<1x48xf32>
    %126 = vector.broadcast %125 : vector<1x48xf32> to vector<8x48xf32>
    %127 = arith.addf %124, %126 : vector<8x48xf32>
    %128 = arith.addf %127, %6 : vector<8x48xf32>
    %cst_70 = arith.constant dense<0.000000e+00> : vector<8xf32>
    %129 = vector.multi_reduction <add>, %128, %cst_70 [1] : vector<8x48xf32> to vector<8xf32>
    %130 = vector.shape_cast %129 : vector<8xf32> to vector<8x1xf32>
    %cst_71 = arith.constant 4.800000e+01 : f32
    %131 = vector.broadcast %cst_71 : f32 to vector<8x1xf32>
    %132 = arith.divf %130, %131 : vector<8x1xf32>
    %133 = vector.broadcast %132 : vector<8x1xf32> to vector<8x48xf32>
    %134 = arith.subf %128, %133 : vector<8x48xf32>
    %135 = arith.mulf %134, %134 : vector<8x48xf32>
    %cst_72 = arith.constant dense<0.000000e+00> : vector<8xf32>
    %136 = vector.multi_reduction <add>, %135, %cst_72 [1] : vector<8x48xf32> to vector<8xf32>
    %137 = vector.shape_cast %136 : vector<8xf32> to vector<8x1xf32>
    %cst_73 = arith.constant 4.800000e+01 : f32
    %138 = vector.broadcast %cst_73 : f32 to vector<8x1xf32>
    %139 = arith.divf %137, %138 : vector<8x1xf32>
    %140 = vector.broadcast %132 : vector<8x1xf32> to vector<8x48xf32>
    %141 = arith.subf %128, %140 : vector<8x48xf32>
    %cst_74 = arith.constant 9.99999974E-6 : f32
    %142 = vector.broadcast %cst_74 : f32 to vector<8x1xf32>
    %143 = arith.addf %139, %142 : vector<8x1xf32>
    %144 = math.rsqrt %143 : vector<8x1xf32>
    %145 = vector.broadcast %144 : vector<8x1xf32> to vector<8x48xf32>
    %146 = arith.mulf %141, %145 : vector<8x48xf32>
    %c0_75 = arith.constant 0 : index
    %c0_76 = arith.constant 0 : index
    %147 = vector.load %arg11[%c0_75, %c0_76] : memref<1x48xf32, #tpu.memory_space<vmem>>, vector<1x48xf32>
    %148 = vector.broadcast %147 : vector<1x48xf32> to vector<8x48xf32>
    %149 = arith.mulf %146, %148 : vector<8x48xf32>
    %c0_77 = arith.constant 0 : index
    %c0_78 = arith.constant 0 : index
    %150 = vector.load %arg12[%c0_77, %c0_78] : memref<1x48xf32, #tpu.memory_space<vmem>>, vector<1x48xf32>
    %151 = vector.broadcast %150 : vector<1x48xf32> to vector<8x48xf32>
    %152 = arith.addf %149, %151 : vector<8x48xf32>
    %c0_79 = arith.constant 0 : index
    %c0_80 = arith.constant 0 : index
    %c0_81 = arith.constant 0 : index
    %153 = vector.load %arg14[%c0_79, %c0_80, %c0_81] : memref<1x8x1xf32, #tpu.memory_space<vmem>>, vector<1x8x1xf32>
    %154 = vector.shape_cast %153 : vector<1x8x1xf32> to vector<8x1xf32>
    %155 = vector.broadcast %154 : vector<8x1xf32> to vector<8x48xf32>
    %156 = arith.mulf %152, %155 : vector<8x48xf32>
    %157 = arith.truncf %156 : vector<8x48xf32> to vector<8x48xbf16>
    %c0_82 = arith.constant 0 : index
    %c0_83 = arith.constant 0 : index
    %c0_84 = arith.constant 0 : index
    %158 = vector.load %arg15[%c0_82, %c0_83, %c0_84] : memref<1x8x48xbf16, #tpu.memory_space<vmem>>, vector<1x8x48xbf16>
    %159 = vector.shape_cast %158 : vector<1x8x48xbf16> to vector<8x48xbf16>
    %160 = vector.shape_cast %157 : vector<8x48xbf16> to vector<1x8x48xbf16>
    tpu.vector_store %arg15[%c0_82, %c0_83, %c0_84], %160 {strides = array<i32>} : memref<1x8x48xbf16, #tpu.memory_space<vmem>>, vector<1x8x48xbf16>,
    return
  }
  func.func @transform_0(%arg0: i32) -> (i32, i32, i32) {
    %c0_i32 = arith.constant 0 : i32
    %c0_i32_0 = arith.constant 0 : i32
    %c0_i32_1 = arith.constant 0 : i32
    return %arg0, %c0_i32, %c0_i32_0 : i32, i32, i32
  }
  func.func @transform_1(%arg0: i32) -> (i32, i32, i32) {
    %c0_i32 = arith.constant 0 : i32
    %c0_i32_0 = arith.constant 0 : i32
    %c0_i32_1 = arith.constant 0 : i32
    return %arg0, %c0_i32, %c0_i32_0 : i32, i32, i32
  }
  func.func @transform_2(%arg0: i32) -> (i32, i32) {
    %c0_i32 = arith.constant 0 : i32
    %c0_i32_0 = arith.constant 0 : i32
    %c0_i32_1 = arith.constant 0 : i32
    return %c0_i32, %c0_i32_0 : i32, i32
  }
  func.func @transform_3(%arg0: i32) -> (i32, i32) {
    %c0_i32 = arith.constant 0 : i32
    %c0_i32_0 = arith.constant 0 : i32
    %c0_i32_1 = arith.constant 0 : i32
    return %c0_i32, %c0_i32_0 : i32, i32
  }
  func.func @transform_4(%arg0: i32) -> (i32, i32) {
    %c0_i32 = arith.constant 0 : i32
    %c0_i32_0 = arith.constant 0 : i32
    %c0_i32_1 = arith.constant 0 : i32
    return %c0_i32, %c0_i32_0 : i32, i32
  }
  func.func @transform_5(%arg0: i32) -> (i32, i32) {
    %c0_i32 = arith.constant 0 : i32
    %c0_i32_0 = arith.constant 0 : i32
    %c0_i32_1 = arith.constant 0 : i32
    return %c0_i32, %c0_i32_0 : i32, i32
  }
  func.func @transform_6(%arg0: i32) -> (i32, i32) {
    %c0_i32 = arith.constant 0 : i32
    %c0_i32_0 = arith.constant 0 : i32
    %c0_i32_1 = arith.constant 0 : i32
    return %c0_i32, %c0_i32_0 : i32, i32
  }
  func.func @transform_7(%arg0: i32) -> (i32, i32) {
    %c0_i32 = arith.constant 0 : i32
    %c0_i32_0 = arith.constant 0 : i32
    %c0_i32_1 = arith.constant 0 : i32
    return %c0_i32, %c0_i32_0 : i32, i32
  }
  func.func @transform_8(%arg0: i32) -> (i32, i32) {
    %c0_i32 = arith.constant 0 : i32
    %c0_i32_0 = arith.constant 0 : i32
    %c0_i32_1 = arith.constant 0 : i32
    return %c0_i32, %c0_i32_0 : i32, i32
  }
  func.func @transform_9(%arg0: i32) -> (i32, i32) {
    %c0_i32 = arith.constant 0 : i32
    %c0_i32_0 = arith.constant 0 : i32
    %c0_i32_1 = arith.constant 0 : i32
    return %c0_i32, %c0_i32_0 : i32, i32
  }
  func.func @transform_10(%arg0: i32) -> (i32, i32) {
    %c0_i32 = arith.constant 0 : i32
    %c0_i32_0 = arith.constant 0 : i32
    %c0_i32_1 = arith.constant 0 : i32
    return %c0_i32, %c0_i32_0 : i32, i32
  }
  func.func @transform_11(%arg0: i32) -> (i32, i32) {
    %c0_i32 = arith.constant 0 : i32
    %c0_i32_0 = arith.constant 0 : i32
    %c0_i32_1 = arith.constant 0 : i32
    return %c0_i32, %c0_i32_0 : i32, i32
  }
  func.func @transform_12(%arg0: i32) -> (i32, i32, i32, i32) {
    %c0_i32 = arith.constant 0 : i32
    %c0_i32_0 = arith.constant 0 : i32
    %c0_i32_1 = arith.constant 0 : i32
    %c0_i32_2 = arith.constant 0 : i32
    return %arg0, %c0_i32, %c0_i32_0, %c0_i32_1 : i32, i32, i32, i32
  }
  func.func @transform_13(%arg0: i32) -> (i32, i32, i32) {
    %c0_i32 = arith.constant 0 : i32
    %c0_i32_0 = arith.constant 0 : i32
    %c0_i32_1 = arith.constant 0 : i32
    return %arg0, %c0_i32, %c0_i32_0 : i32, i32, i32
  }
  func.func @transform_14(%arg0: i32) -> (i32, i32, i32) {
    %c0_i32 = arith.constant 0 : i32
    %c0_i32_0 = arith.constant 0 : i32
    %c0_i32_1 = arith.constant 0 : i32
    return %arg0, %c0_i32, %c0_i32_0 : i32, i32, i32
  }
  func.func @transform_15(%arg0: i32) -> (i32, i32, i32, i32) {
    %c0_i32 = arith.constant 0 : i32
    %c0_i32_0 = arith.constant 0 : i32
    %c0_i32_1 = arith.constant 0 : i32
    %c0_i32_2 = arith.constant 0 : i32
    return %arg0, %c0_i32, %c0_i32_0, %c0_i32_1 : i32, i32, i32, i32
  }
}

module attributes {stable_mosaic.version = 11 : i64} {
  func.func @_proj_ffn_kernel(%arg0: i32, %arg1: memref<1x8x48xbf16, #tpu.memory_space<vmem>>, %arg2: memref<48x32xbf16, #tpu.memory_space<vmem>>, %arg3: memref<1x32xf32, #tpu.memory_space<vmem>>, %arg4: memref<32x64xbf16, #tpu.memory_space<vmem>>, %arg5: memref<1x64xf32, #tpu.memory_space<vmem>>, %arg6: memref<64x32xbf16, #tpu.memory_space<vmem>>, %arg7: memref<1x32xf32, #tpu.memory_space<vmem>>, %arg8: memref<1x32xf32, #tpu.memory_space<vmem>>, %arg9: memref<1x32xf32, #tpu.memory_space<vmem>>, %arg10: memref<1x8x1xf32, #tpu.memory_space<vmem>>, %arg11: memref<1x8x32xf32, #tpu.memory_space<vmem>>) attributes {dimension_semantics = [#tpu.dimension_semantics<parallel>], iteration_bounds = array<i64: 2>, scalar_prefetch = 0 : i64, scratch_operands = 0 : i64, tpu.core_type = #tpu.core_type<tc>, window_params = [{transform_indices = @transform_0, window_bounds = array<i64: 1, 8, 48>}, {pipeline_mode = #tpu.pipeline_mode<synchronous>, transform_indices = @transform_1, window_bounds = array<i64: 48, 32>}, {pipeline_mode = #tpu.pipeline_mode<synchronous>, transform_indices = @transform_2, window_bounds = array<i64: 1, 32>}, {pipeline_mode = #tpu.pipeline_mode<synchronous>, transform_indices = @transform_3, window_bounds = array<i64: 32, 64>}, {pipeline_mode = #tpu.pipeline_mode<synchronous>, transform_indices = @transform_4, window_bounds = array<i64: 1, 64>}, {pipeline_mode = #tpu.pipeline_mode<synchronous>, transform_indices = @transform_5, window_bounds = array<i64: 64, 32>}, {pipeline_mode = #tpu.pipeline_mode<synchronous>, transform_indices = @transform_6, window_bounds = array<i64: 1, 32>}, {pipeline_mode = #tpu.pipeline_mode<synchronous>, transform_indices = @transform_7, window_bounds = array<i64: 1, 32>}, {pipeline_mode = #tpu.pipeline_mode<synchronous>, transform_indices = @transform_8, window_bounds = array<i64: 1, 32>}, {transform_indices = @transform_9, window_bounds = array<i64: 1, 8, 1>}, {transform_indices = @transform_10, window_bounds = array<i64: 1, 8, 32>}]} {
    %c0 = arith.constant 0 : index
    %c0_0 = arith.constant 0 : index
    %c0_1 = arith.constant 0 : index
    %0 = vector.load %arg1[%c0, %c0_0, %c0_1] : memref<1x8x48xbf16, #tpu.memory_space<vmem>>, vector<1x8x48xbf16>
    %1 = vector.shape_cast %0 : vector<1x8x48xbf16> to vector<8x48xbf16>
    %c0_2 = arith.constant 0 : index
    %c0_3 = arith.constant 0 : index
    %2 = vector.load %arg2[%c0_2, %c0_3] : memref<48x32xbf16, #tpu.memory_space<vmem>>, vector<48x32xbf16>
    %cst = arith.constant dense<0.000000e+00> : vector<8x32xf32>
    %3 = tpu.matmul %1, %2, %cst {dimension_numbers = #tpu.dot_dimension_numbers<[1], [0], [0], [1], [0, 0, 1, 1], [], []>} : vector<8x48xbf16>, vector<48x32xbf16>, vector<8x32xf32> -> vector<8x32xf32>
    %c0_4 = arith.constant 0 : index
    %c0_5 = arith.constant 0 : index
    %4 = vector.load %arg3[%c0_4, %c0_5] : memref<1x32xf32, #tpu.memory_space<vmem>>, vector<1x32xf32>
    %5 = vector.broadcast %4 : vector<1x32xf32> to vector<8x32xf32>
    %6 = arith.addf %3, %5 : vector<8x32xf32>
    %7 = arith.truncf %6 : vector<8x32xf32> to vector<8x32xbf16>
    %c0_6 = arith.constant 0 : index
    %c0_7 = arith.constant 0 : index
    %8 = vector.load %arg4[%c0_6, %c0_7] : memref<32x64xbf16, #tpu.memory_space<vmem>>, vector<32x64xbf16>
    %cst_8 = arith.constant dense<0.000000e+00> : vector<8x64xf32>
    %9 = tpu.matmul %7, %8, %cst_8 {dimension_numbers = #tpu.dot_dimension_numbers<[1], [0], [0], [1], [0, 0, 1, 1], [], []>} : vector<8x32xbf16>, vector<32x64xbf16>, vector<8x64xf32> -> vector<8x64xf32>
    %c0_9 = arith.constant 0 : index
    %c0_10 = arith.constant 0 : index
    %10 = vector.load %arg5[%c0_9, %c0_10] : memref<1x64xf32, #tpu.memory_space<vmem>>, vector<1x64xf32>
    %11 = vector.broadcast %10 : vector<1x64xf32> to vector<8x64xf32>
    %12 = arith.addf %9, %11 : vector<8x64xf32>
    %cst_11 = arith.constant 0.000000e+00 : f32
    %13 = vector.broadcast %cst_11 : f32 to vector<8x64xf32>
    %14 = arith.maximumf %12, %13 : vector<8x64xf32>
    %15 = arith.truncf %14 : vector<8x64xf32> to vector<8x64xbf16>
    %c0_12 = arith.constant 0 : index
    %c0_13 = arith.constant 0 : index
    %16 = vector.load %arg6[%c0_12, %c0_13] : memref<64x32xbf16, #tpu.memory_space<vmem>>, vector<64x32xbf16>
    %cst_14 = arith.constant dense<0.000000e+00> : vector<8x32xf32>
    %17 = tpu.matmul %15, %16, %cst_14 {dimension_numbers = #tpu.dot_dimension_numbers<[1], [0], [0], [1], [0, 0, 1, 1], [], []>} : vector<8x64xbf16>, vector<64x32xbf16>, vector<8x32xf32> -> vector<8x32xf32>
    %c0_15 = arith.constant 0 : index
    %c0_16 = arith.constant 0 : index
    %18 = vector.load %arg7[%c0_15, %c0_16] : memref<1x32xf32, #tpu.memory_space<vmem>>, vector<1x32xf32>
    %19 = vector.broadcast %18 : vector<1x32xf32> to vector<8x32xf32>
    %20 = arith.addf %17, %19 : vector<8x32xf32>
    %21 = arith.addf %20, %6 : vector<8x32xf32>
    %cst_17 = arith.constant dense<0.000000e+00> : vector<8xf32>
    %22 = vector.multi_reduction <add>, %21, %cst_17 [1] : vector<8x32xf32> to vector<8xf32>
    %23 = vector.shape_cast %22 : vector<8xf32> to vector<8x1xf32>
    %cst_18 = arith.constant 3.200000e+01 : f32
    %24 = vector.broadcast %cst_18 : f32 to vector<8x1xf32>
    %25 = arith.divf %23, %24 : vector<8x1xf32>
    %26 = vector.broadcast %25 : vector<8x1xf32> to vector<8x32xf32>
    %27 = arith.subf %21, %26 : vector<8x32xf32>
    %28 = arith.mulf %27, %27 : vector<8x32xf32>
    %cst_19 = arith.constant dense<0.000000e+00> : vector<8xf32>
    %29 = vector.multi_reduction <add>, %28, %cst_19 [1] : vector<8x32xf32> to vector<8xf32>
    %30 = vector.shape_cast %29 : vector<8xf32> to vector<8x1xf32>
    %cst_20 = arith.constant 3.200000e+01 : f32
    %31 = vector.broadcast %cst_20 : f32 to vector<8x1xf32>
    %32 = arith.divf %30, %31 : vector<8x1xf32>
    %33 = vector.broadcast %25 : vector<8x1xf32> to vector<8x32xf32>
    %34 = arith.subf %21, %33 : vector<8x32xf32>
    %cst_21 = arith.constant 9.99999974E-6 : f32
    %35 = vector.broadcast %cst_21 : f32 to vector<8x1xf32>
    %36 = arith.addf %32, %35 : vector<8x1xf32>
    %37 = math.rsqrt %36 : vector<8x1xf32>
    %38 = vector.broadcast %37 : vector<8x1xf32> to vector<8x32xf32>
    %39 = arith.mulf %34, %38 : vector<8x32xf32>
    %c0_22 = arith.constant 0 : index
    %c0_23 = arith.constant 0 : index
    %40 = vector.load %arg8[%c0_22, %c0_23] : memref<1x32xf32, #tpu.memory_space<vmem>>, vector<1x32xf32>
    %41 = vector.broadcast %40 : vector<1x32xf32> to vector<8x32xf32>
    %42 = arith.mulf %39, %41 : vector<8x32xf32>
    %c0_24 = arith.constant 0 : index
    %c0_25 = arith.constant 0 : index
    %43 = vector.load %arg9[%c0_24, %c0_25] : memref<1x32xf32, #tpu.memory_space<vmem>>, vector<1x32xf32>
    %44 = vector.broadcast %43 : vector<1x32xf32> to vector<8x32xf32>
    %45 = arith.addf %42, %44 : vector<8x32xf32>
    %c0_26 = arith.constant 0 : index
    %c0_27 = arith.constant 0 : index
    %c0_28 = arith.constant 0 : index
    %46 = vector.load %arg10[%c0_26, %c0_27, %c0_28] : memref<1x8x1xf32, #tpu.memory_space<vmem>>, vector<1x8x1xf32>
    %47 = vector.shape_cast %46 : vector<1x8x1xf32> to vector<8x1xf32>
    %48 = vector.broadcast %47 : vector<8x1xf32> to vector<8x32xf32>
    %49 = arith.mulf %45, %48 : vector<8x32xf32>
    %c0_29 = arith.constant 0 : index
    %c0_30 = arith.constant 0 : index
    %c0_31 = arith.constant 0 : index
    %50 = vector.load %arg11[%c0_29, %c0_30, %c0_31] : memref<1x8x32xf32, #tpu.memory_space<vmem>>, vector<1x8x32xf32>
    %51 = vector.shape_cast %50 : vector<1x8x32xf32> to vector<8x32xf32>
    %52 = vector.shape_cast %49 : vector<8x32xf32> to vector<1x8x32xf32>
    tpu.vector_store %arg11[%c0_29, %c0_30, %c0_31], %52 {strides = array<i32>} : memref<1x8x32xf32, #tpu.memory_space<vmem>>, vector<1x8x32xf32>,
    return
  }
  func.func @transform_0(%arg0: i32) -> (i32, i32, i32) {
    %c0_i32 = arith.constant 0 : i32
    %c0_i32_0 = arith.constant 0 : i32
    %c0_i32_1 = arith.constant 0 : i32
    return %arg0, %c0_i32, %c0_i32_0 : i32, i32, i32
  }
  func.func @transform_1(%arg0: i32) -> (i32, i32) {
    %c0_i32 = arith.constant 0 : i32
    %c0_i32_0 = arith.constant 0 : i32
    %c0_i32_1 = arith.constant 0 : i32
    return %c0_i32, %c0_i32_0 : i32, i32
  }
  func.func @transform_2(%arg0: i32) -> (i32, i32) {
    %c0_i32 = arith.constant 0 : i32
    %c0_i32_0 = arith.constant 0 : i32
    %c0_i32_1 = arith.constant 0 : i32
    return %c0_i32, %c0_i32_0 : i32, i32
  }
  func.func @transform_3(%arg0: i32) -> (i32, i32) {
    %c0_i32 = arith.constant 0 : i32
    %c0_i32_0 = arith.constant 0 : i32
    %c0_i32_1 = arith.constant 0 : i32
    return %c0_i32, %c0_i32_0 : i32, i32
  }
  func.func @transform_4(%arg0: i32) -> (i32, i32) {
    %c0_i32 = arith.constant 0 : i32
    %c0_i32_0 = arith.constant 0 : i32
    %c0_i32_1 = arith.constant 0 : i32
    return %c0_i32, %c0_i32_0 : i32, i32
  }
  func.func @transform_5(%arg0: i32) -> (i32, i32) {
    %c0_i32 = arith.constant 0 : i32
    %c0_i32_0 = arith.constant 0 : i32
    %c0_i32_1 = arith.constant 0 : i32
    return %c0_i32, %c0_i32_0 : i32, i32
  }
  func.func @transform_6(%arg0: i32) -> (i32, i32) {
    %c0_i32 = arith.constant 0 : i32
    %c0_i32_0 = arith.constant 0 : i32
    %c0_i32_1 = arith.constant 0 : i32
    return %c0_i32, %c0_i32_0 : i32, i32
  }
  func.func @transform_7(%arg0: i32) -> (i32, i32) {
    %c0_i32 = arith.constant 0 : i32
    %c0_i32_0 = arith.constant 0 : i32
    %c0_i32_1 = arith.constant 0 : i32
    return %c0_i32, %c0_i32_0 : i32, i32
  }
  func.func @transform_8(%arg0: i32) -> (i32, i32) {
    %c0_i32 = arith.constant 0 : i32
    %c0_i32_0 = arith.constant 0 : i32
    %c0_i32_1 = arith.constant 0 : i32
    return %c0_i32, %c0_i32_0 : i32, i32
  }
  func.func @transform_9(%arg0: i32) -> (i32, i32, i32) {
    %c0_i32 = arith.constant 0 : i32
    %c0_i32_0 = arith.constant 0 : i32
    %c0_i32_1 = arith.constant 0 : i32
    return %arg0, %c0_i32, %c0_i32_0 : i32, i32, i32
  }
  func.func @transform_10(%arg0: i32) -> (i32, i32, i32) {
    %c0_i32 = arith.constant 0 : i32
    %c0_i32_0 = arith.constant 0 : i32
    %c0_i32_1 = arith.constant 0 : i32
    return %arg0, %c0_i32, %c0_i32_0 : i32, i32, i32
  }
}

</mosaic_0001>

<bundles_post_ra>
// kernel: _lambda_.4
= control target key start
LH: loop header
LB: loop body
LE: loop exit
PB: predicated region body
PF: predicated region fallthrough
CT: control target
= control target key end

     0   :  { %s1726_s0 = inlined_call_operand.vmem [shape: f32[2,8,32], index: 0, kind: input, shape index: {}]   ;;  %s1727_s1 = inlined_call_operand.vmem [shape: bf16[32,192], index: 1, kind: input, shape index: {}]   ;;  %s1728_s2 = inlined_call_operand.vmem [shape: f32[1,192], index: 2, kind: input, shape index: {}]   ;;  %s1729_s3 = inlined_call_operand.vmem [shape: bf16[64,32], index: 3, kind: input, shape index: {}]   ;;  %s1730_s4 = inlined_call_operand.vmem [shape: f32[1,32], index: 4, kind: input, shape index: {}]   ;;  %s1731_s5 = inlined_call_operand.vmem [shape: f32[1,32], index: 5, kind: input, shape index: {}]   ;;  %s1732_s6 = inlined_call_operand.vmem [shape: f32[1,32], index: 6, kind: input, shape index: {}]   ;;  %s1733_s7 = inlined_call_operand.vmem [shape: f32[2,8,1], index: 7, kind: input, shape index: {}]   ;;  %s1734_s8 = inlined_call_operand.vmem [shape: bf16[2,8,32], index: 8, kind: output, shape index: {0}]   ;;  %s1735_s9 = inlined_call_operand.hbm [shape: f32[2,4,8,8], index: 9, kind: output, shape index: {1}]  }
   0x1   :  { %1737 = sst [smem:[#allocation5_spill]] %s1726_s0 }
   0x2   :  { %1738 = sst [smem:[#allocation6_spill]] %s1727_s1 }
   0x3   :  { %15 = vsyncpa [#allocation3], 0 }
   0x4   :  { %17 = vsyncpa [#allocation3 + $0x1], 0  ;;  %s1477_s30 = smov 0   ;;  %s1479_s10 = smov 0  }
   0x5   :  { %s1481_s11 = smov 0   ;;  %s1483_s12 = smov 0  }
   0x6 LB: > { %s1498_s13 = sadd.s32 4294967295, %s1412_s12   ;;  %s1153_s14 = sadd.s32 4294967294, %s1412_s12   ;;  %s1412_s12 = sphi %s1483_s12, %s1747_s12   ;;  %s1408_s11 = sphi %s1481_s11, %s1746_s11   ;;  %s1404_s10 = sphi %s1479_s10, %s1745_s10   ;;  %s1400_s30 = sphi %s1477_s30, %s1744_s30  }
   0x7   : > { %s1502_s15 = sadd.s32 1, %s1412_s12   ;;  %s234_s16 = sadd.s32 1, %s1408_s11 }
   0x8   : > { %s231_s17 = ssub.s32 %s1412_s12, %s1502_s15  ;;  %p244_p0 = scmp.ne.s32.totalorder %s1408_s11, %s1404_s10 }
   0x9   : > { %p232_p1 = scmp.eq.s32.totalorder %s231_s17, 0  ;;  %p245_p2 = scmp.eq.s32.totalorder %s1498_s13, 1 }
   0xa   : > { %p250_p3 = scmp.ne.s32.totalorder %s1404_s10, %s1400_s30  ;;  %p251_p4 = scmp.eq.s32.totalorder %s1153_s14, 1 }
   0xb   : > { %s1513_s18 = scalar_select %p232_p1, %s1408_s11, %s234_s16  }
   0xc   : > { %p1515_p5 = por %p245_p2, %p244_p0  ;;  %p1519_p6 = por %p251_p4, %p250_p3 }
   0xd   : > { %p1156_p7 = scmp.ge.s32.totalorder %s1412_s12, 1  ;;  %p301_p8 = scmp.lt.s32.totalorder %s1412_s12, 3 }
   0xf   : > { %p302_p9 = pnand %p1156_p7, %p301_p8 }
  0x10   : > { %s1741_s1 = sld [smem:[#allocation6_spill]] (!%p302_p9)  ;;  %p344_p10 = scmp.lt.s32.totalorder (!%p302_p9), %s1498_s13, 1 }
  0x11   : > { %305 = sbr.rel (%p302_p9) target bundleno = 1741 (0x6cd), region = 52  ;;  %s1742_s0 = sld [smem:[#allocation5_spill]] (!%p302_p9) }
  0x12   : > { %s1417_s24 = smov (!%p302_p9), 64   ;;  %s1418_s25 = smov (!%p302_p9), 112  }
  0x13   : > { %s1419_s26 = smov (!%p302_p9), 48   ;;  %s1420_s28 = smov (!%p302_p9), 32  }
  0x14   : > { %s1421_s29 = smov (!%p302_p9), 96   ;;  %s1422_s16 = smov (!%p302_p9), 16  }
  0x15   : > { %s1423_s17 = smov (!%p302_p9), 80  }
  0x16   : > { %v1324_v0 = vld [vmem:[%s1741_s1 + $0x14] ss:$8 sps:$4 sm:$0xff]   ;;  %v1326_v1 = vld [vmem:[%s1741_s1 + $0x10] ss:$8 sps:$4 sm:$0xff]   ;;  %v1414_v2 = vmov 0   ;;  %s1536_s27 = scalar_select %p344_p10, %s1498_s13, 1  ;;  %v365_v8 = vlaneseq }
  0x17   : > { %431 = vmatprep.mubr.bf16.mxu0 %v1414_v2  ;;  %1323 = vset.pattern.permute.xlu0 %v1414_v2  ;;  %v1327_v3 = vld [vmem:[%s1741_s1 + $0x4] ss:$8 sps:$4 sm:$0xff]   ;;  %v1329_v4 = vld [vmem:[%s1741_s1] ss:$8 sps:$4 sm:$0xff]   ;;  %vm395_vm0 = vcmask 261120   ;;  %v1415_v7 = vmov 0.0  }
  0x18   : > { %411 = vmatprep.subr.bf16.mxu0 %v1324_v0  ;;  %s1158_s14 = sshll.u32 %s1536_s27, 3  ;;  %1212 = vmatprep.subr.bf16.mxu1 %v1415_v7  ;;  %v366_v9 = vshrl.u32 %v365_v8, 7  ;;  %v363_v11 = vld [vmem:[%s1728_s2] sm:$0x3]  ;;  %vm1416_vm1 = vmmov 0   ;;  %vm511_vm2 = vcmask 1043456  }
  0x19   : > { %412 = vmatpush1.bf16.msra.mxu0 %v1326_v1  ;;  %s347_s21 = scalar_lea.vmem %s1742_s0, %s1158_s14  ;;  %1214 = vmatprep.mubr.msk.bf16.mxu1 %vm1416_vm1, %v1415_v7  ;;  %vm447_vm3 = vcmask 130048   ;;  %vm494_vm4 = vcmask 64512   ;;  %vm907_vm5 = vcmask 392192   ;;  %vm949_vm6 = vcmask 523264  }
  0x1a   : > { %413 = vmatprep.subr.bf16.mxu0 %v1327_v3  ;;  %v1547_v5 = vld [vmem:[%s347_s21] sm:$0xff]  ;;  %v367_v10 = vsub.s32 0, %v366_v9  ;;  %v371_v12 = vsub.s32 1, %v366_v9  ;;  %s1736_s21 = sand.u32 1, %s1404_s10  }
  0x1b   : > { %v358_v6 = vpack.c.bf16 %v1547_v5, %v1547_v5  ;;  %s1157_s22 = sshll.u32 %s1736_s21, 5  ;;  %s1743_s21 = sand.u32 1, %s1404_s10  }
  0x1c   : > { %v368_v13 = vrot.slane %v363_v11, %v367_v10  ;;  %v372_v14 = vrot.slane %v363_v11, %v371_v12  ;;  %s1609_s23 = scalar_lea.vmem [#allocation2], %s1157_s22  ;;  %s1676_s0 = scalar_lea.sflag [#allocation3], %s1743_s21 }
  0x1d   : > { %414 = vmatpush1.bf16.msra.mxu0 %v1329_v4  ;;  %s1055_s22 = sshll.u32 %s1609_s23, 4  ;;  %s1672_s22 = int_to_ptr.vmem [resolvable:$true] %s1055_s22 }
  0x1e   : > { %1218 = vmatprep.subr.bf16.mxu0 %v1415_v7  ;;  %s1352_s1 = scalar_lea.vmem %s1672_s22, 512 }
  0x1f   : > { %p1353_p11 = scmp.ne.s32.totalorder %s1672_s22, %s1352_s1 }
  0x20   : > { %1165 = vmatmul.mubr.msk.bf16.vlgmr.msra.gmra.mxu0 %vm395_vm0, %v358_v6 }
  0x21   : > { %1220 = vmatprep.mubr.msk.bf16.mxu0 %vm1416_vm1, %v1415_v7  ;;  %p1354_p12 = pnand %p1353_p11, %p1515_p5 }
  0x23   : > { %p1355_p13 = pneg %p1354_p12 }
  0xe0   : > { %v433_v15 = vpop.f32.mrf.mxu0 }
  0xe1   : > { %v434_v16 = vadd.f32 %v433_v15, %v368_v13 }
  0xe2   : > { %v435_v17 = vpop.f32.mrf.mxu0 }
  0xe3   : > { %v440_v18 = vmul.f32 0.25, %v434_v16  ;;  %v442_v19 = vpack.c.bf16 %v434_v16, %v434_v16  ;;  %v436_v20 = vadd.f32 %v435_v17, %v372_v14 }
  0xe4   : > { %v437_v21 = vpop.f32.mrf.mxu0 }
  0xe5   : > { %v441_v22 = vpack.c.bf16 %v440_v18, %v440_v18  ;;  %v1561_v23 = vpack.c.bf16 %v436_v20, %v436_v20  ;;  %445 = vrot.lane.b32.xlu0 %v442_v19, %s1417_s24 }
  0xe6   : > { %v438_v24 = vpop.f32.mrf.mxu0 }
  0xe7   : > { %556 = vrot.lane.b32.xlu1 %v441_v22, %s1418_s25  ;;  %v513_v25 = vsel %vm511_vm2, %v1561_v23, 0 }
  0xe8   : > { %1219 = vmatpush3.bf16.msra.mxu0 %v513_v25 }
  0xe9   : > { %558 = vrot.lane.b32.xlu0 %v442_v19, %s1419_s26  ;;  %1230 = vmatprep.subr.bf16.mxu0 %v1415_v7 }
  0xeb   : > { %671 = vrot.lane.b32.xlu1 %v442_v19, %s1420_s28 }
  0xed   : > { %669 = vrot.lane.b32.xlu0 %v441_v22, %s1421_s29 }
  0xef   : > { %783 = vrot.lane.b32.xlu1 %v442_v19, %s1422_s16 }
  0xf1   : > { %781 = vrot.lane.b32.xlu0 %v441_v22, %s1423_s17 }
 0x157   : > { %v446_v26 = vpop.permute.xlu0 %445 }
 0x158   : > { %v452_v27 = vsel %vm447_vm3, %v446_v26, 0 }
 0x159   : > { %1213 = vmatpush3.bf16.xpose.msra.mxu1 %v452_v27  ;;  %v557_v29 = vpop.permute.xlu1 %556 }
 0x15a   : > { %1224 = vmatprep.subr.bf16.mxu1 %v1415_v7 }
 0x15b   : > { %v559_v28 = vpop.permute.xlu0 %558 }
 0x15c   : > { %v564_v30 = vsel %vm447_vm3, %v559_v28, 0 }
 0x15d   : > { %v672_v31 = vpop.permute.xlu1 %671 }
 0x15e   : > { %v677_v32 = vsel %vm447_vm3, %v672_v31, 0 }
 0x15f   : > { %v670_v34 = vpop.permute.xlu0 %669 }
 0x160   : > { %1215 = vmatmul.mubr.msk.bf16.vlgmr.msra.gmra.mxu1 %vm447_vm3, %v441_v22 }
 0x161   : > { %1225 = vmatpush3.bf16.xpose.msra.mxu1 %v564_v30  ;;  %1226 = vmatprep.mubr.msk.bf16.mxu1 %vm1416_vm1, %v1415_v7  ;;  %v784_v33 = vpop.permute.xlu1 %783 }
 0x162   : > { %1236 = vmatprep.subr.bf16.mxu1 %v1415_v7  ;;  %v789_v35 = vsel %vm447_vm3, %v784_v33, 0 }
 0x163   : > { %v782_v36 = vpop.permute.xlu0 %781 }
 0x168   : > { %1227 = vmatmul.mubr.msk.bf16.vlgmr.msra.gmra.mxu1 %vm447_vm3, %v557_v29 }
 0x169   : > { %1237 = vmatpush3.bf16.xpose.msra.mxu1 %v677_v32  ;;  %1238 = vmatprep.mubr.msk.bf16.mxu1 %vm1416_vm1, %v1415_v7 }
 0x16a   : > { %1248 = vmatprep.subr.bf16.mxu1 %v1415_v7 }
 0x170   : > { %1239 = vmatmul.mubr.msk.bf16.vlgmr.msra.gmra.mxu1 %vm447_vm3, %v670_v34 }
 0x171   : > { %1249 = vmatpush3.bf16.xpose.msra.mxu1 %v789_v35  ;;  %1250 = vmatprep.mubr.msk.bf16.mxu1 %vm1416_vm1, %v1415_v7 }
 0x172   : > { %1260 = vmatprep.subr.bf16.mxu1 %v1415_v7 }
 0x178   : > { %1251 = vmatmul.mubr.msk.bf16.vlgmr.msra.gmra.mxu1 %vm447_vm3, %v782_v36 }
 0x179   : > { %1268 = vmatprep.mubr.msk.bf16.mxu1 %vm1416_vm1, %v1415_v7 }
 0x220   : > { %v488_v37 = vpop.f32.mrf.mxu1 }
 0x221   : > { %v495_v38 = vsel %vm494_vm4, %v488_v37, -inf }
 0x222   : > { %496 = vmax.xlane.f32.xlu1 %v495_v38  ;;  %v1216_v39 = vpop.f32.mrf.mxu1 }
 0x224   : > { %v491_v40 = vpop.f32.mrf.mxu1 }
 0x225   : > { %v1330_v40 = vld [vmem:[%s1729_s3 + $0x18] sm:$0xff]  }
 0x226   : > { %v1217_v41 = vpop.f32.mrf.mxu1  ;;  %1261 = vmatpush3.bf16.msra.mxu1 %v1330_v40 }
 0x227   : > { %1262 = vmatprep.subr.bf16.mxu1 %v1415_v7 }
 0x228   : > { %v600_v42 = vpop.f32.mrf.mxu1 }
 0x229   : > { %v606_v43 = vsel %vm494_vm4, %v600_v42, -inf }
 0x22a   : > { %607 = vmax.xlane.f32.xlu0 %v606_v43  ;;  %v1228_v44 = vpop.f32.mrf.mxu1 }
 0x22c   : > { %v603_v45 = vpop.f32.mrf.mxu1 }
 0x22d   : > { %v1332_v45 = vld [vmem:[%s1729_s3 + $0x8] sm:$0xff]  }
 0x22e   : > { %v1229_v46 = vpop.f32.mrf.mxu1 }
 0x230   : > { %v713_v47 = vpop.f32.mrf.mxu1 }
 0x231   : > { %v719_v48 = vsel %vm494_vm4, %v713_v47, -inf }
 0x232   : > { %720 = vmax.xlane.f32.xlu0 %v719_v48  ;;  %v1240_v49 = vpop.f32.mrf.mxu1 }
 0x234   : > { %v716_v50 = vpop.f32.mrf.mxu1 }
 0x236   : > { %v1241_v51 = vpop.f32.mrf.mxu1 }
 0x238   : > { %v825_v52 = vpop.f32.mrf.mxu1 }
 0x239   : > { %v831_v53 = vsel %vm494_vm4, %v825_v52, -inf }
 0x23a   : > { %832 = vmax.xlane.f32.xlu1 %v831_v53  ;;  %v1252_v54 = vpop.f32.mrf.mxu1 }
 0x23c   : > { %v828_v55 = vpop.f32.mrf.mxu1 }
 0x23e   : > { %v1253_v56 = vpop.f32.mrf.mxu1 }
 0x2ab   : > { %v497_v57 = vpop.xlane.xlu1 %496 }
 0x2ac   : > { %v498_v58 = vsub.f32 %v488_v37, %v497_v57 }
 0x2ae   : > { %v499_v59 = vmul.f32 1.442695, %v498_v58 }
 0x2b0   : > { %1334 = vpow2.f32 %v499_v59 }
 0x2b3   : > { %v608_v60 = vpop.xlane.xlu0 %607 }
 0x2b4   : > { %v609_v61 = vsub.f32 %v600_v42, %v608_v60  ;;  %v1331_v42 = vld [vmem:[%s1729_s3 + $0x10] sm:$0xff]  }
 0x2b5   : > { %1263 = vmatpush3.bf16.msra.mxu1 %v1331_v42 }
 0x2b6   : > { %v610_v62 = vmul.f32 1.442695, %v609_v61  ;;  %1264 = vmatprep.subr.bf16.mxu1 %v1415_v7 }
 0x2b8   : > { %1336 = vpow2.f32 %v610_v62 }
 0x2b9   : > { %1265 = vmatpush3.bf16.msra.mxu1 %v1332_v45 }
 0x2ba   : > { %1266 = vmatprep.subr.bf16.mxu1 %v1415_v7 }
 0x2bb   : > { %v721_v63 = vpop.xlane.xlu0 %720 }
 0x2bc   : > { %v722_v0 = vsub.f32 %v713_v47, %v721_v63  ;;  %v1177_v63 = vld [vmem:[%s1730_s4] ss:$0 sm:$0xff] }
 0x2bd   : > { %v1335_v1 = vpop.eup %1334 }
 0x2be   : > { %v723_v2 = vmul.f32 1.442695, %v722_v0  ;;  %v501_v3 = vsel %vm494_vm4, %v1335_v1, 0.0 }
 0x2bf   : > { %502 = vadd.xlane.f32.xlu0 %v501_v3 }
 0x2c0   : > { %1338 = vpow2.f32 %v723_v2 }
 0x2c3   : > { %v833_v10 = vpop.xlane.xlu1 %832 }
 0x2c4   : > { %v834_v11 = vsub.f32 %v825_v52, %v833_v10  ;;  %v1333_v52 = vld [vmem:[%s1729_s3] sm:$0xff]  }
 0x2c5   : > { %v1337_v4 = vpop.eup %1336  ;;  %1267 = vmatpush3.bf16.msra.mxu1 %v1333_v52 }
 0x2c6   : > { %v612_v6 = vsel %vm494_vm4, %v1337_v4, 0.0  ;;  %v835_v12 = vmul.f32 1.442695, %v834_v11 }
 0x2c7   : > { %613 = vadd.xlane.f32.xlu1 %v612_v6 }
 0x2c8   : > { %1340 = vpow2.f32 %v835_v12 }
 0x2cd   : > { %v1339_v8 = vpop.eup %1338 }
 0x2ce   : > { %v725_v9 = vsel %vm494_vm4, %v1339_v8, 0.0 }
 0x2cf   : > { %726 = vadd.xlane.f32.xlu0 %v725_v9 }
 0x2d5   : > { %v1341_v13 = vpop.eup %1340 }
 0x2d6   : > { %v837_v14 = vsel %vm494_vm4, %v1341_v13, 0.0 }
 0x2d8   : > { %733 = vrot.lane.b32.xlu1 %v1561_v23, %s1421_s29  ;;  %s351_s29 = scalar_lea.vmem %s1733_s7, %s1158_s14 }
 0x2e5   : > { %621 = vrot.lane.b32.xlu0 %v1561_v23, %s1418_s25 }
 0x2fc   : > { %838 = vadd.xlane.f32.xlu1 %v837_v14 }
 0x30d   : > { %845 = vrot.lane.b32.xlu1 %v1561_v23, %s1423_s17  ;;  %s1190_s17 = sshll.u32 %s1498_s13, 9  ;;  %s1424_s13 = smov [#allocation2]  }
 0x30e   : > { %s1356_s14 = sshll.u32 %s1424_s13, 4  ;;  %s1357_s14 = int_to_ptr.vmem [resolvable:$false] %s1356_s14 }
 0x30f   : > { %p1359_p0 = scmp.lt.s32.totalorder %s1672_s22, %s1357_s14 }
 0x348   : > { %v503_v15 = vpop.xlane.xlu0 %502 }
 0x349   : > { %1342 = vrcp.f32 %v503_v15 }
 0x350   : > { %v614_v16 = vpop.xlane.xlu1 %613 }
 0x351   : > { %1344 = vrcp.f32 %v614_v16 }
 0x354   : > { %v734_v25 = vpop.permute.xlu1 %733 }
 0x355   : > { %v739_v27 = vsel %vm511_vm2, %v734_v25, 0 }
 0x356   : > { %v1343_v17 = vpop.eup %1342 }
 0x357   : > { %v505_v18 = vmul.f32 %v1343_v17, %v1335_v1 }
 0x358   : > { %v727_v19 = vpop.xlane.xlu0 %726 }
 0x359   : > { %1346 = vrcp.f32 %v727_v19  ;;  %506 = vst.msk [vmem:[%s1609_s23] sm:$0xff] %vm494_vm4, %v505_v18  ;;  %v507_v20 = vpack.c.bf16 %v505_v18, %v505_v18 }
 0x35b   : > { %1221 = vmatmul.mubr.msk.bf16.vlgmr.msra.gmra.mxu0 %vm494_vm4, %v507_v20 }
 0x35c   : > { %v622_v21 = vpop.permute.xlu0 %621  ;;  %1232 = vmatprep.mubr.msk.bf16.mxu0 %vm1416_vm1, %v1415_v7 }
 0x35d   : > { %v627_v22 = vsel %vm511_vm2, %v622_v21, 0 }
 0x35e   : > { %v1345_v23 = vpop.eup %1344  ;;  %1231 = vmatpush3.bf16.msra.mxu0 %v627_v22 }
 0x35f   : > { %1242 = vmatprep.subr.bf16.mxu0 %v1415_v7  ;;  %v616_v24 = vmul.f32 %v1345_v23, %v1337_v4 }
 0x361   : > { %1169 = vst.msk [vmem:[%s1609_s23 + $0x8] sm:$0xff] %vm494_vm4, %v616_v24  ;;  %v619_v26 = vpack.c.bf16 %v616_v24, %v616_v24 }
 0x363   : > { %1233 = vmatmul.mubr.msk.bf16.vlgmr.msra.gmra.mxu0 %vm494_vm4, %v619_v26 }
 0x364   : > { %1243 = vmatpush3.bf16.msra.mxu0 %v739_v27  ;;  %1244 = vmatprep.mubr.msk.bf16.mxu0 %vm1416_vm1, %v1415_v7 }
 0x365   : > { %1254 = vmatprep.subr.bf16.mxu0 %v1415_v7 }
 0x366   : > { %v1347_v28 = vpop.eup %1346 }
 0x367   : > { %v729_v29 = vmul.f32 %v1347_v28, %v1339_v8 }
 0x369   : > { %1172 = vst.msk [vmem:[%s1609_s23 + $0x10] sm:$0xff] %vm494_vm4, %v729_v29  ;;  %v732_v30 = vpack.c.bf16 %v729_v29, %v729_v29 }
 0x36b   : > { %1245 = vmatmul.mubr.msk.bf16.vlgmr.msra.gmra.mxu0 %vm494_vm4, %v732_v30 }
 0x36c   : > { %1256 = vmatprep.mubr.msk.bf16.mxu0 %vm1416_vm1, %v1415_v7 }
 0x385   : > { %v839_v31 = vpop.xlane.xlu1 %838 }
 0x386   : > { %1348 = vrcp.f32 %v839_v31 }
 0x389   : > { %v846_v32 = vpop.permute.xlu1 %845 }
 0x38a   : > { %v851_v33 = vsel %vm511_vm2, %v846_v32, 0 }
 0x38b   : > { %1255 = vmatpush3.bf16.msra.mxu0 %v851_v33 }
 0x393   : > { %v1349_v34 = vpop.eup %1348 }
 0x394   : > { %v841_v35 = vmul.f32 %v1349_v34, %v1341_v13 }
 0x396   : > { %1175 = vst.msk [vmem:[%s1609_s23 + $0x18] sm:$0xff] %vm494_vm4, %v841_v35  ;;  %v844_v36 = vpack.c.bf16 %v841_v35, %v841_v35  ;;  %s1358_s23 = scalar_lea.vmem %s1357_s14, 1024 }
 0x397   : > { %p1360_p1 = scmp.lt.s32.totalorder %s1358_s23, %s1352_s1 }
 0x398   : > { %1257 = vmatmul.mubr.msk.bf16.vlgmr.msra.gmra.mxu0 %vm494_vm4, %v844_v36 }
 0x399   : > { %p1361_p2 = por %p1360_p1, %p1359_p0 }
 0x39b   : > { %p1362_p3 = pnand %p1361_p2, %p1355_p13 }
 0x41b   : > { %v549_v37 = vpop.f32.mrf.mxu0 }
 0x41d   : > { %v1222_v38 = vpop.f32.mrf.mxu0 }
 0x41f   : > { %v552_v39 = vpop.f32.mrf.mxu0 }
 0x421   : > { %v1223_v41 = vpop.f32.mrf.mxu0 }
 0x423   : > { %v663_v43 = vpop.f32.mrf.mxu0 }
 0x424   : > { %894 = vrot.lane.b32.xlu0 %v663_v43, %s1422_s16 }
 0x425   : > { %v1234_v44 = vpop.f32.mrf.mxu0 }
 0x427   : > { %v666_v46 = vpop.f32.mrf.mxu0 }
 0x429   : > { %v1235_v47 = vpop.f32.mrf.mxu0 }
 0x42b   : > { %v775_v48 = vpop.f32.mrf.mxu0 }
 0x42c   : > { %898 = vrot.lane.b32.xlu1 %v775_v48, %s1420_s28  ;;  %s1670_s28 = scalar_lea.hbm %s1735_s9, %s1190_s17 }
 0x42d   : > { %v1246_v49 = vpop.f32.mrf.mxu0 }
 0x42f   : > { %v778_v50 = vpop.f32.mrf.mxu0 }
 0x431   : > { %v1247_v51 = vpop.f32.mrf.mxu0 }
 0x458   : > { %v887_v53 = vpop.f32.mrf.mxu0 }
 0x459   : > { %902 = vrot.lane.b32.xlu0 %v887_v53, %s1419_s26 }
 0x45a   : > { %v1258_v54 = vpop.f32.mrf.mxu0 }
 0x45c   : > { %v890_v55 = vpop.f32.mrf.mxu0 }
 0x45e   : > { %v1259_v56 = vpop.f32.mrf.mxu0 }
 0x496   : > { %v895_v57 = vpop.permute.xlu0 %894 }
 0x497   : > { %v905_v7 = vsel %vm447_vm3, %v549_v37, %v895_v57 }
 0x49e   : > { %v899_v58 = vpop.permute.xlu1 %898 }
 0x49f   : > { %v906_v59 = vsel %vm395_vm0, %v905_v7, %v899_v58 }
 0x4cb   : > { %v903_v60 = vpop.permute.xlu0 %902 }
 0x4cc   : > { %v908_v61 = vsel %vm907_vm5, %v906_v59, %v903_v60 }
 0x4cd   : > { %v909_v62 = vpack.c.bf16 %v908_v61, %v908_v61 }
 0x4cf   : > { %1269 = vmatmul.mubr.msk.bf16.vlgmr.msra.gmra.mxu1 %vm949_vm6, %v909_v62 }
 0x58f   : > { %v987_v0 = vpop.f32.mrf.mxu1 }
 0x590   : > { %v988_v1 = vadd.f32 %v1177_v63, %v987_v0 }
 0x591   : > { %v1270_v2 = vpop.f32.mrf.mxu1 }
 0x592   : > { %v993_v3 = vadd.f32 %v988_v1, %v1547_v5  ;;  %v1024_v5 = vld [vmem:[%s351_s29] sm:$0xff] }
 0x593   : > { %v990_v4 = vpop.f32.mrf.mxu1 }
 0x594   : > { %v994_v6 = vsel %vm395_vm0, %v993_v3, 0.0 }
 0x595   : > { %995 = vadd.xlane.f32.xlu1 %v994_v6  ;;  %v1271_v8 = vpop.f32.mrf.mxu1 }
 0x61e   : > { %v996_v9 = vpop.xlane.xlu1 %995 }
 0x61f   : > { %v998_v10 = vmul.f32 0.03125, %v996_v9 }
 0x621   : > { %v999_v11 = vsub.f32 %v993_v3, %v998_v10 }
 0x623   : > { %v1000_v12 = vmul.f32 %v999_v11, %v999_v11 }
 0x625   : > { %v1001_v13 = vsel %vm395_vm0, %v1000_v12, 0.0 }
 0x626   : > { %1002 = vadd.xlane.f32.xlu0 %v1001_v13 }
 0x63c   : > { %1027 = vperm.xlu0 %1323, %v1024_v5  }
 0x63d   : > { %1365 = shalt.err (!%p1362_p3)
}
 0x63e   : > { %s1366_s26 = scalar_lea.hbm %s1670_s28, 512  ;;  %s1370_s17 = scalar_lea.hbm %s1735_s9, 1024 }
 0x63f   : > { %p1367_p4 = scmp.ne.s32.totalorder %s1670_s28, %s1366_s26  ;;  %p1371_p9 = scmp.lt.s32.totalorder %s1670_s28, %s1735_s9 }
 0x640   : > { %p1372_p10 = scmp.lt.s32.totalorder %s1370_s17, %s1366_s26 }
 0x641   : > { %p1368_p7 = pnand %p1367_p4, %p1515_p5 }
 0x642   : > { %p1373_p11 = por %p1372_p10, %p1371_p9 }
 0x643   : > { %p1369_p8 = pneg %p1368_p7 }
 0x645   : > { %p1374_p12 = pnand %p1373_p11, %p1369_p8 }
 0x647   : > { %1377 = shalt.err (!%p1374_p12)
}
 0x648   : > { %s1425_s1 = smov 128   ;;  %s1426_s21 = smov 8   ;;  %v1183_v18 = vld [vmem:[%s1731_s5] ss:$0 sm:$0xff]  ;;  %vm1032_vm7 = vcmask 257024  }
 0x649   : > { %1272 = dma.vmem_to_hbm [thread:$0]  (%p1515_p5), %s1672_s22, 512, %s1670_s28, %s1676_s0, %s1425_s1, %s1425_s1, %s1426_s21  }
 0x64a   : > { %v1184_v20 = vld [vmem:[%s1732_s6] ss:$0 sm:$0xff]  ;;  %s1160_s25 = sshll.u32 %s1536_s27, 2 }
 0x64b   : > { %s355_s22 = scalar_lea.vmem %s1734_s8, %s1160_s25 }
 0x6af   : > { %v1003_v14 = vpop.xlane.xlu0 %1002 }
 0x6b0   : > { %v1004_v15 = vmul.f32 0.03125, %v1003_v14 }
 0x6b2   : > { %v1005_v16 = vadd.f32 1e-05, %v1004_v15 }
 0x6b4   : > { %1350 = vrsqrt.f32 %v1005_v16 }
 0x6b7   : > { %v1028_v22 = vpop.permute.xlu0 %1027 }
 0x6c1   : > { %v1351_v17 = vpop.eup %1350 }
 0x6c2   : > { %v1007_v19 = vmul.f32 %v1351_v17, %v999_v11 }
 0x6c4   : > { %v1015_v21 = vmul.f32 %v1183_v18, %v1007_v19 }
 0x6c6   : > { %v1023_v23 = vadd.f32 %v1184_v20, %v1015_v21 }
 0x6c8   : > { %v1030_v24 = vmul.f32 %v1028_v22, %v1023_v23 }
 0x6ca   : > { %v1031_v25 = vpack.c.bf16 %v1030_v24, %v1030_v24 }
 0x6cc   : > { %1033 = vst.msk [vmem:[%s355_s22] sm:$0xf] %vm1032_vm7, %v1031_v25 }
 0x6cd PF: > { %p1278_p5 = scmp.ge.s32.totalorder %s1412_s12, 2  ;;  %s1077_s28 = sand.u32 1, %s1400_s30  }
 0x6ce   : > { %s1078_s29 = scalar_lea.sflag [#allocation3], %s1077_s28 }
 0x6cf   : > { %p1275_p13 = pnand %p1278_p5, %p1519_p6 }
 0x6d1   : > { %p1276_p0 = pneg %p1275_p13 }
 0x6d3   : > { %1395 = dma.done.wait (%p1276_p0), %s1078_s29, 512  }
 0x6d4   : > { %1397 = vsyncadd (%p1276_p0), %s1078_s29, 4294966784  ;;  %p20_p1 = scmp.ge.s32.totalorder %s1502_s15, 4   ;;  %s1744_s30 = smov %s1404_s10 }
 0x6d5   : > { %s1745_s10 = smov %s1408_s11  ;;  %s1746_s11 = smov %s1513_s18 }
 0x6d6   : > { %s1747_s12 = smov %s1502_s15  ;;  %22 = sbr.rel (!%p20_p1) target bundleno = 6 (0x6), region = 105 }
 0x6db   :  { %1083 = vsyncpa [#allocation3], 1 }
 0x6dc   :  { %1085 = vsyncpa [#allocation3 + $0x1], 1 }

// kernel: _lambda_.7
= control target key start
LH: loop header
LB: loop body
LE: loop exit
PB: predicated region body
PF: predicated region fallthrough
CT: control target
= control target key end

     0   :  { %s1115_s0 = inlined_call_operand.vmem [shape: bf16[2,8,48], index: 0, kind: input, shape index: {}]   ;;  %s1116_s1 = inlined_call_operand.vmem [shape: bf16[48,32], index: 1, kind: input, shape index: {}]   ;;  %s1117_s2 = inlined_call_operand.vmem [shape: f32[1,32], index: 2, kind: input, shape index: {}]   ;;  %s1118_s3 = inlined_call_operand.vmem [shape: bf16[32,64], index: 3, kind: input, shape index: {}]   ;;  %s1119_s4 = inlined_call_operand.vmem [shape: f32[1,64], index: 4, kind: input, shape index: {}]   ;;  %s1120_s5 = inlined_call_operand.vmem [shape: bf16[64,32], index: 5, kind: input, shape index: {}]   ;;  %s1121_s6 = inlined_call_operand.vmem [shape: f32[1,32], index: 6, kind: input, shape index: {}]   ;;  %s1122_s7 = inlined_call_operand.vmem [shape: f32[1,32], index: 7, kind: input, shape index: {}]   ;;  %s1123_s8 = inlined_call_operand.vmem [shape: f32[1,32], index: 8, kind: input, shape index: {}]   ;;  %s1124_s9 = inlined_call_operand.vmem [shape: f32[2,8,1], index: 9, kind: input, shape index: {}]   ;;  %s1125_s10 = inlined_call_operand.hbm [shape: f32[2,8,32], index: 10, kind: output, shape index: {}]  }
   0x1   :  { %1126 = sst [smem:[#allocation5_spill]] %s1115_s0 }
   0x2   :  { %15 = vsyncpa [#allocation3], 0 }
   0x3   :  { %17 = vsyncpa [#allocation3 + $0x1], 0  ;;  %s972_s13 = smov 0   ;;  %s974_s14 = smov 0  }
   0x4   :  { %s976_s15 = smov 0   ;;  %s978_s16 = smov 0  }
   0x5 LB: > { %s993_s17 = sadd.s32 4294967295, %s911_s16   ;;  %s726_s18 = sadd.s32 4294967294, %s911_s16   ;;  %s911_s16 = sphi %s978_s16, %s1133_s16   ;;  %s907_s15 = sphi %s976_s15, %s1132_s15   ;;  %s903_s14 = sphi %s974_s14, %s1131_s14   ;;  %s899_s13 = sphi %s972_s13, %s1130_s13  }
   0x6   : > { %s997_s19 = sadd.s32 1, %s911_s16   ;;  %s250_s20 = sadd.s32 1, %s907_s15 }
   0x7   : > { %s247_s21 = ssub.s32 %s911_s16, %s997_s19  ;;  %p260_p0 = scmp.ne.s32.totalorder %s907_s15, %s903_s14 }
   0x8   : > { %p248_p1 = scmp.eq.s32.totalorder %s247_s21, 0  ;;  %p261_p2 = scmp.eq.s32.totalorder %s993_s17, 1 }
   0x9   : > { %p266_p3 = scmp.ne.s32.totalorder %s903_s14, %s899_s13  ;;  %p267_p4 = scmp.eq.s32.totalorder %s726_s18, 1 }
   0xa   : > { %s1008_s22 = scalar_select %p248_p1, %s907_s15, %s250_s20  }
   0xb   : > { %p1010_p5 = por %p261_p2, %p260_p0  ;;  %p1014_p6 = por %p267_p4, %p266_p3 }
   0xc   : > { %p729_p7 = scmp.ge.s32.totalorder %s911_s16, 1  ;;  %p323_p8 = scmp.lt.s32.totalorder %s911_s16, 3 }
   0xe   : > { %p324_p9 = pnand %p729_p7, %p323_p8 }
   0xf   : > { %p364_p10 = scmp.lt.s32.totalorder (!%p324_p9), %s993_s17, 1  ;;  %s1129_s0 = sld [smem:[#allocation5_spill]] (!%p324_p9) }
  0x10   : > { %327 = sbr.rel (%p324_p9) target bundleno = 950 (0x3b6), region = 60  ;;  %s751_s18 = sshll.u32 (!%p324_p9), %s993_s17, 7 }
  0x11   : > { %s916_s11 = smov (!%p324_p9), [#allocation2]  }
  0x15   : > { %v840_v0 = vld [vmem:[%s1116_s1 + $0x10] sm:$0xff]   ;;  %v913_v1 = vmov 0.0   ;;  %v841_v2 = vld [vmem:[%s1116_s1 + $0x8] sm:$0xff]   ;;  %vm914_vm0 = vmmov 0   ;;  %s1030_s29 = scalar_select %p364_p10, %s993_s17, 1  ;;  %v842_v3 = vld [vmem:[%s1116_s1] sm:$0xff]  }
  0x16   : > { %766 = vmatprep.subr.bf16.mxu0 %v913_v1  ;;  %784 = vmatprep.subr.bf16.mxu1 %v913_v1  ;;  %vm405_vm1 = vcmask 392192   ;;  %v843_v5 = vld [vmem:[%s1118_s3 + $0x8] sm:$0xff]   ;;  %v844_v6 = vld [vmem:[%s1118_s3] sm:$0xff]   ;;  %v845_v7 = vld [vmem:[%s1120_s5 + $0x18] sm:$0xff]   ;;  %vm473_vm2 = vcmask 261120   ;;  %vm558_vm3 = vcmask 523264  }
  0x17   : > { %767 = vmatpush3.bf16.msra.mxu0 %v840_v0  ;;  %772 = vmatprep.mubr.msk.bf16.mxu0 %vm914_vm0, %v913_v1  ;;  %s731_s12 = sshll.u32 %s1030_s29, 2  ;;  %v846_v8 = vld [vmem:[%s1120_s5 + $0x10] sm:$0xff]   ;;  %v733_v9 = vld [vmem:[%s1117_s2] ss:$0 sm:$0xff]  ;;  %v847_v16 = vld [vmem:[%s1120_s5 + $0x8] sm:$0xff]   ;;  %s732_s20 = sshll.u32 %s1030_s29, 3 }
  0x18   : > { %768 = vmatprep.subr.bf16.mxu0 %v913_v1  ;;  %792 = vmatprep.mubr.msk.bf16.mxu1 %vm914_vm0, %v913_v1  ;;  %s367_s21 = scalar_lea.vmem %s1129_s0, %s731_s12  ;;  %v848_v17 = vld [vmem:[%s1120_s5] sm:$0xff]   ;;  %v915_v34 = vmov 0   ;;  %s371_s26 = scalar_lea.vmem %s1124_s9, %s732_s20 }
  0x19   : > { %v373_v4 = vld [vmem:[%s367_s21] sm:$0xf]  ;;  %785 = vmatpush3.bf16.msra.mxu1 %v845_v7  ;;  %838 = vset.pattern.permute.xlu1 %v915_v34  ;;  %s361_s29 = sand.u32 1, %s903_s14   ;;  %s653_s0 = scalar_lea.hbm %s1125_s10, %s751_s18 }
  0x1a   : > { %786 = vmatprep.subr.bf16.mxu1 %v913_v1  ;;  %v738_v18 = vld [vmem:[%s1119_s4] ss:$0 sm:$0xff]  ;;  %839 = vset.pattern.permute.xlu0 %v915_v34  ;;  %s730_s27 = sshll.u32 %s361_s29, 3  ;;  %s642_s28 = scalar_lea.sflag [#allocation3], %s361_s29 }
  0x1b   : > { %769 = vmatpush3.bf16.msra.mxu0 %v841_v2  ;;  %v742_v26 = vld [vmem:[%s1121_s6] ss:$0 sm:$0xff]  ;;  %s363_s20 = scalar_lea.vmem [#allocation2], %s730_s27  ;;  %s855_s12 = sshll.u32 %s916_s11, 4  ;;  %s856_s12 = int_to_ptr.vmem [resolvable:$false] %s855_s12 }
  0x1c   : > { %770 = vmatprep.subr.bf16.mxu0 %v913_v1  ;;  %v633_v35 = vld [vmem:[%s371_s26] sm:$0xff]  ;;  %s655_s21 = sshll.u32 %s363_s20, 4  ;;  %s857_s17 = scalar_lea.vmem %s856_s12, 256  ;;  %s656_s21 = int_to_ptr.vmem [resolvable:$true] %s655_s21 }
  0x1d   : > { %787 = vmatpush3.bf16.msra.mxu1 %v846_v8  ;;  %636 = vperm.xlu1 %838, %v633_v35   ;;  %v748_v45 = vld [vmem:[%s1122_s7] ss:$0 sm:$0xff]  ;;  %s851_s30 = scalar_lea.vmem %s656_s21, 128  ;;  %p858_p0 = scmp.lt.s32.totalorder %s656_s21, %s856_s12 }
  0x1e   : > { %788 = vmatprep.subr.bf16.mxu1 %v913_v1  ;;  %v749_v47 = vld [vmem:[%s1123_s8] ss:$0 sm:$0xff]  ;;  %p852_p11 = scmp.ne.s32.totalorder %s656_s21, %s851_s30  ;;  %p859_p1 = scmp.lt.s32.totalorder %s857_s17, %s851_s30 }
  0x1f   : > { %771 = vmatpush3.bf16.msra.mxu0 %v842_v3 }
  0x20   : > { %776 = vmatprep.subr.bf16.mxu0 %v913_v1  ;;  %p853_p12 = pnand %p852_p11, %p1010_p5  ;;  %p860_p2 = por %p859_p1, %p858_p0 }
  0x21   : > { %789 = vmatpush3.bf16.msra.mxu1 %v847_v16 }
  0x22   : > { %773 = vmatmul.mubr.msk.bf16.vlgmr.msra.gmra.mxu0 %vm405_vm1, %v373_v4  ;;  %790 = vmatprep.subr.bf16.mxu1 %v913_v1  ;;  %p854_p13 = pneg %p853_p12 }
  0x23   : > { %777 = vmatpush3.bf16.msra.mxu0 %v843_v5  ;;  %780 = vmatprep.mubr.msk.bf16.mxu0 %vm914_vm0, %v913_v1 }
  0x24   : > { %778 = vmatprep.subr.bf16.mxu0 %v913_v1  ;;  %p861_p3 = pnand %p860_p2, %p854_p13 }
  0x25   : > { %791 = vmatpush3.bf16.msra.mxu1 %v848_v17 }
  0x27   : > { %779 = vmatpush3.bf16.msra.mxu0 %v844_v6 }
  0x98   : > { %v637_v49 = vpop.permute.xlu1 %636 }
  0xe2   : > { %v443_v10 = vpop.f32.mrf.mxu0 }
  0xe3   : > { %v444_v11 = vadd.f32 %v733_v9, %v443_v10 }
  0xe4   : > { %v774_v12 = vpop.f32.mrf.mxu0 }
  0xe5   : > { %v449_v13 = vpack.c.bf16 %v444_v11, %v444_v11 }
  0xe6   : > { %v446_v14 = vpop.f32.mrf.mxu0 }
  0xe7   : > { %781 = vmatmul.mubr.msk.bf16.vlgmr.msra.gmra.mxu0 %vm473_vm2, %v449_v13 }
  0xe8   : > { %v775_v15 = vpop.f32.mrf.mxu0 }
 0x1a7   : > { %v511_v19 = vpop.f32.mrf.mxu0 }
 0x1a8   : > { %v512_v20 = vadd.f32 %v738_v18, %v511_v19 }
 0x1a9   : > { %v782_v21 = vpop.f32.mrf.mxu0 }
 0x1aa   : > { %v517_v22 = vmax.f32 %v512_v20, 0.0 }
 0x1ab   : > { %v514_v23 = vpop.f32.mrf.mxu0 }
 0x1ac   : > { %v518_v24 = vpack.c.bf16 %v517_v22, %v517_v22 }
 0x1ad   : > { %v783_v25 = vpop.f32.mrf.mxu0 }
 0x1ae   : > { %793 = vmatmul.mubr.msk.bf16.vlgmr.msra.gmra.mxu1 %vm558_vm3, %v518_v24 }
 0x26e   : > { %v596_v27 = vpop.f32.mrf.mxu1 }
 0x26f   : > { %v597_v28 = vadd.f32 %v742_v26, %v596_v27 }
 0x270   : > { %v794_v29 = vpop.f32.mrf.mxu1 }
 0x271   : > { %v602_v30 = vadd.f32 %v597_v28, %v444_v11 }
 0x272   : > { %v599_v31 = vpop.f32.mrf.mxu1 }
 0x273   : > { %v603_v32 = vsel %vm473_vm2, %v602_v30, 0.0 }
 0x274   : > { %604 = vadd.xlane.f32.xlu0 %v603_v32  ;;  %v795_v33 = vpop.f32.mrf.mxu1 }
 0x2fd   : > { %v605_v36 = vpop.xlane.xlu0 %604 }
 0x2fe   : > { %v607_v37 = vmul.f32 0.03125, %v605_v36 }
 0x300   : > { %v608_v38 = vsub.f32 %v602_v30, %v607_v37 }
 0x302   : > { %v609_v39 = vmul.f32 %v608_v38, %v608_v38 }
 0x304   : > { %v610_v40 = vsel %vm473_vm2, %v609_v39, 0.0 }
 0x305   : > { %611 = vadd.xlane.f32.xlu0 %v610_v40 }
 0x38e   : > { %v612_v41 = vpop.xlane.xlu0 %611 }
 0x38f   : > { %v613_v42 = vmul.f32 0.03125, %v612_v41 }
 0x391   : > { %v614_v43 = vadd.f32 1e-05, %v613_v42 }
 0x393   : > { %849 = vrsqrt.f32 %v614_v43 }
 0x3a0   : > { %v850_v44 = vpop.eup %849 }
 0x3a1   : > { %v616_v46 = vmul.f32 %v850_v44, %v608_v38 }
 0x3a3   : > { %v624_v48 = vmul.f32 %v748_v45, %v616_v46 }
 0x3a5   : > { %v632_v50 = vadd.f32 %v749_v47, %v624_v48 }
 0x3a7   : > { %v639_v51 = vmul.f32 %v637_v49, %v632_v50 }
 0x3a9   : > { %640 = vst.msk [vmem:[%s363_s20] sm:$0xff] %vm473_vm2, %v639_v51 }
 0x3aa   : > { %864 = shalt.err (!%p861_p3)
}
 0x3ab   : > { %s865_s27 = scalar_lea.hbm %s653_s0, 128  ;;  %s869_s20 = scalar_lea.hbm %s1125_s10, 256 }
 0x3ac   : > { %p866_p4 = scmp.ne.s32.totalorder %s653_s0, %s865_s27  ;;  %p870_p9 = scmp.lt.s32.totalorder %s653_s0, %s1125_s10 }
 0x3ad   : > { %p871_p10 = scmp.lt.s32.totalorder %s869_s20, %s865_s27 }
 0x3ae   : > { %p867_p7 = pnand %p866_p4, %p1010_p5 }
 0x3af   : > { %p872_p11 = por %p871_p10, %p870_p9 }
 0x3b0   : > { %p868_p8 = pneg %p867_p7 }
 0x3b2   : > { %p873_p12 = pnand %p872_p11, %p868_p8 }
 0x3b4   : > { %876 = shalt.err (!%p873_p12)
}
 0x3b5   : > { %796 = dma.vmem_to_hbm [thread:$0]  (%p1010_p5), %s656_s21, 128, %s653_s0, %s642_s28  }
 0x3b6 PF: > { %p802_p13 = scmp.ge.s32.totalorder %s911_s16, 2  ;;  %s667_s30 = sand.u32 1, %s899_s13  }
 0x3b7   : > { %s668_s11 = scalar_lea.sflag [#allocation3], %s667_s30 }
 0x3b8   : > { %p799_p0 = pnand %p802_p13, %p1014_p6 }
 0x3ba   : > { %p800_p1 = pneg %p799_p0 }
 0x3bc   : > { %894 = dma.done.wait (%p800_p1), %s668_s11, 128  }
 0x3bd   : > { %896 = vsyncadd (%p800_p1), %s668_s11, 4294967168  ;;  %p20_p2 = scmp.ge.s32.totalorder %s997_s19, 4   ;;  %s1130_s13 = smov %s903_s14 }
 0x3be   : > { %s1131_s14 = smov %s907_s15  ;;  %s1132_s15 = smov %s1008_s22 }
 0x3bf   : > { %s1133_s16 = smov %s997_s19  ;;  %22 = sbr.rel (!%p20_p2) target bundleno = 5 (0x5), region = 98 }
 0x3c4   :  { %673 = vsyncpa [#allocation3], 1 }
 0x3c5   :  { %675 = vsyncpa [#allocation3 + $0x1], 1 }

// kernel: _lambda_.5
= control target key start
LH: loop header
LB: loop body
LE: loop exit
PB: predicated region body
PF: predicated region fallthrough
CT: control target
= control target key end

     0   :  { %s1720_s29 = smov 0   ;;  %s1907_s0 = inlined_call_operand.vmem [shape: bf16[2,8,32], index: 0, kind: input, shape index: {}]   ;;  %s1908_s1 = inlined_call_operand.vmem [shape: f32[2,5,24], index: 1, kind: input, shape index: {}]   ;;  %s1909_s2 = inlined_call_operand.vmem [shape: bf16[32,24], index: 2, kind: input, shape index: {}]   ;;  %s1910_s3 = inlined_call_operand.vmem [shape: f32[1,24], index: 3, kind: input, shape index: {}]   ;;  %s1911_s4 = inlined_call_operand.vmem [shape: bf16[24,64], index: 4, kind: input, shape index: {}]   ;;  %s1912_s5 = inlined_call_operand.vmem [shape: f32[1,64], index: 5, kind: input, shape index: {}]   ;;  %s1913_s6 = inlined_call_operand.vmem [shape: bf16[24,128], index: 6, kind: input, shape index: {}]   ;;  %s1914_s7 = inlined_call_operand.vmem [shape: f32[1,128], index: 7, kind: input, shape index: {}]   ;;  %s1915_s8 = inlined_call_operand.vmem [shape: bf16[64,24], index: 8, kind: input, shape index: {}]   ;;  %s1916_s9 = inlined_call_operand.vmem [shape: f32[1,24], index: 9, kind: input, shape index: {}]   ;;  %s1917_s10 = inlined_call_operand.vmem [shape: f32[1,24], index: 10, kind: input, shape index: {}]   ;;  %s1918_s11 = inlined_call_operand.vmem [shape: f32[1,24], index: 11, kind: input, shape index: {}]   ;;  %s1919_s12 = inlined_call_operand.vmem [shape: f32[2,8,1], index: 12, kind: input, shape index: {}]   ;;  %s1920_s13 = inlined_call_operand.vmem [shape: bf16[2,8,24], index: 13, kind: output, shape index: {0}]   ;;  %s1921_s14 = inlined_call_operand.vmem [shape: f32[2,4,8,5], index: 14, kind: output, shape index: {1}]  }
   0x1 LB: > { %s1419_s30 = sadd.s32 4294967295, %s1632_s29   ;;  %p1423_p0 = scmp.ge.s32.totalorder %s1632_s29, 1  ;;  %s1632_s29 = sphi %s1720_s29, %s25_s29  }
   0x2   : > { %p432_p1 = scmp.lt.s32.totalorder %s1632_s29, 3 }
   0x4   : > { %p433_p2 = pnand %p1423_p0, %p432_p1 }
   0x5   : > { %p489_p3 = scmp.lt.s32.totalorder (!%p433_p2), %s1419_s30, 1  ;;  %s1637_s28 = smov (!%p433_p2), 96  }
   0x6   : > { %436 = sbr.rel (%p433_p2) target bundleno = 1882 (0x75a), region = 72  ;;  %s1638_s17 = smov (!%p433_p2), 80  }
   0x7   : > { %s1639_s18 = smov (!%p433_p2), 64   ;;  %s1641_s19 = smov (!%p433_p2), 32  }
   0x8   : > { %s1642_s20 = smov (!%p433_p2), 16  }
   0xb   : > { %v1598_v0 = vld [vmem:[%s1909_s2 + $0x8] sm:$0xff]   ;;  %v1634_v1 = vmov 0.0   ;;  %v1599_v2 = vld [vmem:[%s1909_s2] sm:$0xff]   ;;  %vm1635_vm0 = vmmov 0   ;;  %vm603_vm1 = vcmask 1043456   ;;  %s1923_s30 = smov (!%p489_p3, %s1419_s30), 1 }
   0xc   : > { %1494 = vmatprep.subr.bf16.mxu0 %v1634_v1  ;;  %1502 = vmatprep.subr.bf16.mxu1 %v1634_v1  ;;  %v1600_v3 = vld [vmem:[%s1913_s6 + $0x8] ss:$0 sps:$4 sm:$0xff]   ;;  %s1424_s23 = sshll.u32 %s1923_s30, 2  ;;  %vm535_vm2 = vcmask 261120   ;;  %s1425_s27 = sshll.u32 %s1923_s30, 3  ;;  %v1601_v8 = vld [vmem:[%s1913_s6] sm:$0xff]  }
   0xd   : > { %1495 = vmatpush3.bf16.msra.mxu0 %v1598_v0  ;;  %1498 = vmatprep.mubr.msk.bf16.mxu0 %vm1635_vm0, %v1634_v1  ;;  %v1602_v4 = vld [vmem:[%s1911_s4 + $0x8] ss:$0 sps:$4 sm:$0xff]   ;;  %v672_v5 = vsel %vm603_vm1, %v1600_v3, 0  ;;  %s492_s26 = scalar_lea.vmem %s1907_s0, %s1424_s23  ;;  %s496_s16 = scalar_lea.vmem %s1908_s1, %s1425_s27  ;;  %vm599_vm3 = vcmask 195584   ;;  %v1603_v11 = vld [vmem:[%s1911_s4] sm:$0xff]   ;;  %vm717_vm4 = vcmask 130048  }
   0xe   : > { %1496 = vmatprep.subr.bf16.mxu0 %v1634_v1  ;;  %1506 = vmatprep.mubr.msk.bf16.mxu1 %vm1635_vm0, %v1634_v1  ;;  %v605_v6 = vsel %vm603_vm1, %v1602_v4, 0  ;;  %v511_v7 = vld [vmem:[%s492_s26] sm:$0xf]  ;;  %s1636_s26 = smov 112   ;;  %vm764_vm5 = vcmask 39936   ;;  %vm784_vm6 = vcmask 1041408   ;;  %s504_s22 = scalar_lea.vmem %s1920_s13, %s1424_s23 }
   0xf   : > { %1503 = vmatpush3.bf16.msra.mxu1 %v605_v6  ;;  %v647_v9 = vld [vmem:[%s496_s16] sm:$0x1f]  ;;  %vm785_vm7 = vcmask 1042432   ;;  %s1463_s21 = sshll.u32 %s1923_s30, 5  ;;  %vm1182_vm8 = vcmask 392192   ;;  %vm1224_vm9 = vcmask 523264  }
  0x10   : > { %1504 = vmatprep.subr.bf16.mxu1 %v1634_v1  ;;  %v648_v10 = vpack.c.bf16 %v647_v9, %v647_v9  ;;  %v1430_v12 = vld [vmem:[%s1910_s3] ss:$0 sm:$0xff]  ;;  %s1838_s25 = scalar_lea.vmem %s1921_s14, %s1463_s21  ;;  %vm1307_vm10 = vcmask 191488  }
  0x11   : > { %1497 = vmatpush3.bf16.msra.mxu0 %v1599_v2  ;;  %v1438_v19 = vld [vmem:[%s1914_s7] ss:$0 sm:$0xff] }
  0x12   : > { %1510 = vmatprep.subr.bf16.mxu0 %v1634_v1  ;;  %v1434_v27 = vld [vmem:[%s1912_s5] ss:$0 sm:$0xff] }
  0x13   : > { %1505 = vmatpush3.bf16.msra.mxu1 %v1603_v11 }
  0x14   : > { %1499 = vmatmul.mubr.msk.bf16.vlgmr.msra.gmra.mxu0 %vm535_vm2, %v511_v7  ;;  %1518 = vmatprep.subr.bf16.mxu1 %v1634_v1 }
  0x15   : > { %1511 = vmatpush3.bf16.msra.mxu0 %v672_v5  ;;  %1514 = vmatprep.mubr.msk.bf16.mxu0 %vm1635_vm0, %v1634_v1 }
  0x16   : > { %1512 = vmatprep.subr.bf16.mxu0 %v1634_v1 }
  0x19   : > { %1513 = vmatpush3.bf16.msra.mxu0 %v1601_v8 }
  0x1a   : > { %1524 = vmatprep.subr.bf16.mxu0 %v1634_v1 }
  0x1c   : > { %1515 = vmatmul.mubr.msk.bf16.vlgmr.msra.gmra.mxu0 %vm599_vm3, %v648_v10 }
  0x1d   : > { %1526 = vmatprep.mubr.msk.bf16.mxu0 %vm1635_vm0, %v1634_v1 }
  0xd4   : > { %v573_v13 = vpop.f32.mrf.mxu0 }
  0xd5   : > { %v1781_v14 = vadd.f32 %v1430_v12, %v573_v13 }
  0xd6   : > { %v1500_v15 = vpop.f32.mrf.mxu0 }
  0xd7   : > { %v579_v16 = vpack.c.bf16 %v1781_v14, %v1781_v14 }
  0xd8   : > { %v576_v17 = vpop.f32.mrf.mxu0 }
  0xd9   : > { %1507 = vmatmul.mubr.msk.bf16.vlgmr.msra.gmra.mxu1 %vm599_vm3, %v579_v16 }
  0xda   : > { %v1501_v18 = vpop.f32.mrf.mxu0  ;;  %1520 = vmatprep.mubr.msk.bf16.mxu1 %vm1635_vm0, %v1634_v1 }
  0xdc   : > { %v708_v20 = vpop.f32.mrf.mxu0 }
  0xdd   : > { %v709_v21 = vadd.f32 %v1438_v19, %v708_v20 }
  0xde   : > { %v1516_v22 = vpop.f32.mrf.mxu0 }
  0xdf   : > { %v1791_v23 = vpack.c.bf16 %v709_v21, %v709_v21  ;;  %v1640_v22 = vmov 65535  }
  0xe0   : > { %v711_v24 = vpop.f32.mrf.mxu0 }
  0xe1   : > { %834 = vrot.lane.b32.xlu0 %v1791_v23, %s1636_s26  ;;  %946 = vrot.lane.b32.xlu1 %v1791_v23, %s1637_s28  ;;  %v722_v26 = vsel %vm717_vm4, %v1791_v23, 0  ;;  %v786_v24 = vsel %vm784_vm6, 4294967295, %v1640_v22 }
  0xe2   : > { %v1517_v25 = vpop.f32.mrf.mxu0  ;;  %1519 = vmatpush3.bf16.xpose.msra.mxu1 %v722_v26  ;;  %v787_v26 = vsel %vm785_vm7, %v786_v24, 0 }
  0xe3   : > { %1530 = vmatprep.subr.bf16.mxu1 %v1634_v1 }
 0x153   : > { %v835_v32 = vpop.permute.xlu0 %834  ;;  %v947_v37 = vpop.permute.xlu1 %946 }
 0x154   : > { %v840_v36 = vsel %vm717_vm4, %v835_v32, 0  ;;  %v952_v39 = vsel %vm717_vm4, %v947_v37, 0 }
 0x199   : > { %v641_v28 = vpop.f32.mrf.mxu1 }
 0x19a   : > { %v642_v29 = vadd.f32 %v1434_v27, %v641_v28 }
 0x19b   : > { %v1508_v30 = vpop.f32.mrf.mxu1 }
 0x19c   : > { %v714_v31 = vmul.f32 0.25, %v642_v29 }
 0x19d   : > { %v644_v33 = vpop.f32.mrf.mxu1 }
 0x19e   : > { %v715_v34 = vpack.c.bf16 %v714_v31, %v714_v31 }
 0x19f   : > { %v1509_v35 = vpop.f32.mrf.mxu1 }
 0x1a0   : > { %944 = vrot.lane.b32.xlu1 %v715_v34, %s1637_s28  ;;  %832 = vrot.lane.b32.xlu0 %v715_v34, %s1636_s26  ;;  %s1643_s26 = smov 48   ;;  %s500_s28 = scalar_lea.vmem %s1919_s12, %s1425_s27 }
 0x1a1   : > { %1521 = vmatmul.mubr.msk.bf16.vlgmr.msra.gmra.mxu1 %vm717_vm4, %v715_v34 }
 0x1a2   : > { %1531 = vmatpush3.bf16.xpose.msra.mxu1 %v840_v36  ;;  %1532 = vmatprep.mubr.msk.bf16.mxu1 %vm1635_vm0, %v1634_v1 }
 0x1a3   : > { %1542 = vmatprep.subr.bf16.mxu1 %v1634_v1 }
 0x1a4   : > { %1056 = vrot.lane.b32.xlu1 %v715_v34, %s1638_s17  ;;  %1058 = vrot.lane.b32.xlu0 %v1791_v23, %s1638_s17 }
 0x212   : > { %v833_v38 = vpop.permute.xlu0 %832  ;;  %v945_v41 = vpop.permute.xlu1 %944 }
 0x213   : > { %1533 = vmatmul.mubr.msk.bf16.vlgmr.msra.gmra.mxu1 %vm717_vm4, %v833_v38 }
 0x214   : > { %1543 = vmatpush3.bf16.xpose.msra.mxu1 %v952_v39  ;;  %1544 = vmatprep.mubr.msk.bf16.mxu1 %vm1635_vm0, %v1634_v1 }
 0x215   : > { %1554 = vmatprep.subr.bf16.mxu1 %v1634_v1 }
 0x216   : > { %v1059_v40 = vpop.permute.xlu0 %1058  ;;  %v1057_v43 = vpop.permute.xlu1 %1056 }
 0x217   : > { %v1064_v42 = vsel %vm717_vm4, %v1059_v40, 0 }
 0x21b   : > { %1545 = vmatmul.mubr.msk.bf16.vlgmr.msra.gmra.mxu1 %vm717_vm4, %v945_v41 }
 0x21c   : > { %1555 = vmatpush3.bf16.xpose.msra.mxu1 %v1064_v42  ;;  %1556 = vmatprep.mubr.msk.bf16.mxu1 %vm1635_vm0, %v1634_v1 }
 0x21d   : > { %1566 = vmatprep.subr.bf16.mxu1 %v1634_v1 }
 0x223   : > { %1557 = vmatmul.mubr.msk.bf16.vlgmr.msra.gmra.mxu1 %vm717_vm4, %v1057_v43 }
 0x224   : > { %1574 = vmatprep.mubr.msk.bf16.mxu1 %vm1635_vm0, %v1634_v1 }
 0x261   : > { %v758_v44 = vpop.f32.mrf.mxu1 }
 0x262   : > { %v765_v45 = vsel %vm764_vm5, %v758_v44, -inf }
 0x263   : > { %766 = vmax.xlane.f32.xlu0 %v765_v45  ;;  %v1522_v46 = vpop.f32.mrf.mxu1 }
 0x265   : > { %v761_v47 = vpop.f32.mrf.mxu1 }
 0x267   : > { %v1523_v48 = vpop.f32.mrf.mxu1 }
 0x2d3   : > { %v876_v49 = vpop.f32.mrf.mxu1 }
 0x2d4   : > { %v882_v50 = vsel %vm764_vm5, %v876_v49, -inf }
 0x2d5   : > { %883 = vmax.xlane.f32.xlu1 %v882_v50  ;;  %v1534_v51 = vpop.f32.mrf.mxu1 }
 0x2d7   : > { %v879_v52 = vpop.f32.mrf.mxu1 }
 0x2d9   : > { %v1535_v53 = vpop.f32.mrf.mxu1 }
 0x2da   : > { %v1604_v53 = vld [vmem:[%s1915_s8 + $0x18] sm:$0xff]  }
 0x2db   : > { %v988_v54 = vpop.f32.mrf.mxu1  ;;  %1567 = vmatpush3.bf16.msra.mxu1 %v1604_v53 }
 0x2dc   : > { %v994_v55 = vsel %vm764_vm5, %v988_v54, -inf  ;;  %1568 = vmatprep.subr.bf16.mxu1 %v1634_v1 }
 0x2dd   : > { %995 = vmax.xlane.f32.xlu0 %v994_v55  ;;  %v1546_v56 = vpop.f32.mrf.mxu1  ;;  %v1606_v55 = vld [vmem:[%s1915_s8 + $0x8] sm:$0xff]  }
 0x2df   : > { %v991_v57 = vpop.f32.mrf.mxu1 }
 0x2e1   : > { %v1547_v58 = vpop.f32.mrf.mxu1 }
 0x2e2   : > { %v1607_v58 = vld [vmem:[%s1915_s8] sm:$0xff]  }
 0x2e3   : > { %v1100_v59 = vpop.f32.mrf.mxu1 }
 0x2e4   : > { %v1106_v60 = vsel %vm764_vm5, %v1100_v59, -inf }
 0x2e5   : > { %1107 = vmax.xlane.f32.xlu0 %v1106_v60  ;;  %v1558_v61 = vpop.f32.mrf.mxu1 }
 0x2e7   : > { %v1103_v62 = vpop.f32.mrf.mxu1 }
 0x2e9   : > { %v1559_v63 = vpop.f32.mrf.mxu1 }
 0x2ec   : > { %v767_v0 = vpop.xlane.xlu0 %766 }
 0x2ed   : > { %v768_v2 = vsub.f32 %v758_v44, %v767_v0 }
 0x2ef   : > { %v769_v3 = vmul.f32 1.442695, %v768_v2 }
 0x2f1   : > { %1608 = vpow2.f32 %v769_v3 }
 0x2fe   : > { %v1609_v4 = vpop.eup %1608 }
 0x2ff   : > { %v771_v5 = vsel %vm764_vm5, %v1609_v4, 0.0 }
 0x300   : > { %772 = vadd.xlane.f32.xlu1 %v771_v5 }
 0x311   : > { %779 = vrot.lane.b32.xlu1 %v1791_v23, %s1639_s18 }
 0x35e   : > { %v884_v6 = vpop.xlane.xlu1 %883 }
 0x35f   : > { %v885_v7 = vsub.f32 %v876_v49, %v884_v6 }
 0x361   : > { %v886_v8 = vmul.f32 1.442695, %v885_v7 }
 0x363   : > { %1610 = vpow2.f32 %v886_v8 }
 0x366   : > { %v996_v9 = vpop.xlane.xlu0 %995 }
 0x367   : > { %v997_v10 = vsub.f32 %v988_v54, %v996_v9  ;;  %v1605_v54 = vld [vmem:[%s1915_s8 + $0x10] sm:$0xff]  }
 0x368   : > { %1569 = vmatpush3.bf16.msra.mxu1 %v1605_v54 }
 0x369   : > { %v998_v11 = vmul.f32 1.442695, %v997_v10  ;;  %1570 = vmatprep.subr.bf16.mxu1 %v1634_v1 }
 0x36b   : > { %1612 = vpow2.f32 %v998_v11 }
 0x36c   : > { %1571 = vmatpush3.bf16.msra.mxu1 %v1606_v55 }
 0x36d   : > { %1572 = vmatprep.subr.bf16.mxu1 %v1634_v1 }
 0x36e   : > { %v1108_v12 = vpop.xlane.xlu0 %1107 }
 0x36f   : > { %v1109_v13 = vsub.f32 %v1100_v59, %v1108_v12  ;;  %v1453_v12 = vld [vmem:[%s1916_s9] ss:$0 sm:$0xff] }
 0x370   : > { %v1611_v15 = vpop.eup %1610  ;;  %1573 = vmatpush3.bf16.msra.mxu1 %v1607_v58 }
 0x371   : > { %v1110_v16 = vmul.f32 1.442695, %v1109_v13  ;;  %v888_v17 = vsel %vm764_vm5, %v1611_v15, 0.0 }
 0x372   : > { %889 = vadd.xlane.f32.xlu0 %v888_v17 }
 0x373   : > { %1614 = vpow2.f32 %v1110_v16 }
 0x378   : > { %v1613_v18 = vpop.eup %1612 }
 0x379   : > { %v1000_v19 = vsel %vm764_vm5, %v1613_v18, 0.0 }
 0x37a   : > { %1001 = vadd.xlane.f32.xlu1 %v1000_v19 }
 0x380   : > { %v1615_v20 = vpop.eup %1614 }
 0x381   : > { %v1112_v21 = vsel %vm764_vm5, %v1615_v20, 0.0 }
 0x382   : > { %1113 = vadd.xlane.f32.xlu0 %v1112_v21  ;;  %v1644_v21 = vmov 0  }
 0x383   : > { %1597 = vset.pattern.permute.xlu0 %v1644_v21 }
 0x389   : > { %v773_v25 = vpop.xlane.xlu1 %772 }
 0x38a   : > { %1616 = vrcp.f32 %v773_v25 }
 0x38b   : > { %1008 = vrot.lane.b32.xlu1 %v1791_v23, %s1641_s19 }
 0x38d   : > { %v780_v27 = vpop.permute.xlu1 %779 }
 0x38e   : > { %v789_v28 = vand.u32 %v787_v26, %v780_v27 }
 0x38f   : > { %1120 = vrot.lane.b32.xlu1 %v1791_v23, %s1642_s20 }
 0x390   : > { %1525 = vmatpush3.bf16.msra.mxu0 %v789_v28 }
 0x391   : > { %1536 = vmatprep.subr.bf16.mxu0 %v1634_v1 }
 0x397   : > { %v1617_v29 = vpop.eup %1616 }
 0x398   : > { %896 = vrot.lane.b32.xlu0 %v1791_v23, %s1643_s26  ;;  %v775_v30 = vmul.f32 %v1617_v29, %v1609_v4 }
 0x39a   : > { %776 = vst.msk [vmem:[%s1838_s25] sm:$0xff] %vm764_vm5, %v775_v30  ;;  %v777_v31 = vpack.c.bf16 %v775_v30, %v775_v30 }
 0x39c   : > { %1527 = vmatmul.mubr.msk.bf16.vlgmr.msra.gmra.mxu0 %vm764_vm5, %v777_v31 }
 0x39d   : > { %1538 = vmatprep.mubr.msk.bf16.mxu0 %vm1635_vm0, %v1634_v1 }
 0x3fb   : > { %v890_v32 = vpop.xlane.xlu0 %889 }
 0x3fc   : > { %1618 = vrcp.f32 %v890_v32  ;;  %v1459_v32 = vld [vmem:[%s1917_s10] ss:$0 sm:$0xff] }
 0x403   : > { %v1002_v33 = vpop.xlane.xlu1 %1001 }
 0x404   : > { %1620 = vrcp.f32 %v1002_v33 }
 0x407   : > { %v1009_v39 = vpop.permute.xlu1 %1008 }
 0x408   : > { %v1014_v42 = vand.u32 %v1009_v39, %v787_v26 }
 0x409   : > { %v1619_v34 = vpop.eup %1618 }
 0x40a   : > { %v892_v35 = vmul.f32 %v1619_v34, %v1611_v15  ;;  %v1460_v34 = vld [vmem:[%s1918_s11] ss:$0 sm:$0xff] }
 0x40b   : > { %v1114_v36 = vpop.xlane.xlu0 %1113  ;;  %v1121_v44 = vpop.permute.xlu1 %1120 }
 0x40c   : > { %1622 = vrcp.f32 %v1114_v36  ;;  %1445 = vst.msk [vmem:[%s1838_s25 + $0x8] sm:$0xff] %vm764_vm5, %v892_v35  ;;  %v895_v41 = vpack.c.bf16 %v892_v35, %v892_v35  ;;  %v1126_v47 = vand.u32 %v1121_v44, %v787_v26 }
 0x40f   : > { %v897_v23 = vpop.permute.xlu0 %896 }
 0x410   : > { %v902_v37 = vand.u32 %v897_v23, %v787_v26 }
 0x411   : > { %v1621_v38 = vpop.eup %1620 }
 0x412   : > { %1537 = vmatpush3.bf16.msra.mxu0 %v902_v37  ;;  %v1004_v40 = vmul.f32 %v1621_v38, %v1613_v18 }
 0x413   : > { %1548 = vmatprep.subr.bf16.mxu0 %v1634_v1 }
 0x414   : > { %1448 = vst.msk [vmem:[%s1838_s25 + $0x10] sm:$0xff] %vm764_vm5, %v1004_v40  ;;  %v1007_v46 = vpack.c.bf16 %v1004_v40, %v1004_v40 }
 0x415   : > { %1539 = vmatmul.mubr.msk.bf16.vlgmr.msra.gmra.mxu0 %vm764_vm5, %v895_v41 }
 0x416   : > { %1549 = vmatpush3.bf16.msra.mxu0 %v1014_v42  ;;  %1550 = vmatprep.mubr.msk.bf16.mxu0 %vm1635_vm0, %v1634_v1 }
 0x417   : > { %1560 = vmatprep.subr.bf16.mxu0 %v1634_v1 }
 0x419   : > { %v1623_v43 = vpop.eup %1622 }
 0x41a   : > { %v1116_v45 = vmul.f32 %v1623_v43, %v1615_v20 }
 0x41c   : > { %1451 = vst.msk [vmem:[%s1838_s25 + $0x18] sm:$0xff] %vm764_vm5, %v1116_v45  ;;  %v1119_v48 = vpack.c.bf16 %v1116_v45, %v1116_v45 }
 0x41d   : > { %1551 = vmatmul.mubr.msk.bf16.vlgmr.msra.gmra.mxu0 %vm764_vm5, %v1007_v46 }
 0x41e   : > { %1561 = vmatpush3.bf16.msra.mxu0 %v1126_v47  ;;  %1562 = vmatprep.mubr.msk.bf16.mxu0 %vm1635_vm0, %v1634_v1 }
 0x425   : > { %1563 = vmatmul.mubr.msk.bf16.vlgmr.msra.gmra.mxu0 %vm764_vm5, %v1119_v48 }
 0x45c   : > { %v825_v49 = vpop.f32.mrf.mxu0 }
 0x45e   : > { %v1528_v50 = vpop.f32.mrf.mxu0 }
 0x460   : > { %v828_v51 = vpop.f32.mrf.mxu0 }
 0x462   : > { %v1529_v52 = vpop.f32.mrf.mxu0 }
 0x4d5   : > { %v938_v56 = vpop.f32.mrf.mxu0 }
 0x4d6   : > { %1169 = vrot.lane.b32.xlu0 %v938_v56, %s1642_s20 }
 0x4d7   : > { %v1540_v57 = vpop.f32.mrf.mxu0 }
 0x4d9   : > { %v941_v59 = vpop.f32.mrf.mxu0 }
 0x4db   : > { %v1541_v60 = vpop.f32.mrf.mxu0 }
 0x4dd   : > { %v1050_v61 = vpop.f32.mrf.mxu0 }
 0x4de   : > { %1173 = vrot.lane.b32.xlu1 %v1050_v61, %s1641_s19 }
 0x4df   : > { %v1552_v62 = vpop.f32.mrf.mxu0 }
 0x4e1   : > { %v1053_v63 = vpop.f32.mrf.mxu0 }
 0x4e3   : > { %v1553_v0 = vpop.f32.mrf.mxu0 }
 0x4e5   : > { %v1162_v2 = vpop.f32.mrf.mxu0 }
 0x4e6   : > { %1177 = vrot.lane.b32.xlu0 %v1162_v2, %s1643_s26 }
 0x4e7   : > { %v1564_v3 = vpop.f32.mrf.mxu0 }
 0x4e9   : > { %v1165_v4 = vpop.f32.mrf.mxu0 }
 0x4eb   : > { %v1565_v5 = vpop.f32.mrf.mxu0 }
 0x548   : > { %v1170_v1 = vpop.permute.xlu0 %1169 }
 0x549   : > { %v1180_v7 = vsel %vm717_vm4, %v825_v49, %v1170_v1 }
 0x550   : > { %v1174_v6 = vpop.permute.xlu1 %1173 }
 0x551   : > { %v1181_v8 = vsel %vm535_vm2, %v1180_v7, %v1174_v6 }
 0x558   : > { %v1178_v9 = vpop.permute.xlu0 %1177 }
 0x559   : > { %v1183_v10 = vsel %vm1182_vm8, %v1181_v8, %v1178_v9 }
 0x55a   : > { %v1184_v11 = vpack.c.bf16 %v1183_v10, %v1183_v10 }
 0x55c   : > { %1575 = vmatmul.mubr.msk.bf16.vlgmr.msra.gmra.mxu1 %vm1224_vm9, %v1184_v11 }
 0x61c   : > { %v1262_v13 = vpop.f32.mrf.mxu1 }
 0x61d   : > { %v1263_v15 = vadd.f32 %v1453_v12, %v1262_v13 }
 0x61e   : > { %v1576_v16 = vpop.f32.mrf.mxu1 }
 0x61f   : > { %v1268_v17 = vadd.f32 %v1263_v15, %v1781_v14  ;;  %v1299_v14 = vld [vmem:[%s500_s28] sm:$0xff] }
 0x620   : > { %v1265_v18 = vpop.f32.mrf.mxu1 }
 0x621   : > { %v1269_v19 = vsel %vm599_vm3, %v1268_v17, 0.0 }
 0x622   : > { %1270 = vadd.xlane.f32.xlu1 %v1269_v19  ;;  %v1577_v20 = vpop.f32.mrf.mxu1 }
 0x6ab   : > { %v1271_v22 = vpop.xlane.xlu1 %1270 }
 0x6ac   : > { %v1273_v24 = vmul.f32 0.041666668, %v1271_v22 }
 0x6ae   : > { %v1274_v25 = vsub.f32 %v1268_v17, %v1273_v24 }
 0x6b0   : > { %v1275_v26 = vmul.f32 %v1274_v25, %v1274_v25 }
 0x6b2   : > { %v1276_v27 = vsel %vm599_vm3, %v1275_v26, 0.0 }
 0x6b3   : > { %1277 = vadd.xlane.f32.xlu0 %v1276_v27 }
 0x6c9   : > { %1302 = vperm.xlu0 %1597, %v1299_v14  }
 0x73c   : > { %v1278_v28 = vpop.xlane.xlu0 %1277 }
 0x73d   : > { %v1279_v29 = vmul.f32 0.041666668, %v1278_v28 }
 0x73f   : > { %v1280_v30 = vadd.f32 1e-05, %v1279_v29 }
 0x741   : > { %1624 = vrsqrt.f32 %v1280_v30 }
 0x744   : > { %v1303_v36 = vpop.permute.xlu0 %1302 }
 0x74e   : > { %v1625_v31 = vpop.eup %1624 }
 0x74f   : > { %v1282_v33 = vmul.f32 %v1625_v31, %v1274_v25 }
 0x751   : > { %v1290_v35 = vmul.f32 %v1459_v32, %v1282_v33 }
 0x753   : > { %v1298_v23 = vadd.f32 %v1460_v34, %v1290_v35 }
 0x755   : > { %v1305_v37 = vmul.f32 %v1303_v36, %v1298_v23 }
 0x757   : > { %v1306_v38 = vpack.c.bf16 %v1305_v37, %v1305_v37 }
 0x759   : > { %1308 = vst.msk [vmem:[%s504_s22] sm:$0xf] %vm1307_vm10, %v1306_v38 }
 0x75a PF: > { %s25_s29 = sadd.s32 1, %s1632_s29  }
 0x75b   : > { %p22_p4 = scmp.ge.s32.totalorder %s25_s29, 4  }
 0x75d   :  { %24 = sbr.rel (!%p22_p4) target bundleno = 1 (0x1), region = 123 }

// kernel: _lambda_.6
= control target key start
LH: loop header
LB: loop body
LE: loop exit
PB: predicated region body
PF: predicated region fallthrough
CT: control target
= control target key end

     0   :  { %s2311_s0 = inlined_call_operand.vmem [shape: bf16[2,8,24], index: 0, kind: input, shape index: {}]   ;;  %s2312_s1 = inlined_call_operand.vmem [shape: f32[2,8,48], index: 1, kind: input, shape index: {}]   ;;  %s2313_s2 = inlined_call_operand.vmem [shape: bf16[24,48], index: 2, kind: input, shape index: {}]   ;;  %s2314_s3 = inlined_call_operand.vmem [shape: f32[1,48], index: 3, kind: input, shape index: {}]   ;;  %s2315_s4 = inlined_call_operand.vmem [shape: bf16[48,64], index: 4, kind: input, shape index: {}]   ;;  %s2316_s5 = inlined_call_operand.vmem [shape: f32[1,64], index: 5, kind: input, shape index: {}]   ;;  %s2317_s6 = inlined_call_operand.vmem [shape: bf16[48,128], index: 6, kind: input, shape index: {}]   ;;  %s2318_s7 = inlined_call_operand.vmem [shape: f32[1,128], index: 7, kind: input, shape index: {}]   ;;  %s2319_s8 = inlined_call_operand.vmem [shape: bf16[64,48], index: 8, kind: input, shape index: {}]   ;;  %s2320_s9 = inlined_call_operand.vmem [shape: f32[1,48], index: 9, kind: input, shape index: {}]   ;;  %s2321_s10 = inlined_call_operand.vmem [shape: f32[1,48], index: 10, kind: input, shape index: {}]   ;;  %s2322_s11 = inlined_call_operand.vmem [shape: f32[1,48], index: 11, kind: input, shape index: {}]   ;;  %s2323_s12 = inlined_call_operand.vmem [shape: f32[2,4,8,5], index: 12, kind: input, shape index: {}]   ;;  %s2324_s13 = inlined_call_operand.vmem [shape: f32[2,8,1], index: 13, kind: input, shape index: {}]   ;;  %s2325_s14 = inlined_call_operand.vmem [shape: bf16[2,8,48], index: 14, kind: output, shape index: {0}]   ;;  %s2326_s15 = inlined_call_operand.hbm [shape: f32[2,4,8,8], index: 15, kind: output, shape index: {1}]  }
   0x1   :  { %2334 = sst [smem:[#allocation9_spill]] %s2311_s0 }
   0x2   :  { %2335 = sst [smem:[#allocation10_spill]] %s2312_s1 }
   0x3   :  { %2336 = sst [smem:[#allocation11_spill]] %s2313_s2 }
   0x4   :  { %2337 = sst [smem:[#allocation12_spill]] %s2314_s3 }
   0x5   :  { %21 = vsyncpa [#allocation3], 0 }
   0x6   :  { %23 = vsyncpa [#allocation3 + $0x1], 0  ;;  %s2007_s18 = smov 0   ;;  %s2009_s19 = smov 0  }
   0x7   :  { %s2011_s20 = smov 0   ;;  %s2013_s21 = smov 0  }
   0x8 LB: > { %2338 = sst [smem:[#allocation5_spill]] %s1904_s20  ;;  %s2028_s22 = sadd.s32 4294967295, %s1908_s21   ;;  %s1908_s21 = sphi %s2013_s21, %s2352_s21   ;;  %s1904_s20 = sphi %s2011_s20, %s2354_s20   ;;  %s1900_s19 = sphi %s2009_s19, %s2356_s19   ;;  %s1896_s18 = sphi %s2007_s18, %s2355_s18  }
   0x9   : > { %s1588_s23 = sadd.s32 4294967294, %s1908_s21   ;;  %s2032_s24 = sadd.s32 1, %s1908_s21  }
   0xa   : > { %2339 = sst [smem:[#allocation6_spill]] %s2032_s24  ;;  %s376_s25 = sadd.s32 1, %s1904_s20 }
   0xb   : > { %s373_s26 = ssub.s32 %s1908_s21, %s2032_s24  ;;  %p386_p0 = scmp.ne.s32.totalorder %s1904_s20, %s1900_s19 }
   0xc   : > { %p374_p1 = scmp.eq.s32.totalorder %s373_s26, 0  ;;  %p387_p2 = scmp.eq.s32.totalorder %s2028_s22, 1 }
   0xd   : > { %p392_p3 = scmp.ne.s32.totalorder %s1900_s19, %s1896_s18  ;;  %p393_p4 = scmp.eq.s32.totalorder %s1588_s23, 1 }
   0xe   : > { %s2043_s27 = scalar_select %p374_p1, %s1904_s20, %s376_s25  }
   0xf   : > { %p2045_p5 = por %p387_p2, %p386_p0  ;;  %p2049_p6 = por %p393_p4, %p392_p3 }
  0x10   : > { %2340 = sst [smem:[#allocation7_spill]] %s2043_s27  ;;  %p1591_p7 = scmp.ge.s32.totalorder %s1908_s21, 1 }
  0x11   : > { %s2342_s29 = scalar_select %p2049_p6, 1, 0 }
  0x12   : > { %p470_p8 = scmp.lt.s32.totalorder %s1908_s21, 3 }
  0x13   : > { %2343 = sst [smem:[#allocation8_spill]] %s2342_s29 }
  0x14   : > { %p471_p9 = pnand %p1591_p7, %p470_p8 }
  0x15   : > { %s2344_s2 = sld [smem:[#allocation11_spill]] (!%p471_p9)  ;;  %p534_p10 = scmp.lt.s32.totalorder (!%p471_p9), %s2028_s22, 1 }
  0x16   : > { %474 = sbr.rel (%p471_p9) target bundleno = 1900 (0x76c), region = 76  ;;  %s2345_s0 = sld [smem:[#allocation9_spill]] (!%p471_p9) }
  0x17   : > { %s2346_s1 = sld [smem:[#allocation10_spill]] (!%p471_p9)  ;;  %s1912_s27 = smov (!%p471_p9), 112  }
  0x18   : > { %s2347_s3 = sld [smem:[#allocation12_spill]] (!%p471_p9)  ;;  %s1913_s29 = smov (!%p471_p9), 96  }
  0x19   : > { %s1914_s23 = smov (!%p471_p9), 80   ;;  %s1915_s16 = smov (!%p471_p9), 125  }
  0x1b   : > { %v1818_v0 = vld [vmem:[%s2344_s2 + $0x8] ss:$0 sps:$4 sm:$0xff]   ;;  %vm580_vm0 = vcmask 1043456   ;;  %v1910_v1 = vmov 0.0   ;;  %v1819_v3 = vld [vmem:[%s2344_s2] sm:$0xff]   ;;  %vm1911_vm1 = vmmov 0  }
  0x1c   : > { %1674 = vmatprep.subr.bf16.mxu0 %v1910_v1  ;;  %1682 = vmatprep.subr.bf16.mxu1 %v1910_v1  ;;  %v582_v2 = vsel %vm580_vm0, %v1818_v0, 0  ;;  %s2071_s25 = scalar_select %p534_p10, %s2028_s22, 1  ;;  %v1820_v4 = vld [vmem:[%s2317_s6 + $0x10] sm:$0xff]   ;;  %vm576_vm2 = vcmask 195584   ;;  %v1824_v6 = vld [vmem:[%s2315_s4 + $0x8] sm:$0xff]   ;;  %v1822_v9 = vld [vmem:[%s2317_s6] sm:$0xff]  }
  0x1d   : > { %1678 = vmatprep.mubr.msk.bf16.mxu0 %vm1911_vm1, %v1910_v1  ;;  %1688 = vmatprep.mubr.msk.bf16.mxu1 %vm1911_vm1, %v1910_v1  ;;  %v1823_v5 = vld [vmem:[%s2315_s4 + $0x10] sm:$0xff]   ;;  %v1821_v8 = vld [vmem:[%s2317_s6 + $0x8] sm:$0xff]   ;;  %vm656_vm3 = vcmask 392192   ;;  %v1825_v12 = vld [vmem:[%s2315_s4] sm:$0xff]   ;;  %vm779_vm4 = vcmask 130048   ;;  %vm840_vm5 = vcmask 15360  }
  0x1e   : > { %1675 = vmatpush3.bf16.msra.mxu0 %v582_v2  ;;  %s2331_s26 = sshll.u32 %s2071_s25, 2  ;;  %1683 = vmatpush3.bf16.msra.mxu1 %v1823_v5  ;;  %s2333_s30 = sshll.u32 %s2071_s25, 3  ;;  %v1599_v13 = vld [vmem:[%s2347_s3] ss:$0 sm:$0xff]  ;;  %vm842_vm6 = vcmask 31744   ;;  %vm844_vm7 = vcmask 48128  }
  0x1f   : > { %1676 = vmatprep.subr.bf16.mxu0 %v1910_v1  ;;  %s537_s20 = scalar_lea.vmem %s2345_s0, %s2331_s26  ;;  %1684 = vmatprep.subr.bf16.mxu1 %v1910_v1  ;;  %s541_s24 = scalar_lea.vmem %s2346_s1, %s2333_s30  ;;  %v1608_v20 = vld [vmem:[%s2318_s7] ss:$0 sm:$0xff]  ;;  %vm847_vm8 = vcmask 64512   ;;  %vm1317_vm9 = vcmask 261120   ;;  %vm1360_vm10 = vcmask 523264  }
  0x20   : > { %v556_v7 = vld [vmem:[%s537_s20] sm:$0xf]  ;;  %s1640_s17 = sshll.u32 %s2071_s25, 5  ;;  %s1918_s26 = smov 3  }
  0x21   : > { %v700_v10 = vld [vmem:[%s541_s24] sm:$0xff]  ;;  %s546_s24 = scalar_lea.vmem %s2323_s12, %s1640_s17  ;;  %s1920_s17 = smov 32  }
  0x22   : > { %1677 = vmatpush3.bf16.msra.mxu0 %v1819_v3  ;;  %1685 = vmatpush3.bf16.msra.mxu1 %v1824_v6  ;;  %v701_v11 = vpack.c.bf16 %v700_v10, %v700_v10  ;;  %v1603_v28 = vld [vmem:[%s2316_s5] ss:$0 sm:$0xff]  ;;  %v1616_v39 = vld [vmem:[%s546_s24 + $0x8] sm:$0xff]  ;;  %v1620_v40 = vld [vmem:[%s546_s24 + $0x10] sm:$0xff]  ;;  %s1921_s2 = smov 16   ;;  %s2332_s20 = sand.u32 1, %s1900_s19  }
  0x23   : > { %1692 = vmatprep.subr.bf16.mxu0 %v1910_v1  ;;  %1686 = vmatprep.subr.bf16.mxu1 %v1910_v1  ;;  %v826_v38 = vld [vmem:[%s546_s24] sm:$0xff]  ;;  %v1624_v41 = vld [vmem:[%s546_s24 + $0x18] sm:$0xff]  ;;  %s1592_s24 = sshll.u32 %s2332_s20, 5  ;;  %s2349_s0 = sand.u32 1, %s1900_s19  }
  0x24   : > { %s2260_s1 = scalar_lea.sflag [#allocation3], %s2349_s0 }
  0x25   : > { %1679 = vmatmul.mubr.msk.bf16.vlgmr.msra.gmra.mxu0 %vm576_vm2, %v556_v7 }
  0x26   : > { %1693 = vmatpush3.bf16.msra.mxu0 %v1820_v4  ;;  %1698 = vmatprep.mubr.msk.bf16.mxu0 %vm1911_vm1, %v1910_v1 }
  0x27   : > { %1694 = vmatprep.subr.bf16.mxu0 %v1910_v1  ;;  %1687 = vmatpush3.bf16.msra.mxu1 %v1825_v12 }
  0x28   : > { %1702 = vmatprep.subr.bf16.mxu1 %v1910_v1 }
  0x2a   : > { %1695 = vmatpush3.bf16.msra.mxu0 %v1821_v8 }
  0x2b   : > { %1696 = vmatprep.subr.bf16.mxu0 %v1910_v1 }
  0x2e   : > { %1697 = vmatpush3.bf16.msra.mxu0 %v1822_v9 }
  0x2f   : > { %1708 = vmatprep.subr.bf16.mxu0 %v1910_v1 }
  0x31   : > { %1699 = vmatmul.mubr.msk.bf16.vlgmr.msra.gmra.mxu0 %vm656_vm3, %v701_v11 }
  0x32   : > { %1710 = vmatprep.mubr.msk.bf16.mxu0 %vm1911_vm1, %v1910_v1 }
  0xe5   : > { %v618_v14 = vpop.f32.mrf.mxu0 }
  0xe6   : > { %v2118_v15 = vadd.f32 %v1599_v13, %v618_v14 }
  0xe7   : > { %v1680_v16 = vpop.f32.mrf.mxu0 }
  0xe8   : > { %v624_v17 = vpack.c.bf16 %v2118_v15, %v2118_v15 }
  0xe9   : > { %v621_v18 = vpop.f32.mrf.mxu0 }
  0xea   : > { %1689 = vmatmul.mubr.msk.bf16.vlgmr.msra.gmra.mxu1 %vm656_vm3, %v624_v17 }
  0xeb   : > { %v1681_v19 = vpop.f32.mrf.mxu0  ;;  %1704 = vmatprep.mubr.msk.bf16.mxu1 %vm1911_vm1, %v1910_v1 }
  0xf1   : > { %v770_v21 = vpop.f32.mrf.mxu0 }
  0xf2   : > { %v771_v22 = vadd.f32 %v1608_v20, %v770_v21 }
  0xf3   : > { %v1700_v23 = vpop.f32.mrf.mxu0 }
  0xf4   : > { %v2128_v24 = vpack.c.bf16 %v771_v22, %v771_v22 }
  0xf5   : > { %v773_v25 = vpop.f32.mrf.mxu0 }
  0xf6   : > { %913 = vrot.lane.b32.xlu0 %v2128_v24, %s1912_s27  ;;  %1044 = vrot.lane.b32.xlu1 %v2128_v24, %s1913_s29  ;;  %v784_v27 = vsel %vm779_vm4, %v2128_v24, 0 }
  0xf7   : > { %v1701_v26 = vpop.f32.mrf.mxu0  ;;  %1703 = vmatpush3.bf16.xpose.msra.mxu1 %v784_v27 }
  0xf8   : > { %1714 = vmatprep.subr.bf16.mxu1 %v1910_v1 }
 0x168   : > { %v914_v33 = vpop.permute.xlu0 %913  ;;  %v1045_v42 = vpop.permute.xlu1 %1044 }
 0x169   : > { %v919_v37 = vsel %vm779_vm4, %v914_v33, 0  ;;  %v1050_v45 = vsel %vm779_vm4, %v1045_v42, 0 }
 0x1aa   : > { %v694_v29 = vpop.f32.mrf.mxu1 }
 0x1ab   : > { %v695_v30 = vadd.f32 %v1603_v28, %v694_v29 }
 0x1ac   : > { %v1690_v31 = vpop.f32.mrf.mxu1 }
 0x1ad   : > { %v776_v32 = vmul.f32 0.25, %v695_v30 }
 0x1ae   : > { %v697_v34 = vpop.f32.mrf.mxu1 }
 0x1af   : > { %v777_v35 = vpack.c.bf16 %v776_v32, %v776_v32 }
 0x1b0   : > { %v1691_v36 = vpop.f32.mrf.mxu1 }
 0x1b1   : > { %1042 = vrot.lane.b32.xlu1 %v777_v35, %s1913_s29  ;;  %911 = vrot.lane.b32.xlu0 %v777_v35, %s1912_s27  ;;  %s1916_s27 = smov 127   ;;  %s1917_s29 = smov 1  }
 0x1b2   : > { %1705 = vmatmul.mubr.msk.bf16.vlgmr.msra.gmra.mxu1 %vm779_vm4, %v777_v35 }
 0x1b3   : > { %1715 = vmatpush3.bf16.xpose.msra.mxu1 %v919_v37  ;;  %1716 = vmatprep.mubr.msk.bf16.mxu1 %vm1911_vm1, %v1910_v1 }
 0x1b4   : > { %1726 = vmatprep.subr.bf16.mxu1 %v1910_v1 }
 0x1b5   : > { %1173 = vrot.lane.b32.xlu1 %v777_v35, %s1914_s23  ;;  %1175 = vrot.lane.b32.xlu0 %v2128_v24, %s1914_s23  ;;  %s1922_s23 = smov 48  }
 0x1b9   : > { %828 = vrot.lane.b32.xlu0 %v826_v38, %s1915_s16  ;;  %831 = vrot.lane.b32.xlu1 %v826_v38, %s1916_s27 }
 0x1bd   : > { %834 = vrot.lane.b32.xlu0 %v826_v38, %s1917_s29  ;;  %837 = vrot.lane.b32.xlu1 %v826_v38, %s1918_s26 }
 0x1c1   : > { %964 = vrot.lane.b32.xlu0 %v1616_v39, %s1915_s16  ;;  %967 = vrot.lane.b32.xlu1 %v1616_v39, %s1916_s27 }
 0x1c5   : > { %970 = vrot.lane.b32.xlu0 %v1616_v39, %s1917_s29  ;;  %973 = vrot.lane.b32.xlu1 %v1616_v39, %s1918_s26 }
 0x1c9   : > { %1095 = vrot.lane.b32.xlu0 %v1620_v40, %s1915_s16  ;;  %1098 = vrot.lane.b32.xlu1 %v1620_v40, %s1916_s27 }
 0x1cd   : > { %1101 = vrot.lane.b32.xlu0 %v1620_v40, %s1917_s29  ;;  %1104 = vrot.lane.b32.xlu1 %v1620_v40, %s1918_s26 }
 0x1d1   : > { %1226 = vrot.lane.b32.xlu0 %v1624_v41, %s1915_s16  ;;  %1229 = vrot.lane.b32.xlu1 %v1624_v41, %s1916_s27  ;;  %s2193_s16 = scalar_lea.vmem [#allocation2], %s1592_s24  ;;  %s1641_s24 = sshll.u32 %s2028_s22, 9 }
 0x1d2   : > { %s1466_s27 = sshll.u32 %s2193_s16, 4  ;;  %s1924_s22 = smov [#allocation2]   ;;  %s2256_s27 = int_to_ptr.vmem [resolvable:$true] %s1466_s27 }
 0x1d3   : > { %s1848_s3 = scalar_lea.vmem %s2256_s27, 512 }
 0x1d4   : > { %p1849_p11 = scmp.ne.s32.totalorder %s2256_s27, %s1848_s3 }
 0x1d5   : > { %1232 = vrot.lane.b32.xlu0 %v1624_v41, %s1917_s29  ;;  %1235 = vrot.lane.b32.xlu1 %v1624_v41, %s1918_s26  ;;  %s1919_s26 = smov 64  }
 0x1d6   : > { %p1850_p12 = pnand %p1849_p11, %p2045_p5 }
 0x1d8   : > { %p1851_p13 = pneg %p1850_p12 }
 0x223   : > { %v1043_v43 = vpop.permute.xlu1 %1042  ;;  %v912_v44 = vpop.permute.xlu0 %911 }
 0x224   : > { %1717 = vmatmul.mubr.msk.bf16.vlgmr.msra.gmra.mxu1 %vm779_vm4, %v912_v44 }
 0x225   : > { %1727 = vmatpush3.bf16.xpose.msra.mxu1 %v1050_v45  ;;  %1728 = vmatprep.mubr.msk.bf16.mxu1 %vm1911_vm1, %v1910_v1 }
 0x226   : > { %1738 = vmatprep.subr.bf16.mxu1 %v1910_v1 }
 0x227   : > { %v1174_v46 = vpop.permute.xlu1 %1173  ;;  %v1176_v47 = vpop.permute.xlu0 %1175 }
 0x228   : > { %v1181_v50 = vsel %vm779_vm4, %v1176_v47, 0 }
 0x22b   : > { %v829_v48 = vpop.permute.xlu0 %828  ;;  %v832_v49 = vpop.permute.xlu1 %831 }
 0x22c   : > { %1729 = vmatmul.mubr.msk.bf16.vlgmr.msra.gmra.mxu1 %vm779_vm4, %v1043_v43  ;;  %v841_v2 = vsel %vm840_vm5, %v829_v48, %v832_v49 }
 0x22d   : > { %1739 = vmatpush3.bf16.xpose.msra.mxu1 %v1181_v50  ;;  %1740 = vmatprep.mubr.msk.bf16.mxu1 %vm1911_vm1, %v1910_v1 }
 0x22e   : > { %1750 = vmatprep.subr.bf16.mxu1 %v1910_v1 }
 0x22f   : > { %v835_v51 = vpop.permute.xlu0 %834  ;;  %v838_v52 = vpop.permute.xlu1 %837 }
 0x230   : > { %v843_v6 = vsel %vm842_vm6, %v841_v2, %v835_v51 }
 0x231   : > { %v845_v9 = vsel %vm844_vm7, %v843_v6, %v838_v52 }
 0x233   : > { %v965_v53 = vpop.permute.xlu0 %964  ;;  %v968_v54 = vpop.permute.xlu1 %967 }
 0x234   : > { %1741 = vmatmul.mubr.msk.bf16.vlgmr.msra.gmra.mxu1 %vm779_vm4, %v1174_v46  ;;  %v976_v55 = vsel %vm840_vm5, %v965_v53, %v968_v54 }
 0x235   : > { %1758 = vmatprep.mubr.msk.bf16.mxu1 %vm1911_vm1, %v1910_v1 }
 0x237   : > { %v971_v56 = vpop.permute.xlu0 %970  ;;  %v974_v58 = vpop.permute.xlu1 %973 }
 0x238   : > { %v977_v57 = vsel %vm842_vm6, %v976_v55, %v971_v56 }
 0x239   : > { %v978_v18 = vsel %vm844_vm7, %v977_v57, %v974_v58 }
 0x23b   : > { %v1096_v59 = vpop.permute.xlu0 %1095  ;;  %v1099_v60 = vpop.permute.xlu1 %1098 }
 0x23c   : > { %v1107_v61 = vsel %vm840_vm5, %v1096_v59, %v1099_v60 }
 0x23f   : > { %v1102_v62 = vpop.permute.xlu0 %1101  ;;  %v1105_v63 = vpop.permute.xlu1 %1104 }
 0x240   : > { %v1108_v0 = vsel %vm842_vm6, %v1107_v61, %v1102_v62 }
 0x241   : > { %v1109_v26 = vsel %vm844_vm7, %v1108_v0, %v1105_v63 }
 0x243   : > { %v1227_v3 = vpop.permute.xlu0 %1226  ;;  %v1230_v4 = vpop.permute.xlu1 %1229 }
 0x244   : > { %v1238_v5 = vsel %vm840_vm5, %v1227_v3, %v1230_v4 }
 0x247   : > { %v1233_v7 = vpop.permute.xlu0 %1232  ;;  %v1236_v31 = vpop.permute.xlu1 %1235 }
 0x248   : > { %v1239_v8 = vsel %vm842_vm6, %v1238_v5, %v1233_v7 }
 0x249   : > { %v1240_v34 = vsel %vm844_vm7, %v1239_v8, %v1236_v31  ;;  %v1829_v31 = vld [vmem:[%s2319_s8] sm:$0xff]  }
 0x272   : > { %v820_v10 = vpop.f32.mrf.mxu1 }
 0x273   : > { %v846_v11 = vmul.f32 %v845_v9, %v820_v10 }
 0x274   : > { %v1706_v12 = vpop.f32.mrf.mxu1 }
 0x275   : > { %v848_v13 = vsel %vm847_vm8, %v846_v11, -inf }
 0x276   : > { %849 = vmax.xlane.f32.xlu0 %v848_v13  ;;  %v823_v14 = vpop.f32.mrf.mxu1 }
 0x278   : > { %v1707_v16 = vpop.f32.mrf.mxu1 }
 0x2e4   : > { %v955_v17 = vpop.f32.mrf.mxu1 }
 0x2e5   : > { %v979_v19 = vmul.f32 %v978_v18, %v955_v17 }
 0x2e6   : > { %v1718_v20 = vpop.f32.mrf.mxu1 }
 0x2e7   : > { %v980_v21 = vsel %vm847_vm8, %v979_v19, -inf }
 0x2e8   : > { %981 = vmax.xlane.f32.xlu1 %v980_v21  ;;  %v958_v22 = vpop.f32.mrf.mxu1 }
 0x2ea   : > { %v1719_v23 = vpop.f32.mrf.mxu1 }
 0x2ec   : > { %v1086_v25 = vpop.f32.mrf.mxu1 }
 0x2ed   : > { %v1110_v27 = vmul.f32 %v1109_v26, %v1086_v25  ;;  %v1826_v26 = vld [vmem:[%s2319_s8 + $0x18] sm:$0xff]  }
 0x2ee   : > { %v1730_v28 = vpop.f32.mrf.mxu1  ;;  %1751 = vmatpush3.bf16.msra.mxu1 %v1826_v26 }
 0x2ef   : > { %v1111_v29 = vsel %vm847_vm8, %v1110_v27, -inf  ;;  %1752 = vmatprep.subr.bf16.mxu1 %v1910_v1  ;;  %v1828_v28 = vld [vmem:[%s2319_s8 + $0x8] sm:$0xff]  }
 0x2f0   : > { %1112 = vmax.xlane.f32.xlu0 %v1111_v29  ;;  %v1089_v30 = vpop.f32.mrf.mxu1 }
 0x2f2   : > { %v1731_v32 = vpop.f32.mrf.mxu1 }
 0x2f4   : > { %v1217_v33 = vpop.f32.mrf.mxu1 }
 0x2f5   : > { %v1241_v35 = vmul.f32 %v1240_v34, %v1217_v33 }
 0x2f6   : > { %v1742_v36 = vpop.f32.mrf.mxu1 }
 0x2f7   : > { %v1242_v37 = vsel %vm847_vm8, %v1241_v35, -inf }
 0x2f8   : > { %1243 = vmax.xlane.f32.xlu0 %v1242_v37  ;;  %v1220_v38 = vpop.f32.mrf.mxu1 }
 0x2fa   : > { %v1743_v39 = vpop.f32.mrf.mxu1 }
 0x2ff   : > { %v850_v40 = vpop.xlane.xlu0 %849 }
 0x300   : > { %v851_v41 = vsub.f32 %v846_v11, %v850_v40 }
 0x302   : > { %v852_v42 = vmul.f32 1.442695, %v851_v41 }
 0x304   : > { %1830 = vpow2.f32 %v852_v42 }
 0x311   : > { %v1831_v43 = vpop.eup %1830 }
 0x312   : > { %v854_v44 = vsel %vm847_vm8, %v1831_v43, 0.0 }
 0x313   : > { %855 = vadd.xlane.f32.xlu1 %v854_v44 }
 0x324   : > { %862 = vrot.lane.b32.xlu1 %v2128_v24, %s1919_s26 }
 0x371   : > { %v982_v45 = vpop.xlane.xlu1 %981 }
 0x372   : > { %v983_v46 = vsub.f32 %v979_v19, %v982_v45 }
 0x374   : > { %v984_v47 = vmul.f32 1.442695, %v983_v46 }
 0x376   : > { %1832 = vpow2.f32 %v984_v47 }
 0x379   : > { %v1113_v48 = vpop.xlane.xlu0 %1112 }
 0x37a   : > { %v1114_v49 = vsub.f32 %v1110_v27, %v1113_v48  ;;  %v1827_v27 = vld [vmem:[%s2319_s8 + $0x10] sm:$0xff]   ;;  %v1627_v48 = vld [vmem:[%s2320_s9] ss:$0 sm:$0xff] }
 0x37b   : > { %1753 = vmatpush3.bf16.msra.mxu1 %v1827_v27 }
 0x37c   : > { %v1115_v50 = vmul.f32 1.442695, %v1114_v49  ;;  %1754 = vmatprep.subr.bf16.mxu1 %v1910_v1 }
 0x37e   : > { %1834 = vpow2.f32 %v1115_v50 }
 0x37f   : > { %1755 = vmatpush3.bf16.msra.mxu1 %v1828_v28 }
 0x380   : > { %1756 = vmatprep.subr.bf16.mxu1 %v1910_v1 }
 0x381   : > { %v1244_v51 = vpop.xlane.xlu0 %1243 }
 0x382   : > { %v1245_v52 = vsub.f32 %v1241_v35, %v1244_v51 }
 0x383   : > { %v1833_v53 = vpop.eup %1832  ;;  %1757 = vmatpush3.bf16.msra.mxu1 %v1829_v31 }
 0x384   : > { %v1246_v54 = vmul.f32 1.442695, %v1245_v52  ;;  %v986_v55 = vsel %vm847_vm8, %v1833_v53, 0.0 }
 0x385   : > { %987 = vadd.xlane.f32.xlu0 %v986_v55 }
 0x386   : > { %1836 = vpow2.f32 %v1246_v54 }
 0x38b   : > { %v1835_v56 = vpop.eup %1834 }
 0x38c   : > { %v1117_v57 = vsel %vm847_vm8, %v1835_v56, 0.0 }
 0x38d   : > { %1118 = vadd.xlane.f32.xlu1 %v1117_v57 }
 0x393   : > { %v1837_v58 = vpop.eup %1836 }
 0x394   : > { %v1248_v59 = vsel %vm847_vm8, %v1837_v58, 0.0 }
 0x395   : > { %1249 = vadd.xlane.f32.xlu0 %v1248_v59 }
 0x39c   : > { %v856_v60 = vpop.xlane.xlu1 %855 }
 0x39d   : > { %1838 = vrcp.f32 %v856_v60 }
 0x39e   : > { %1125 = vrot.lane.b32.xlu1 %v2128_v24, %s1920_s17 }
 0x3a0   : > { %v863_v61 = vpop.permute.xlu1 %862 }
 0x3a1   : > { %v868_v62 = vsel %vm580_vm0, %v863_v61, 0 }
 0x3a2   : > { %1709 = vmatpush3.bf16.msra.mxu0 %v868_v62  ;;  %1256 = vrot.lane.b32.xlu1 %v2128_v24, %s1921_s2 }
 0x3a3   : > { %1720 = vmatprep.subr.bf16.mxu0 %v1910_v1 }
 0x3aa   : > { %v1839_v63 = vpop.eup %1838 }
 0x3ab   : > { %994 = vrot.lane.b32.xlu0 %v2128_v24, %s1922_s23  ;;  %v858_v0 = vmul.f32 %v1839_v63, %v1831_v43 }
 0x3ad   : > { %859 = vst.msk [vmem:[%s2193_s16] sm:$0xff] %vm847_vm8, %v858_v0  ;;  %v860_v2 = vpack.c.bf16 %v858_v0, %v858_v0 }
 0x3af   : > { %1711 = vmatmul.mubr.msk.bf16.vlgmr.msra.gmra.mxu0 %vm847_vm8, %v860_v2 }
 0x3b0   : > { %1722 = vmatprep.mubr.msk.bf16.mxu0 %vm1911_vm1, %v1910_v1 }
 0x40e   : > { %v988_v3 = vpop.xlane.xlu0 %987 }
 0x40f   : > { %1840 = vrcp.f32 %v988_v3 }
 0x416   : > { %v1119_v4 = vpop.xlane.xlu1 %1118 }
 0x417   : > { %1842 = vrcp.f32 %v1119_v4 }
 0x41a   : > { %v1126_v10 = vpop.permute.xlu1 %1125 }
 0x41b   : > { %v1131_v13 = vsel %vm580_vm0, %v1126_v10, 0 }
 0x41c   : > { %v1841_v5 = vpop.eup %1840 }
 0x41d   : > { %v990_v24 = vmul.f32 %v1841_v5, %v1833_v53 }
 0x41e   : > { %v1250_v6 = vpop.xlane.xlu0 %1249  ;;  %v1257_v16 = vpop.permute.xlu1 %1256 }
 0x41f   : > { %1844 = vrcp.f32 %v1250_v6  ;;  %1617 = vst.msk [vmem:[%s2193_s16 + $0x8] sm:$0xff] %vm847_vm8, %v990_v24  ;;  %v993_v11 = vpack.c.bf16 %v990_v24, %v990_v24  ;;  %v1262_v19 = vsel %vm580_vm0, %v1257_v16, 0 }
 0x422   : > { %v995_v7 = vpop.permute.xlu0 %994 }
 0x423   : > { %v1000_v8 = vsel %vm580_vm0, %v995_v7, 0 }
 0x424   : > { %v1843_v9 = vpop.eup %1842  ;;  %1721 = vmatpush3.bf16.msra.mxu0 %v1000_v8 }
 0x425   : > { %1732 = vmatprep.subr.bf16.mxu0 %v1910_v1  ;;  %v1121_v12 = vmul.f32 %v1843_v9, %v1835_v56  ;;  %v1923_v56 = vmov 0  }
 0x426   : > { %1817 = vset.pattern.permute.xlu0 %v1923_v56 }
 0x427   : > { %1723 = vmatmul.mubr.msk.bf16.vlgmr.msra.gmra.mxu0 %vm847_vm8, %v993_v11  ;;  %1621 = vst.msk [vmem:[%s2193_s16 + $0x10] sm:$0xff] %vm847_vm8, %v1121_v12  ;;  %v1124_v17 = vpack.c.bf16 %v1121_v12, %v1121_v12 }
 0x428   : > { %1733 = vmatpush3.bf16.msra.mxu0 %v1131_v13  ;;  %1734 = vmatprep.mubr.msk.bf16.mxu0 %vm1911_vm1, %v1910_v1 }
 0x429   : > { %1744 = vmatprep.subr.bf16.mxu0 %v1910_v1 }
 0x42c   : > { %v1845_v14 = vpop.eup %1844 }
 0x42d   : > { %v1252_v18 = vmul.f32 %v1845_v14, %v1837_v58 }
 0x42f   : > { %1735 = vmatmul.mubr.msk.bf16.vlgmr.msra.gmra.mxu0 %vm847_vm8, %v1124_v17  ;;  %1625 = vst.msk [vmem:[%s2193_s16 + $0x18] sm:$0xff] %vm847_vm8, %v1252_v18  ;;  %v1255_v20 = vpack.c.bf16 %v1252_v18, %v1252_v18  ;;  %s1852_s16 = sshll.u32 %s1924_s22, 4  ;;  %s1853_s16 = int_to_ptr.vmem [resolvable:$false] %s1852_s16 }
 0x430   : > { %1745 = vmatpush3.bf16.msra.mxu0 %v1262_v19  ;;  %1746 = vmatprep.mubr.msk.bf16.mxu0 %vm1911_vm1, %v1910_v1  ;;  %p1855_p0 = scmp.lt.s32.totalorder %s2256_s27, %s1853_s16 }
 0x437   : > { %1747 = vmatmul.mubr.msk.bf16.vlgmr.msra.gmra.mxu0 %vm847_vm8, %v1255_v20 }
 0x46f   : > { %v904_v21 = vpop.f32.mrf.mxu0 }
 0x471   : > { %v1712_v22 = vpop.f32.mrf.mxu0 }
 0x473   : > { %v907_v23 = vpop.f32.mrf.mxu0 }
 0x475   : > { %v1713_v25 = vpop.f32.mrf.mxu0 }
 0x4e7   : > { %v1036_v29 = vpop.f32.mrf.mxu0 }
 0x4e8   : > { %1305 = vrot.lane.b32.xlu0 %v1036_v29, %s1921_s2  ;;  %s2348_s2 = sshll.u32 %s2071_s25, 3 }
 0x4e9   : > { %v1724_v30 = vpop.f32.mrf.mxu0  ;;  %s550_s26 = scalar_lea.vmem %s2324_s13, %s2348_s2  ;;  %s1854_s2 = scalar_lea.vmem %s1853_s16, 1024 }
 0x4ea   : > { %p1856_p1 = scmp.lt.s32.totalorder %s1854_s2, %s1848_s3 }
 0x4eb   : > { %v1039_v32 = vpop.f32.mrf.mxu0 }
 0x4ec   : > { %p1857_p2 = por %p1856_p1, %p1855_p0 }
 0x4ed   : > { %v1725_v33 = vpop.f32.mrf.mxu0 }
 0x4ee   : > { %p1858_p3 = pnand %p1857_p2, %p1851_p13 }
 0x4ef   : > { %v1167_v34 = vpop.f32.mrf.mxu0 }
 0x4f0   : > { %1309 = vrot.lane.b32.xlu1 %v1167_v34, %s1920_s17  ;;  %s2254_s17 = scalar_lea.hbm %s2326_s15, %s1641_s24 }
 0x4f1   : > { %v1736_v35 = vpop.f32.mrf.mxu0 }
 0x4f3   : > { %v1170_v36 = vpop.f32.mrf.mxu0 }
 0x4f5   : > { %v1737_v37 = vpop.f32.mrf.mxu0 }
 0x4f7   : > { %v1298_v38 = vpop.f32.mrf.mxu0 }
 0x4f8   : > { %1313 = vrot.lane.b32.xlu0 %v1298_v38, %s1922_s23 }
 0x4f9   : > { %v1748_v39 = vpop.f32.mrf.mxu0 }
 0x4fb   : > { %v1301_v40 = vpop.f32.mrf.mxu0 }
 0x4fd   : > { %v1749_v41 = vpop.f32.mrf.mxu0 }
 0x55a   : > { %v1306_v1 = vpop.permute.xlu0 %1305 }
 0x55b   : > { %v1316_v43 = vsel %vm779_vm4, %v904_v21, %v1306_v1 }
 0x562   : > { %v1310_v42 = vpop.permute.xlu1 %1309 }
 0x563   : > { %v1318_v44 = vsel %vm1317_vm9, %v1316_v43, %v1310_v42 }
 0x56a   : > { %v1314_v45 = vpop.permute.xlu0 %1313 }
 0x56b   : > { %v1319_v46 = vsel %vm656_vm3, %v1318_v44, %v1314_v45 }
 0x56c   : > { %v1320_v47 = vpack.c.bf16 %v1319_v46, %v1319_v46 }
 0x56e   : > { %1759 = vmatmul.mubr.msk.bf16.vlgmr.msra.gmra.mxu1 %vm1360_vm10, %v1320_v47 }
 0x62e   : > { %v1398_v49 = vpop.f32.mrf.mxu1 }
 0x62f   : > { %v1399_v50 = vadd.f32 %v1627_v48, %v1398_v49 }
 0x630   : > { %v1760_v51 = vpop.f32.mrf.mxu1 }
 0x631   : > { %v1404_v52 = vadd.f32 %v1399_v50, %v2118_v15  ;;  %v1435_v15 = vld [vmem:[%s550_s26] sm:$0xff] }
 0x632   : > { %v1401_v53 = vpop.f32.mrf.mxu1 }
 0x633   : > { %v1405_v54 = vsel %vm656_vm3, %v1404_v52, 0.0 }
 0x634   : > { %1406 = vadd.xlane.f32.xlu1 %v1405_v54  ;;  %v1761_v55 = vpop.f32.mrf.mxu1 }
 0x6bd   : > { %v1407_v57 = vpop.xlane.xlu1 %1406 }
 0x6be   : > { %v1409_v58 = vmul.f32 0.020833334, %v1407_v57 }
 0x6c0   : > { %v1410_v59 = vsub.f32 %v1404_v52, %v1409_v58 }
 0x6c2   : > { %v1411_v60 = vmul.f32 %v1410_v59, %v1410_v59 }
 0x6c4   : > { %v1412_v61 = vsel %vm656_vm3, %v1411_v60, 0.0 }
 0x6c5   : > { %1413 = vadd.xlane.f32.xlu0 %v1412_v61 }
 0x6db   : > { %1438 = vperm.xlu0 %1817, %v1435_v15  }
 0x6dc   : > { %1861 = shalt.err (!%p1858_p3)
}
 0x6dd   : > { %s1862_s0 = scalar_lea.hbm %s2254_s17, 512  ;;  %s1866_s26 = scalar_lea.hbm %s2326_s15, 1024 }
 0x6de   : > { %p1863_p4 = scmp.ne.s32.totalorder %s2254_s17, %s1862_s0  ;;  %p1867_p9 = scmp.lt.s32.totalorder %s2254_s17, %s2326_s15 }
 0x6df   : > { %p1868_p10 = scmp.lt.s32.totalorder %s1866_s26, %s1862_s0 }
 0x6e0   : > { %p1864_p7 = pnand %p1863_p4, %p2045_p5 }
 0x6e1   : > { %p1869_p11 = por %p1868_p10, %p1867_p9 }
 0x6e2   : > { %p1865_p8 = pneg %p1864_p7 }
 0x6e4   : > { %p1870_p12 = pnand %p1869_p11, %p1865_p8 }
 0x6e6   : > { %1873 = shalt.err (!%p1870_p12)
}
 0x6e7   : > { %s1925_s3 = smov 128   ;;  %s1926_s30 = smov 8   ;;  %v1633_v3 = vld [vmem:[%s2321_s10] ss:$0 sm:$0xff]  ;;  %vm1443_vm11 = vcmask 388096  }
 0x6e8   : > { %1762 = dma.vmem_to_hbm [thread:$0]  (%p2045_p5), %s2256_s27, 512, %s2254_s17, %s2260_s1, %s1925_s3, %s1925_s3, %s1926_s30  }
 0x6e9   : > { %v1634_v5 = vld [vmem:[%s2322_s11] ss:$0 sm:$0xff]  ;;  %s2350_s28 = sshll.u32 %s2071_s25, 2 }
 0x6ea   : > { %s554_s17 = scalar_lea.vmem %s2325_s14, %s2350_s28 }
 0x74e   : > { %v1414_v62 = vpop.xlane.xlu0 %1413 }
 0x74f   : > { %v1415_v63 = vmul.f32 0.020833334, %v1414_v62 }
 0x751   : > { %v1416_v0 = vadd.f32 1e-05, %v1415_v63 }
 0x753   : > { %1846 = vrsqrt.f32 %v1416_v0 }
 0x756   : > { %v1439_v6 = vpop.permute.xlu0 %1438 }
 0x760   : > { %v1847_v2 = vpop.eup %1846 }
 0x761   : > { %v1418_v4 = vmul.f32 %v1847_v2, %v1410_v59 }
 0x763   : > { %v1426_v24 = vmul.f32 %v1633_v3, %v1418_v4 }
 0x765   : > { %v1434_v7 = vadd.f32 %v1634_v5, %v1426_v24 }
 0x767   : > { %v1441_v8 = vmul.f32 %v1439_v6, %v1434_v7 }
 0x769   : > { %v1442_v9 = vpack.c.bf16 %v1441_v8, %v1441_v8 }
 0x76b   : > { %1444 = vst.msk [vmem:[%s554_s17] sm:$0xf] %vm1443_vm11, %v1442_v9 }
 0x76c PF: > { %p1768_p5 = scmp.ge.s32.totalorder %s1908_s21, 2  ;;  %s1488_s23 = sand.u32 1, %s1896_s18  }
 0x76d   : > { %s1489_s26 = scalar_lea.sflag [#allocation3], %s1488_s23 }
 0x76e   : > { %p1765_p13 = pnand %p1768_p5, %p2049_p6 }
 0x770   : > { %p1766_p0 = pneg %p1765_p13 }
 0x772   : > { %1891 = dma.done.wait (%p1766_p0), %s1489_s26, 512  }
 0x773   : > { %1893 = vsyncadd (%p1766_p0), %s1489_s26, 4294966784  ;;  %s2352_s21 = sld [smem:[#allocation6_spill]]  ;;  %s2355_s18 = smov %s1900_s19 }
 0x774   : > { %s2353_s25 = sld [smem:[#allocation5_spill]] }
 0x775   : > { %s2354_s20 = sld [smem:[#allocation7_spill]] }
 0x779   : > { %p26_p1 = scmp.ge.s32.totalorder %s2352_s21, 4  }
 0x77a   : > { %s2356_s19 = smov %s2353_s25 }
 0x77b   :  { %28 = sbr.rel (!%p26_p1) target bundleno = 8 (0x8), region = 138 }
 0x780   :  { %1494 = vsyncpa [#allocation3], 1 }
 0x781   :  { %1496 = vsyncpa [#allocation3 + $0x1], 1 }

</bundles_post_ra>
